<compile_context>
chip_gen: v5e
topology: v5e:2x2
jax: 0.10.0
libtpu: 0.0.40
codegen_flags: <defaults>
</compile_context>

<pallas_src>
import functools
import math

import jax
import jax.numpy as jnp
import numpy as np
from jax import lax
from jax.experimental import pallas as pl
from jax.experimental.pallas import tpu as pltpu


_SCORE_TILE = 2048                 # lane-axis tile for the fused mask-gen matvec
_VMEM_LIMIT = 48 * 1024 * 1024     # <= ~48 MiB: safe on v7x (64 MiB), fine on v5e/v6e


def _round_up(x, m):
    return ((x + m - 1) // m) * m


# ---------------------------------------------------------------------------
# Kernel 1: fused mask-generator output layer.
#   One grid axis over lane tiles of the concatenated W2 slab; the per-tile
#   param id (scalar prefetch, SMEM) selects which hidden vector h_p to use.
#   Pure HBM-bound bf16 matvec, f32 accumulation, raw logits out (no sigmoid).
# ---------------------------------------------------------------------------
def mask_logits_kernel(pid_ref, h_ref, w2_ref, b2_ref, out_ref):
    del pid_ref  # consumed only by the index_maps
    h = h_ref[0]                                   # [1, H_pad] bf16
    out_ref[...] = (
        jnp.dot(h, w2_ref[...], preferred_element_type=jnp.float32) + b2_ref[...]
    )


def fused_mask_logits(seg_param_id, h_stack, w2_cat, b2_cat, *, tile):
    """h_stack [P,1,H_pad] bf16, w2_cat [H_pad,total] bf16, b2_cat [1,total] f32
    -> flat raw logits [1, total] f32 (pre-sigmoid scores, padded segments)."""
    _, _, h_pad = h_stack.shape
    total_cols = w2_cat.shape[1]
    n_tiles = total_cols // tile
    return pl.pallas_call(
        mask_logits_kernel,
        out_shape=jax.ShapeDtypeStruct((1, total_cols), jnp.float32),
        grid_spec=pltpu.PrefetchScalarGridSpec(
            num_scalar_prefetch=1,
            grid=(n_tiles,),
            in_specs=[
                pl.BlockSpec((1, 1, h_pad), lambda j, pid: (pid[j], 0, 0)),
                pl.BlockSpec((h_pad, tile), lambda j, pid: (0, j)),
                pl.BlockSpec((1, tile), lambda j, pid: (0, j)),
            ],
            out_specs=pl.BlockSpec((1, tile), lambda j, pid: (0, j)),
        ),
        compiler_params=pltpu.CompilerParams(
            dimension_semantics=("parallel",),
            vmem_limit_bytes=_VMEM_LIMIT,
        ),
    )(seg_param_id, h_stack, w2_cat, b2_cat)


# ---------------------------------------------------------------------------
# Kernel 2: fused masked base-model MLP (both linears + ReLU in one call).
# Weights arrive in bf16, masks as int8 (single select per element); matmuls
# run on the bf16 MXU path with f32 accumulation; bias/relu in f32.
# ---------------------------------------------------------------------------
def fused_masked_mlp_kernel(x_ref, w1_ref, mw1_ref, b1_ref, mb1_ref,
                            w2_ref, mw2_ref, b2_ref, mb2_ref, out_ref):
    w1 = jnp.where(mw1_ref[...] != 0, w1_ref[...], 0.0).astype(jnp.bfloat16)
    w2 = jnp.where(mw2_ref[...] != 0, w2_ref[...], 0.0).astype(jnp.bfloat16)
    b1 = jnp.where(mb1_ref[...] != 0, b1_ref[...], 0.0)
    b2 = jnp.where(mb2_ref[...] != 0, b2_ref[...], 0.0)
    x = x_ref[...].astype(jnp.bfloat16)
    h = jnp.dot(x, w1, preferred_element_type=jnp.float32) + b1
    h = jnp.maximum(h, 0.0)
    out_ref[...] = jnp.dot(h.astype(jnp.bfloat16), w2,
                           preferred_element_type=jnp.float32) + b2


def fused_masked_mlp(x_pad, base, m_w1, m_b1, m_w2, m_b2):
    # TODO(synk): for real layer sizes, tile this over output features / d_hid
    # (grid + lane-sliced BlockSpecs, f32 VMEM accumulator, reduction axis last
    # with 'arbitrary' semantics) sized for <=~48 MiB working set on v7x.
    b_pad = x_pad.shape[0]
    d_out_pad = base["w2"].shape[1]
    vmem = pl.BlockSpec(memory_space=pltpu.MemorySpace.VMEM)
    return pl.pallas_call(
        fused_masked_mlp_kernel,
        out_shape=jax.ShapeDtypeStruct((b_pad, d_out_pad), jnp.float32),
        in_specs=[vmem] * 9,
        out_specs=vmem,
        compiler_params=pltpu.CompilerParams(vmem_limit_bytes=_VMEM_LIMIT),
    )(x_pad, base["w1"], m_w1, base["b1"], m_b1, base["w2"], m_w2, base["b2"], m_b2)


# ---------------------------------------------------------------------------
# LotteryTicketRouter forward (update_masks + masked base-model forward)
# ---------------------------------------------------------------------------
def make_lottery_forward(meta, sparsity=0.9):
    sparsity = min(0.99, max(0.0, sparsity))       # matches __init__ clamp
    order = meta["param_order"]
    h_pad_dim, tile = meta["H_pad"], meta["tile"]

    @jax.jit
    def forward(x, task_emb, params):
        t2d = task_emb[None, :]

        # --- update_masks ----------------------------------------------------
        # Hidden activations of each mask generator are tiny ([1,E]x[E,H]);
        # computed once in plain XLA and fed to the single fused Pallas matvec.
        h_rows = []
        for name in order:
            h = jnp.maximum(t2d @ params["mg_w1"][name] + params["mg_b1"][name], 0.0)
            h_rows.append(jnp.pad(h, ((0, 0), (0, h_pad_dim - h.shape[1]))))
        h_stack = jnp.stack(h_rows, axis=0).astype(jnp.bfloat16)   # [P,1,H_pad]

        logits_cat = fused_mask_logits(
            params["seg_param_id"], h_stack,
            params["mg_w2_cat"], params["mg_b2_cat"], tile=tile)   # [1,total] f32

        masks = {}
        for name in order:
            start = meta["col_starts"][name]
            flat = meta["flat_dims"][name]
            logits = logits_cat[0, start:start + flat]
            k = max(1, int((1.0 - sparsity) * flat))
            # Threshold in logit space: sigmoid is monotonic, so the mask is
            # identical to the reference's score-space threshold. '>=' keeps
            # >k elements on exact ties (same as the PyTorch reference).
            # TODO(synk): for multi-million-element params replace lax.top_k
            # (full sort) with lax.approx_max_k or a histogram threshold.
            thr = lax.top_k(logits, k)[0][k - 1]
            mask = (logits >= thr).astype(jnp.int8)
            io_shape, pad_shape = meta["io_shapes"][name]
            mask = mask.reshape(io_shape)
            pads = tuple((0, p - s) for s, p in zip(io_shape, pad_shape))
            masks[name] = jnp.pad(mask, pads)

        # --- masked base-model forward ----------------------------------------
        # TODO(synk): if the same task embedding is reused across many forwards,
        # pre-apply the masks to the bf16 weights once instead of re-selecting
        # inside fused_masked_mlp_kernel every call.
        b = x.shape[0]
        b_pad = _round_up(b, 8)
        x_pad = jnp.pad(x, ((0, b_pad - b), (0, meta["d_in_pad"] - meta["d_in"])))
        out_pad = fused_masked_mlp(
            x_pad, params["base"],
            masks["fc1.weight"], masks["fc1.bias"],
            masks["fc2.weight"], masks["fc2.bias"])
        return out_pad[:b, :meta["d_out"]]

    return forward


# ---------------------------------------------------------------------------
# Deterministic init (PyTorch-Linear-style uniform), with all layout prep done
# ONCE here: pre-transposed [in, out] weights, bf16 weight storage, mask-gen
# output columns permuted into W^T order, W2 slabs concatenated + padded to
# tile multiples, and 128-lane / 8-sublane padding of the base-model dims.
# ---------------------------------------------------------------------------
def init_params(key, d_in, d_hid, d_out, emb_dim, score_tile=_SCORE_TILE):
    keys = iter(jax.random.split(key, 64))

    def linear(fan_in, fan_out):
        bound = 1.0 / math.sqrt(fan_in)
        w = jax.random.uniform(next(keys), (fan_out, fan_in), jnp.float32, -bound, bound)
        b = jax.random.uniform(next(keys), (fan_out,), jnp.float32, -bound, bound)
        return np.asarray(w), np.asarray(b)

    # PyTorch-layout base parameters ([out, in] weights).
    fc1_w, fc1_b = linear(d_in, d_hid)      # [d_hid, d_in], [d_hid]
    fc2_w, fc2_b = linear(d_hid, d_out)     # [d_out, d_hid], [d_out]
    torch_params = {"fc1.weight": fc1_w, "fc1.bias": fc1_b,
                    "fc2.weight": fc2_w, "fc2.bias": fc2_b}
    param_order = list(torch_params)

    flat_dims = {n: int(np.prod(p.shape)) for n, p in torch_params.items()}
    hidden_dims = {n: min(2048, max(128, flat_dims[n] // 8)) for n in param_order}
    h_pad_dim = _round_up(max(hidden_dims.values()), 128)
    tile = min(score_tile, _round_up(max(flat_dims.values()), 128))

    mg_w1, mg_b1 = {}, {}
    w2_segs, b2_segs, seg_param_id, col_starts = [], [], [], {}
    col = 0
    for idx, name in enumerate(param_order):
        p = torch_params[name]
        flat_dim, hid = flat_dims[name], hidden_dims[name]
        w1, b1 = linear(emb_dim, hid)       # [hid, emb], [hid]
        w2, b2 = linear(hid, flat_dim)      # [flat, hid], [flat]
        mg_w1[name] = jnp.asarray(w1.T)             # [emb, hid]  (tiny, f32)
        mg_b1[name] = jnp.asarray(b1[None, :])      # [1, hid]
        w2_io = w2.T                                # [hid, flat]
        b2_io = b2[None, :]                         # [1, flat]
        if p.ndim == 2:
            # Permute output columns so flat logits enumerate the parameter in
            # [in, out] (W^T) order: new pos g = i*out_f + o <- old o*in_f + i.
            out_f, in_f = p.shape
            perm = np.arange(flat_dim).reshape(out_f, in_f).T.reshape(-1)
            w2_io = w2_io[:, perm]
            b2_io = b2_io[:, perm]
        flat_pad = _round_up(flat_dim, tile)
        seg_w2 = np.zeros((h_pad_dim, flat_pad), np.float32)
        seg_w2[:hid, :flat_dim] = w2_io
        seg_b2 = np.zeros((1, flat_pad), np.float32)
        seg_b2[:, :flat_dim] = b2_io
        w2_segs.append(seg_w2)
        b2_segs.append(seg_b2)
        seg_param_id.extend([idx] * (flat_pad // tile))
        col_starts[name] = col
        col += flat_pad

    # Dominant stream stored in bf16 (halves HBM bytes; f32 accumulation in-kernel).
    w2_cat = jnp.asarray(np.concatenate(w2_segs, axis=1), dtype=jnp.bfloat16)
    b2_cat = jnp.asarray(np.concatenate(b2_segs, axis=1))
    seg_param_id = jnp.asarray(np.array(seg_param_id, np.int32))

    # Base-model weights: pre-transposed [in, out], 128-lane padded, bf16.
    d_in_pad = _round_up(d_in, 128)
    d_hid_pad = _round_up(d_hid, 128)
    d_out_pad = _round_up(d_out, 128)
    w1_pad = np.zeros((d_in_pad, d_hid_pad), np.float32); w1_pad[:d_in, :d_hid] = fc1_w.T
    b1_pad = np.zeros((1, d_hid_pad), np.float32);        b1_pad[0, :d_hid] = fc1_b
    w2_pad = np.zeros((d_hid_pad, d_out_pad), np.float32); w2_pad[:d_hid, :d_out] = fc2_w.T
    b2_pad = np.zeros((1, d_out_pad), np.float32);         b2_pad[0, :d_out] = fc2_b

    params = {
        "mg_w1": mg_w1,
        "mg_b1": mg_b1,
        "mg_w2_cat": w2_cat,
        "mg_b2_cat": b2_cat,
        "seg_param_id": seg_param_id,
        "base": {
            "w1": jnp.asarray(w1_pad, dtype=jnp.bfloat16),
            "b1": jnp.asarray(b1_pad),
            "w2": jnp.asarray(w2_pad, dtype=jnp.bfloat16),
            "b2": jnp.asarray(b2_pad),
        },
    }
    meta = {
        "param_order": param_order,
        "flat_dims": flat_dims,
        "col_starts": col_starts,
        "io_shapes": {
            "fc1.weight": ((d_in, d_hid), (d_in_pad, d_hid_pad)),
            "fc1.bias":   ((1, d_hid), (1, d_hid_pad)),
            "fc2.weight": ((d_hid, d_out), (d_hid_pad, d_out_pad)),
            "fc2.bias":   ((1, d_out), (1, d_out_pad)),
        },
        "H_pad": h_pad_dim, "tile": tile, "total_cols": col,
        "d_in": d_in, "d_hid": d_hid, "d_out": d_out,
        "d_in_pad": d_in_pad, "d_hid_pad": d_hid_pad, "d_out_pad": d_out_pad,
    }
    return params, meta


if __name__ == "__main__":
    B, D_IN, D_HID, D_OUT, EMB = 4, 32, 64, 32, 128   # task_embedding_dim=128 (default)

    key = jax.random.PRNGKey(0)
    k_x, k_t, k_p = jax.random.split(key, 3)
    x = jax.random.normal(k_x, (B, D_IN), dtype=jnp.float32)
    task_emb = jax.random.normal(k_t, (EMB,), dtype=jnp.float32)
    params, meta = init_params(k_p, D_IN, D_HID, D_OUT, EMB)

    forward = make_lottery_forward(meta, sparsity=0.9)
    out = forward(x, task_emb, params)
    jax.block_until_ready(out)
    assert out.shape == (B, D_OUT) and out.dtype == jnp.float32
    print("KERNEL_OK")
</pallas_src>

<mosaic_0001>
module attributes {stable_mosaic.version = 11 : i64} {
  func.func @mask_logits_kernel(%arg0: i32, %arg1: memref<4xi32, #tpu.memory_space<smem>>, %arg2: memref<1x1x256xbf16, #tpu.memory_space<vmem>>, %arg3: memref<256x2048xbf16, #tpu.memory_space<vmem>>, %arg4: memref<1x2048xf32, #tpu.memory_space<vmem>>, %arg5: memref<1x2048xf32, #tpu.memory_space<vmem>>) attributes {dimension_semantics = [#tpu.dimension_semantics<parallel>], iteration_bounds = array<i64: 4>, scalar_prefetch = 1 : i64, scratch_operands = 0 : i64, tpu.core_type = #tpu.core_type<tc>, window_params = [{transform_indices = @transform_0, window_bounds = array<i64: 1, 1, 256>}, {transform_indices = @transform_1, window_bounds = array<i64: 256, 2048>}, {transform_indices = @transform_2, window_bounds = array<i64: 1, 2048>}, {transform_indices = @transform_3, window_bounds = array<i64: 1, 2048>}]} {
    %c0 = arith.constant 0 : index
    %c0_0 = arith.constant 0 : index
    %c0_1 = arith.constant 0 : index
    %0 = vector.load %arg2[%c0, %c0_0, %c0_1] : memref<1x1x256xbf16, #tpu.memory_space<vmem>>, vector<1x1x256xbf16>
    %1 = vector.shape_cast %0 : vector<1x1x256xbf16> to vector<1x256xbf16>
    %c0_2 = arith.constant 0 : index
    %c0_3 = arith.constant 0 : index
    %2 = vector.load %arg3[%c0_2, %c0_3] : memref<256x2048xbf16, #tpu.memory_space<vmem>>, vector<256x2048xbf16>
    %cst = arith.constant dense<0.000000e+00> : vector<1x2048xf32>
    %3 = tpu.matmul %1, %2, %cst {dimension_numbers = #tpu.dot_dimension_numbers<[1], [0], [0], [1], [0, 0, 1, 1], [], []>} : vector<1x256xbf16>, vector<256x2048xbf16>, vector<1x2048xf32> -> vector<1x2048xf32>
    %c0_4 = arith.constant 0 : index
    %c0_5 = arith.constant 0 : index
    %4 = vector.load %arg4[%c0_4, %c0_5] : memref<1x2048xf32, #tpu.memory_space<vmem>>, vector<1x2048xf32>
    %5 = arith.addf %3, %4 : vector<1x2048xf32>
    %c0_6 = arith.constant 0 : index
    %c0_7 = arith.constant 0 : index
    %6 = vector.load %arg5[%c0_6, %c0_7] : memref<1x2048xf32, #tpu.memory_space<vmem>>, vector<1x2048xf32>
    tpu.vector_store %arg5[%c0_6, %c0_7], %5 {strides = array<i32>} : memref<1x2048xf32, #tpu.memory_space<vmem>>, vector<1x2048xf32>,
    return
  }
  func.func @transform_0(%arg0: i32, %arg1: memref<4xi32, #tpu.memory_space<smem>>) -> (i32, i32, i32) {
    %0 = arith.index_cast %arg0 : i32 to index
    %1 = memref.load %arg1[%0] : memref<4xi32, #tpu.memory_space<smem>>
    %c0_i32 = arith.constant 0 : i32
    %c0_i32_0 = arith.constant 0 : i32
    %c0_i32_1 = arith.constant 0 : i32
    return %1, %c0_i32, %c0_i32_0 : i32, i32, i32
  }
  func.func @transform_1(%arg0: i32, %arg1: memref<4xi32, #tpu.memory_space<smem>>) -> (i32, i32) {
    %c0_i32 = arith.constant 0 : i32
    %c0_i32_0 = arith.constant 0 : i32
    return %c0_i32, %arg0 : i32, i32
  }
  func.func @transform_2(%arg0: i32, %arg1: memref<4xi32, #tpu.memory_space<smem>>) -> (i32, i32) {
    %c0_i32 = arith.constant 0 : i32
    %c0_i32_0 = arith.constant 0 : i32
    return %c0_i32, %arg0 : i32, i32
  }
  func.func @transform_3(%arg0: i32, %arg1: memref<4xi32, #tpu.memory_space<smem>>) -> (i32, i32) {
    %c0_i32 = arith.constant 0 : i32
    %c0_i32_0 = arith.constant 0 : i32
    return %c0_i32, %arg0 : i32, i32
  }
}

module attributes {stable_mosaic.version = 11 : i64} {
  func.func @fused_masked_mlp_kernel(%arg0: memref<8x128xf32, #tpu.memory_space<vmem>>, %arg1: memref<128x128xbf16, #tpu.memory_space<vmem>>, %arg2: memref<128x128xi8, #tpu.memory_space<vmem>>, %arg3: memref<1x128xf32, #tpu.memory_space<vmem>>, %arg4: memref<1x128xi8, #tpu.memory_space<vmem>>, %arg5: memref<128x128xbf16, #tpu.memory_space<vmem>>, %arg6: memref<128x128xi8, #tpu.memory_space<vmem>>, %arg7: memref<1x128xf32, #tpu.memory_space<vmem>>, %arg8: memref<1x128xi8, #tpu.memory_space<vmem>>, %arg9: memref<8x128xf32, #tpu.memory_space<vmem>>) attributes {dimension_semantics = [], scalar_prefetch = 0 : i64, scratch_operands = 0 : i64, tpu.core_type = #tpu.core_type<tc>} {
    %c0 = arith.constant 0 : index
    %c0_0 = arith.constant 0 : index
    %0 = vector.load %arg2[%c0, %c0_0] : memref<128x128xi8, #tpu.memory_space<vmem>>, vector<128x128xi8>
    %c0_i8 = arith.constant 0 : i8
    %1 = vector.broadcast %c0_i8 : i8 to vector<128x128xi8>
    %2 = arith.cmpi ne, %0, %1 : vector<128x128xi8>
    %c0_1 = arith.constant 0 : index
    %c0_2 = arith.constant 0 : index
    %3 = vector.load %arg1[%c0_1, %c0_2] : memref<128x128xbf16, #tpu.memory_space<vmem>>, vector<128x128xbf16>
    %cst = arith.constant 0.000000e+00 : f32
    %4 = arith.truncf %cst : f32 to bf16
    %5 = vector.broadcast %4 : bf16 to vector<128x128xbf16>
    %6 = arith.select %2, %3, %5 : vector<128x128xi1>, vector<128x128xbf16>
    %c0_3 = arith.constant 0 : index
    %c0_4 = arith.constant 0 : index
    %7 = vector.load %arg6[%c0_3, %c0_4] : memref<128x128xi8, #tpu.memory_space<vmem>>, vector<128x128xi8>
    %c0_i8_5 = arith.constant 0 : i8
    %8 = vector.broadcast %c0_i8_5 : i8 to vector<128x128xi8>
    %9 = arith.cmpi ne, %7, %8 : vector<128x128xi8>
    %c0_6 = arith.constant 0 : index
    %c0_7 = arith.constant 0 : index
    %10 = vector.load %arg5[%c0_6, %c0_7] : memref<128x128xbf16, #tpu.memory_space<vmem>>, vector<128x128xbf16>
    %cst_8 = arith.constant 0.000000e+00 : f32
    %11 = arith.truncf %cst_8 : f32 to bf16
    %12 = vector.broadcast %11 : bf16 to vector<128x128xbf16>
    %13 = arith.select %9, %10, %12 : vector<128x128xi1>, vector<128x128xbf16>
    %c0_9 = arith.constant 0 : index
    %c0_10 = arith.constant 0 : index
    %14 = vector.load %arg4[%c0_9, %c0_10] : memref<1x128xi8, #tpu.memory_space<vmem>>, vector<1x128xi8>
    %c0_i8_11 = arith.constant 0 : i8
    %15 = vector.broadcast %c0_i8_11 : i8 to vector<1x128xi8>
    %16 = arith.cmpi ne, %14, %15 : vector<1x128xi8>
    %c0_12 = arith.constant 0 : index
    %c0_13 = arith.constant 0 : index
    %17 = vector.load %arg3[%c0_12, %c0_13] : memref<1x128xf32, #tpu.memory_space<vmem>>, vector<1x128xf32>
    %cst_14 = arith.constant 0.000000e+00 : f32
    %18 = vector.broadcast %cst_14 : f32 to vector<1x128xf32>
    %19 = arith.select %16, %17, %18 : vector<1x128xi1>, vector<1x128xf32>
    %c0_15 = arith.constant 0 : index
    %c0_16 = arith.constant 0 : index
    %20 = vector.load %arg8[%c0_15, %c0_16] : memref<1x128xi8, #tpu.memory_space<vmem>>, vector<1x128xi8>
    %c0_i8_17 = arith.constant 0 : i8
    %21 = vector.broadcast %c0_i8_17 : i8 to vector<1x128xi8>
    %22 = arith.cmpi ne, %20, %21 : vector<1x128xi8>
    %c0_18 = arith.constant 0 : index
    %c0_19 = arith.constant 0 : index
    %23 = vector.load %arg7[%c0_18, %c0_19] : memref<1x128xf32, #tpu.memory_space<vmem>>, vector<1x128xf32>
    %cst_20 = arith.constant 0.000000e+00 : f32
    %24 = vector.broadcast %cst_20 : f32 to vector<1x128xf32>
    %25 = arith.select %22, %23, %24 : vector<1x128xi1>, vector<1x128xf32>
    %c0_21 = arith.constant 0 : index
    %c0_22 = arith.constant 0 : index
    %26 = vector.load %arg0[%c0_21, %c0_22] : memref<8x128xf32, #tpu.memory_space<vmem>>, vector<8x128xf32>
    %27 = arith.truncf %26 : vector<8x128xf32> to vector<8x128xbf16>
    %cst_23 = arith.constant dense<0.000000e+00> : vector<8x128xf32>
    %28 = tpu.matmul %27, %6, %cst_23 {dimension_numbers = #tpu.dot_dimension_numbers<[1], [0], [0], [1], [0, 0, 1, 1], [], []>} : vector<8x128xbf16>, vector<128x128xbf16>, vector<8x128xf32> -> vector<8x128xf32>
    %29 = vector.broadcast %19 : vector<1x128xf32> to vector<8x128xf32>
    %30 = arith.addf %28, %29 : vector<8x128xf32>
    %cst_24 = arith.constant 0.000000e+00 : f32
    %31 = vector.broadcast %cst_24 : f32 to vector<8x128xf32>
    %32 = arith.maximumf %30, %31 : vector<8x128xf32>
    %33 = arith.truncf %32 : vector<8x128xf32> to vector<8x128xbf16>
    %cst_25 = arith.constant dense<0.000000e+00> : vector<8x128xf32>
    %34 = tpu.matmul %33, %13, %cst_25 {dimension_numbers = #tpu.dot_dimension_numbers<[1], [0], [0], [1], [0, 0, 1, 1], [], []>} : vector<8x128xbf16>, vector<128x128xbf16>, vector<8x128xf32> -> vector<8x128xf32>
    %35 = vector.broadcast %25 : vector<1x128xf32> to vector<8x128xf32>
    %36 = arith.addf %34, %35 : vector<8x128xf32>
    %c0_26 = arith.constant 0 : index
    %c0_27 = arith.constant 0 : index
    %37 = vector.load %arg9[%c0_26, %c0_27] : memref<8x128xf32, #tpu.memory_space<vmem>>, vector<8x128xf32>
    tpu.vector_store %arg9[%c0_26, %c0_27], %36 {strides = array<i32>} : memref<8x128xf32, #tpu.memory_space<vmem>>, vector<8x128xf32>,
    return
  }
}

</mosaic_0001>

<bundles_post_ra>
// kernel: forward.2
= control target key start
LH: loop header
LB: loop body
LE: loop exit
PB: predicated region body
PF: predicated region fallthrough
CT: control target
= control target key end

     0   :  { %s3873_s18 = smov [#allocation3]   ;;  %s4640_s0 = inlined_call_operand.hbm [shape: s32[4], index: 0, kind: input, shape index: {}]   ;;  %s4641_s1 = inlined_call_operand.vmem [shape: bf16[4,1,256], index: 1, kind: input, shape index: {}]   ;;  %s4642_s2 = inlined_call_operand.hbm [shape: bf16[256,8192], index: 2, kind: input, shape index: {}]   ;;  %s4643_s3 = inlined_call_operand.hbm [shape: f32[1,8192], index: 3, kind: input, shape index: {}]   ;;  %s4644_s4 = inlined_call_operand.vmem [shape: f32[1,8192], index: 4, kind: output, shape index: {}]  }
   0x1   :  { %s10_s17 = sshll.u32 %s4640_s0, 4  ;;  %s11_s17 = int_to_ptr.hbm [resolvable:$true] %s10_s17 }
   0x2   :  { %13 = dma.hbm_to_smem %s11_s17, 16, %s3873_s18, [#allocation2] }
   0x3   :  { %3847 = dma.done.wait [#allocation2], 16 }
   0x4   :  { %3848 = vsyncadd [#allocation2], 4294967280 }
   0x5   :  { %16 = sfence }
   0x6   :  { %17 = vsyncpa [#allocation5], 0 }
   0x7   :  { %19 = vsyncpa [#allocation5 + $0x1], 0 }
   0x8   :  { %20 = vsyncpa [#allocation7], 0 }
   0x9   :  { %22 = vsyncpa [#allocation7 + $0x1], 0  ;;  %s3905_s19 = smov 0   ;;  %s3907_s20 = smov 0  }
   0xa   :  { %s3909_s21 = smov 0   ;;  %s3911_s22 = smov 0  }
   0xb LB: > { %s3924_s0 = sadd.s32 4294967295, %s3871_s22   ;;  %s3927_s23 = sadd.s32 1, %s3871_s22   ;;  %s3871_s22 = sphi %s3911_s22, %s4652_s22   ;;  %s3867_s21 = sphi %s3909_s21, %s4651_s21   ;;  %s3863_s20 = sphi %s3907_s20, %s4650_s20   ;;  %s3859_s19 = sphi %s3905_s19, %s4649_s19  }
   0xc   : > { %s60_s24 = ssub.s32 %s3871_s22, %s3927_s23  ;;  %s63_s25 = sadd.s32 1, %s3867_s21 }
   0xd   : > { %p61_p0 = scmp.eq.s32.totalorder %s60_s24, 0  ;;  %p70_p1 = scmp.ne.s32.totalorder %s3867_s21, %s3863_s20 }
   0xe   : > { %p71_p2 = scmp.eq.s32.totalorder %s3871_s22, 0  ;;  %p76_p3 = scmp.ne.s32.totalorder %s3863_s20, %s3859_s19 }
   0xf   : > { %s3937_s26 = scalar_select %p61_p0, %s3867_s21, %s63_s25  }
  0x10   : > { %p3939_p4 = por %p71_p2, %p70_p1  ;;  %p77_p5 = scmp.eq.s32.totalorder %s3924_s0, 0 }
  0x11   : > { %p3720_p6 = scmp.lt.s32.totalorder %s3871_s22, 4  ;;  %s3950_s29 = sand.u32 1, %s3867_s21  }
  0x12   : > { %p3945_p7 = por %p77_p5, %p76_p3  ;;  %s2416_s30 = sshll.u32 %s3950_s29, 11 }
  0x13   : > { %s3452_s5 = sshll.u32 %s3871_s22, 6  ;;  %s165_s9 = scalar_lea.vmem [#allocation4], %s2416_s30 }
  0x14   : > { %s170_s8 = scalar_lea.hbm %s4642_s2, %s3452_s5  ;;  %s173_s10 = sshll.u32 %s165_s9, 4  ;;  %s174_s10 = int_to_ptr.vmem [resolvable:$true] %s173_s10 }
  0x15   : > { %s171_s11 = sshll.u32 %s170_s8, 4  ;;  %p3959_p8 = pnand %p3720_p6, %p3939_p4  ;;  %s172_s11 = int_to_ptr.hbm [resolvable:$true] %s171_s11 }
  0x16   : > { %s162_s13 = scalar_lea.sflag [#allocation5], %s3950_s29  ;;  %s3771_s14 = sshra.s32 %s172_s11, 4  ;;  %s3772_s14 = int_to_ptr.hbm [resolvable:$true] %s3771_s14 }
  0x17   : > { %s3773_s15 = scalar_lea.hbm %s3772_s14, 2048  ;;  %p3775_p10 = pneg %p3959_p8 }
  0x18   : > { %p3774_p9 = scmp.ne.s32.totalorder %s3772_s14, %s3773_s15  ;;  %s3778_s18 = scalar_lea.hbm %s4642_s2, 8192 }
  0x19   : > { %p3779_p13 = scmp.lt.s32.totalorder %s3772_s14, %s4642_s2  ;;  %p3780_p0 = scmp.lt.s32.totalorder %s3778_s18, %s3773_s15 }
  0x1a   : > { %p3776_p11 = pnand %p3775_p10, %p3774_p9 }
  0x1b   : > { %p3781_p1 = por %p3780_p0, %p3779_p13 }
  0x1c   : > { %p3777_p12 = pneg %p3776_p11 }
  0x1e   : > { %p3782_p2 = pnand %p3781_p1, %p3777_p12 }
  0x20   : > { %3785 = shalt.err (!%p3782_p2)
}
  0x21   : > { %s3874_s25 = smov 4096   ;;  %s3875_s27 = smov 1024  }
  0x22   : > { %s3876_s30 = smov 64   ;;  %p2421_p3 = scmp.ge.s32.totalorder %s3871_s22, 1 }
  0x23   : > { %3716 = dma.hbm_to_vmem [thread:$0]  (!%p3959_p8), %s172_s11, 32768, %s174_s10, %s162_s13, %s3874_s25, %s3875_s27, %s3876_s30  }
  0x24   : > { %p200_p4 = scmp.lt.s32.totalorder %s3871_s22, 5  ;;  %s2419_s5 = sshll.u32 %s3950_s29, 4 }
  0x25   : > { %s2420_s7 = sshll.u32 %s3871_s22, 4  ;;  %s187_s8 = scalar_lea.vmem [#allocation6], %s2419_s5 }
  0x26   : > { %p3980_p5 = pnand %p2421_p3, %p200_p4  ;;  %s195_s9 = sshll.u32 %s187_s8, 4  ;;  %s196_s9 = int_to_ptr.vmem [resolvable:$true] %s195_s9 }
  0x27   : > { %s191_s16 = scalar_lea.hbm %s4643_s3, %s2420_s7  ;;  %s184_s18 = scalar_lea.sflag [#allocation7], %s3950_s29 }
  0x28   : > { %s193_s17 = sshll.u32 %s191_s16, 4  ;;  %s3808_s19 = scalar_lea.hbm %s4643_s3, 64  ;;  %s194_s17 = int_to_ptr.hbm [resolvable:$true] %s193_s17 }
  0x29   : > { %s3801_s10 = sshra.s32 %s194_s17, 4  ;;  %s3802_s10 = int_to_ptr.hbm [resolvable:$true] %s3801_s10 }
  0x2a   : > { %s3803_s11 = scalar_lea.hbm %s3802_s10, 16  ;;  %p3809_p12 = scmp.lt.s32.totalorder %s3802_s10, %s4643_s3 }
  0x2b   : > { %p3804_p6 = scmp.ne.s32.totalorder %s3802_s10, %s3803_s11  ;;  %p3810_p13 = scmp.lt.s32.totalorder %s3808_s19, %s3803_s11 }
  0x2d   : > { %p3806_p9 = pnand %p3804_p6, %p3775_p10  ;;  %p3811_p0 = por %p3810_p13, %p3809_p12 }
  0x2f   : > { %p3807_p11 = pneg %p3806_p9 }
  0x31   : > { %p3812_p1 = pnand %p3811_p0, %p3807_p11 }
  0x33   : > { %3815 = shalt.err (!%p3812_p1)
}
  0x34   : > { %3719 = dma.hbm_to_vmem [thread:$0]  (!%p3959_p8), %s194_s17, 256, %s196_s9, %s184_s18  }
  0x35   : > { %204 = sbr.rel (%p3980_p5) target bundleno = 463 (0x1cf), region = 32  ;;  %s206_s29 = sand.u32 (!%p3980_p5), 1, %s3863_s20  }
  0x36   : > { %s2422_s27 = sshll.u32 (!%p3980_p5), %s206_s29, 11  ;;  %s207_s30 = scalar_lea.sflag (!%p3980_p5), [#allocation5], %s206_s29 }
  0x37   : > { %s4003_s5 = scalar_lea.vmem (!%p3980_p5), [#allocation4], %s2422_s27 }
  0x3a   : > { %3850 = dma.done.wait (%p3945_p7), %s207_s30, 32768  }
  0x3b   : > { %3852 = vsyncadd (%p3945_p7), %s207_s30, 4294934528  ;;  %s2423_s7 = sshll.u32 %s206_s29, 4  ;;  %s217_s8 = scalar_lea.sflag [#allocation7], %s206_s29 }
  0x3c   : > { %s4009_s12 = scalar_lea.vmem [#allocation6], %s2423_s7 }
  0x3d   : > { %3854 = dma.done.wait (%p3945_p7), %s217_s8, 256  }
  0x3e   : > { %3856 = vsyncadd (%p3945_p7), %s217_s8, 4294967040  ;;  %v2876_v0 = vld [vmem:[%s4003_s5 + $0x380] sm:$0xf]  ;;  %v3565_v5 = vld [vmem:[%s4003_s5 + $0x384] sm:$0xf]  ;;  %s4074_s28 = sld [smem:[#allocation3 + %s3924_s0]] }
  0x3f   : > { %v3573_v1 = vld [vmem:[%s4003_s5 + $0x3bc] sm:$0xf0]  ;;  %v2878_v6 = vld [vmem:[%s4003_s5 + $0x3c0] sm:$0xf0]  ;;  %vm2291_vm0 = vcmask 1040384   ;;  %vm2293_vm1 = vcmask 1042434  }
  0x40   : > { %v3388_v2 = vld [vmem:[%s4003_s5 + $0x780] sm:$0xf]  ;;  %v2877_v3 = vor.u32 %v3573_v1, %v2876_v0  ;;  %v2881_v8 = vor.u32 %v3565_v5, %v2878_v6  ;;  %v3693_v9 = vld [vmem:[%s4003_s5 + $0x784] sm:$0xf]  ;;  %vm2295_vm2 = vcmask 1041408   ;;  %s2425_s16 = sshll.u32 %s3924_s0, 4 }
  0x41   : > { %v3701_v4 = vld [vmem:[%s4003_s5 + $0x7bc] sm:$0xf0]  ;;  %v3390_v10 = vld [vmem:[%s4003_s5 + $0x7c0] sm:$0xf0]  ;;  %p262_p8 = scmp.lt.s32.totalorder %s2425_s16, 63  ;;  %vm2297_vm3 = vcmask 1044484  }
  0x42   : > { %v3389_v7 = vor.u32 %v3701_v4, %v3388_v2  ;;  %v2812_v11 = vld [vmem:[%s4003_s5 + $0x300] sm:$0xf]  ;;  %1845 = vmatpush.bf16.msra.mxu0 %v2877_v3  ;;  %v3393_v12 = vor.u32 %v3693_v9, %v3390_v10  ;;  %1871 = vmatpush.bf16.msra.mxu2 %v2881_v8  ;;  %v3549_v18 = vld [vmem:[%s4003_s5 + $0x304] sm:$0xf]  ;;  %vm2299_vm4 = vcmask 1046534   ;;  %vm2301_vm5 = vcmask 1045508  }
  0x43   : > { %v3557_v13 = vld [vmem:[%s4003_s5 + $0x33c] sm:$0xf0]  ;;  %v2814_v19 = vld [vmem:[%s4003_s5 + $0x340] sm:$0xf0]  ;;  %s4656_s16 = smov (!%p262_p8, %s2425_s16), 63  ;;  %vm2303_vm6 = vcmask 1043456  }
  0x44   : > { %v3324_v14 = vld [vmem:[%s4003_s5 + $0x700] sm:$0xf]  ;;  %1858 = vmatpush.bf16.msra.mxu1 %v3389_v7  ;;  %v2813_v16 = vor.u32 %v3557_v13, %v2812_v11  ;;  %v3677_v20 = vld [vmem:[%s4003_s5 + $0x704] sm:$0xf]  ;;  %1884 = vmatpush.bf16.msra.mxu3 %v3393_v12  ;;  %v2817_v21 = vor.u32 %v3549_v18, %v2814_v19  ;;  %p254_p7 = scmp.lt.s32.totalorder %s4074_s28, 3  ;;  %s4611_s18 = scalar_lea.vmem %s4644_s4, %s4656_s16 }
  0x45   : > { %v3685_v15 = vld [vmem:[%s4003_s5 + $0x73c] sm:$0xf0]  ;;  %v3326_v22 = vld [vmem:[%s4003_s5 + $0x740] sm:$0xf0] }
  0x46   : > { %v3325_v17 = vor.u32 %v3685_v15, %v3324_v14  ;;  %v2748_v23 = vld [vmem:[%s4003_s5 + $0x280] sm:$0xf]  ;;  %v3329_v25 = vor.u32 %v3677_v20, %v3326_v22  ;;  %v3533_v28 = vld [vmem:[%s4003_s5 + $0x284] sm:$0xf]  ;;  %1846 = vmatpush.bf16.msra.mxu0 %v2813_v16  ;;  %1872 = vmatpush.bf16.msra.mxu2 %v2817_v21  ;;  %s4654_s28 = smov (!%p254_p7, %s4074_s28), 3 }
  0x47   : > { %v3541_v24 = vld [vmem:[%s4003_s5 + $0x2bc] sm:$0xf0]  ;;  %v2750_v30 = vld [vmem:[%s4003_s5 + $0x2c0] sm:$0xf0]  ;;  %s2424_s6 = sshll.u32 %s4654_s28, 1 }
  0x48   : > { %v3260_v26 = vld [vmem:[%s4003_s5 + $0x680] sm:$0xf]  ;;  %v2749_v29 = vor.u32 %v3541_v24, %v2748_v23  ;;  %v3661_v31 = vld [vmem:[%s4003_s5 + $0x684] sm:$0xf]  ;;  %1859 = vmatpush.bf16.msra.mxu1 %v3325_v17  ;;  %v2753_v34 = vor.u32 %v3533_v28, %v2750_v30  ;;  %1885 = vmatpush.bf16.msra.mxu3 %v3329_v25  ;;  %v2884_v28 = vld [vmem:[%s4003_s5 + $0x388] sm:$0xf]  ;;  %s257_s15 = scalar_lea.vmem %s4641_s1, %s2424_s6 }
  0x49   : > { %v3669_v27 = vld [vmem:[%s4003_s5 + $0x6bc] sm:$0xf0]  ;;  %v3262_v32 = vld [vmem:[%s4003_s5 + $0x6c0] sm:$0xf0]  ;;  %v3396_v30 = vld [vmem:[%s4003_s5 + $0x788] sm:$0xf] }
  0x4a   : > { %v3261_v33 = vor.u32 %v3669_v27, %v3260_v26  ;;  %v2684_v35 = vld [vmem:[%s4003_s5 + $0x200] sm:$0xf]  ;;  %v3265_v38 = vor.u32 %v3661_v31, %v3262_v32  ;;  %v3517_v40 = vld [vmem:[%s4003_s5 + $0x204] sm:$0xf]  ;;  %1847 = vmatpush.bf16.msra.mxu0 %v2749_v29  ;;  %1873 = vmatpush.bf16.msra.mxu2 %v2753_v34  ;;  %v3574_v29 = vld [vmem:[%s4003_s5 + $0x3c4] sm:$0xf0] }
  0x4b   : > { %v3525_v36 = vld [vmem:[%s4003_s5 + $0x23c] sm:$0xf0]  ;;  %v2686_v41 = vld [vmem:[%s4003_s5 + $0x240] sm:$0xf0]  ;;  %v3702_v32 = vld [vmem:[%s4003_s5 + $0x7c4] sm:$0xf0] }
  0x4c   : > { %v3196_v37 = vld [vmem:[%s4003_s5 + $0x600] sm:$0xf]  ;;  %v3645_v42 = vld [vmem:[%s4003_s5 + $0x604] sm:$0xf]  ;;  %v2685_v44 = vor.u32 %v3525_v36, %v2684_v35  ;;  %1860 = vmatpush.bf16.msra.mxu1 %v3261_v33  ;;  %v2689_v46 = vor.u32 %v3517_v40, %v2686_v41  ;;  %1886 = vmatpush.bf16.msra.mxu3 %v3265_v38  ;;  %v3566_v33 = vld [vmem:[%s4003_s5 + $0x38c] sm:$0xf]  ;;  %v2885_v40 = vor.u32 %v3574_v29, %v2884_v28 }
  0x4d   : > { %v3653_v39 = vld [vmem:[%s4003_s5 + $0x63c] sm:$0xf0]  ;;  %v3198_v43 = vld [vmem:[%s4003_s5 + $0x640] sm:$0xf0]  ;;  %v2886_v34 = vld [vmem:[%s4003_s5 + $0x3c8] sm:$0xf0]  ;;  %v3397_v41 = vor.u32 %v3702_v32, %v3396_v30 }
  0x4e   : > { %v3197_v45 = vor.u32 %v3653_v39, %v3196_v37  ;;  %v2620_v47 = vld [vmem:[%s4003_s5 + $0x180] sm:$0xf]  ;;  %v3201_v50 = vor.u32 %v3645_v42, %v3198_v43  ;;  %v3501_v52 = vld [vmem:[%s4003_s5 + $0x184] sm:$0xf]  ;;  %1848 = vmatpush.bf16.msra.mxu0 %v2685_v44  ;;  %1874 = vmatpush.bf16.msra.mxu2 %v2689_v46  ;;  %v3694_v37 = vld [vmem:[%s4003_s5 + $0x78c] sm:$0xf]  ;;  %v2889_v42 = vor.u32 %v3566_v33, %v2886_v34 }
  0x4f   : > { %v3509_v48 = vld [vmem:[%s4003_s5 + $0x1bc] sm:$0xf0]  ;;  %v2622_v53 = vld [vmem:[%s4003_s5 + $0x1c0] sm:$0xf0]  ;;  %v3398_v38 = vld [vmem:[%s4003_s5 + $0x7c8] sm:$0xf0] }
  0x50   : > { %v3132_v49 = vld [vmem:[%s4003_s5 + $0x580] sm:$0xf]  ;;  %v3629_v54 = vld [vmem:[%s4003_s5 + $0x584] sm:$0xf]  ;;  %v2621_v56 = vor.u32 %v3509_v48, %v2620_v47  ;;  %1861 = vmatpush.bf16.msra.mxu1 %v3197_v45  ;;  %v2625_v58 = vor.u32 %v3501_v52, %v2622_v53  ;;  %1887 = vmatpush.bf16.msra.mxu3 %v3201_v50  ;;  %v2820_v43 = vld [vmem:[%s4003_s5 + $0x308] sm:$0xf]  ;;  %v3401_v46 = vor.u32 %v3694_v37, %v3398_v38 }
  0x51   : > { %v3637_v51 = vld [vmem:[%s4003_s5 + $0x5bc] sm:$0xf0]  ;;  %v3134_v55 = vld [vmem:[%s4003_s5 + $0x5c0] sm:$0xf0]  ;;  %v3558_v44 = vld [vmem:[%s4003_s5 + $0x344] sm:$0xf0] }
  0x52   : > { %v3133_v57 = vor.u32 %v3637_v51, %v3132_v49  ;;  %v2556_v59 = vld [vmem:[%s4003_s5 + $0x100] sm:$0xf]  ;;  %v3137_v62 = vor.u32 %v3629_v54, %v3134_v55  ;;  %v3485_v0 = vld [vmem:[%s4003_s5 + $0x104] sm:$0xf]  ;;  %1849 = vmatpush.bf16.msra.mxu0 %v2621_v56  ;;  %1875 = vmatpush.bf16.msra.mxu2 %v2625_v58  ;;  %v3332_v45 = vld [vmem:[%s4003_s5 + $0x708] sm:$0xf]  ;;  %v2821_v52 = vor.u32 %v3558_v44, %v2820_v43 }
  0x53   : > { %v3493_v60 = vld [vmem:[%s4003_s5 + $0x13c] sm:$0xf0]  ;;  %v2558_v1 = vld [vmem:[%s4003_s5 + $0x140] sm:$0xf0]  ;;  %v3686_v47 = vld [vmem:[%s4003_s5 + $0x744] sm:$0xf0] }
  0x54   : > { %v3068_v61 = vld [vmem:[%s4003_s5 + $0x500] sm:$0xf]  ;;  %v3613_v2 = vld [vmem:[%s4003_s5 + $0x504] sm:$0xf]  ;;  %v2557_v4 = vor.u32 %v3493_v60, %v2556_v59  ;;  %1862 = vmatpush.bf16.msra.mxu1 %v3133_v57  ;;  %v2561_v6 = vor.u32 %v3485_v0, %v2558_v1  ;;  %1888 = vmatpush.bf16.msra.mxu3 %v3137_v62  ;;  %v3550_v48 = vld [vmem:[%s4003_s5 + $0x30c] sm:$0xf]  ;;  %v3333_v54 = vor.u32 %v3686_v47, %v3332_v45 }
  0x55   : > { %v3621_v63 = vld [vmem:[%s4003_s5 + $0x53c] sm:$0xf0]  ;;  %v3070_v3 = vld [vmem:[%s4003_s5 + $0x540] sm:$0xf0]  ;;  %v2822_v49 = vld [vmem:[%s4003_s5 + $0x348] sm:$0xf0] }
  0x56   : > { %v3069_v5 = vor.u32 %v3621_v63, %v3068_v61  ;;  %v2492_v7 = vld [vmem:[%s4003_s5 + $0x80] sm:$0xf]  ;;  %v3073_v10 = vor.u32 %v3613_v2, %v3070_v3  ;;  %v3469_v12 = vld [vmem:[%s4003_s5 + $0x84] sm:$0xf]  ;;  %1850 = vmatpush.bf16.msra.mxu0 %v2557_v4  ;;  %1876 = vmatpush.bf16.msra.mxu2 %v2561_v6  ;;  %v3678_v50 = vld [vmem:[%s4003_s5 + $0x70c] sm:$0xf]  ;;  %v2825_v55 = vor.u32 %v3550_v48, %v2822_v49 }
  0x57   : > { %v3477_v8 = vld [vmem:[%s4003_s5 + $0xbc] sm:$0xf0]  ;;  %v2494_v13 = vld [vmem:[%s4003_s5 + $0xc0] sm:$0xf0]  ;;  %v3334_v51 = vld [vmem:[%s4003_s5 + $0x748] sm:$0xf0] }
  0x58   : > { %v3004_v9 = vld [vmem:[%s4003_s5 + $0x480] sm:$0xf]  ;;  %v3597_v14 = vld [vmem:[%s4003_s5 + $0x484] sm:$0xf]  ;;  %v2493_v16 = vor.u32 %v3477_v8, %v2492_v7  ;;  %1863 = vmatpush.bf16.msra.mxu1 %v3069_v5  ;;  %v2497_v20 = vor.u32 %v3469_v12, %v2494_v13  ;;  %1889 = vmatpush.bf16.msra.mxu3 %v3073_v10  ;;  %v2756_v53 = vld [vmem:[%s4003_s5 + $0x288] sm:$0xf]  ;;  %v3337_v58 = vor.u32 %v3678_v50, %v3334_v51 }
  0x59   : > { %v3605_v11 = vld [vmem:[%s4003_s5 + $0x4bc] sm:$0xf0]  ;;  %v3006_v15 = vld [vmem:[%s4003_s5 + $0x4c0] sm:$0xf0]  ;;  %v3542_v56 = vld [vmem:[%s4003_s5 + $0x2c4] sm:$0xf0] }
  0x5a   : > { %v2428_v17 = vld [vmem:[%s4003_s5] sm:$0xf]  ;;  %v3005_v19 = vor.u32 %v3605_v11, %v3004_v9  ;;  %v3453_v23 = vld [vmem:[%s4003_s5 + $0x4] sm:$0xf]  ;;  %v3009_v24 = vor.u32 %v3597_v14, %v3006_v15  ;;  %1851 = vmatpush.bf16.msra.mxu0 %v2493_v16  ;;  %1877 = vmatpush.bf16.msra.mxu2 %v2497_v20  ;;  %v3268_v57 = vld [vmem:[%s4003_s5 + $0x688] sm:$0xf]  ;;  %v2757_v0 = vor.u32 %v3542_v56, %v2756_v53 }
  0x5b   : > { %v3461_v18 = vld [vmem:[%s4003_s5 + $0x3c] sm:$0xf0]  ;;  %v2430_v25 = vld [vmem:[%s4003_s5 + $0x40] sm:$0xf0]  ;;  %v3670_v59 = vld [vmem:[%s4003_s5 + $0x6c4] sm:$0xf0] }
  0x5c   : > { %v2940_v21 = vld [vmem:[%s4003_s5 + $0x400] sm:$0xf]  ;;  %v3581_v26 = vld [vmem:[%s4003_s5 + $0x404] sm:$0xf]  ;;  %v2429_v31 = vor.u32 %v3461_v18, %v2428_v17  ;;  %1864 = vmatpush.bf16.msra.mxu1 %v3005_v19  ;;  %v2433_v36 = vor.u32 %v3453_v23, %v2430_v25  ;;  %1890 = vmatpush.bf16.msra.mxu3 %v3009_v24  ;;  %v3534_v60 = vld [vmem:[%s4003_s5 + $0x28c] sm:$0xf]  ;;  %v3269_v3 = vor.u32 %v3670_v59, %v3268_v57 }
  0x5d   : > { %v3589_v22 = vld [vmem:[%s4003_s5 + $0x43c] sm:$0xf0]  ;;  %v2942_v27 = vld [vmem:[%s4003_s5 + $0x440] sm:$0xf0]  ;;  %v2758_v61 = vld [vmem:[%s4003_s5 + $0x2c8] sm:$0xf0] }
  0x5e   : > { %v2941_v35 = vor.u32 %v3589_v22, %v2940_v21  ;;  %v2945_v39 = vor.u32 %v3581_v26, %v2942_v27  ;;  %1852 = vmatpush.bf16.msra.mxu0 %v2429_v31  ;;  %1878 = vmatpush.bf16.msra.mxu2 %v2433_v36  ;;  %v3662_v62 = vld [vmem:[%s4003_s5 + $0x68c] sm:$0xf]  ;;  %v2692_v1 = vld [vmem:[%s4003_s5 + $0x208] sm:$0xf]  ;;  %v2761_v4 = vor.u32 %v3534_v60, %v2758_v61  ;;  %v266_v7 = vld [vmem:[%s257_s15] sm:$0x3] }
  0x5f   : > { %v3270_v63 = vld [vmem:[%s4003_s5 + $0x6c8] sm:$0xf0]  ;;  %v3526_v2 = vld [vmem:[%s4003_s5 + $0x244] sm:$0xf0]  ;;  %526 = vst [vmem:[#allocation1] ss:$9 sm:$0xff] %v266_v7 }
  0x60   : > { %1865 = vmatpush.bf16.msra.mxu1 %v2941_v35  ;;  %1891 = vmatpush.bf16.msra.mxu3 %v2945_v39  ;;  %v3204_v5 = vld [vmem:[%s4003_s5 + $0x608] sm:$0xf]  ;;  %v3273_v8 = vor.u32 %v3662_v62, %v3270_v63  ;;  %v3518_v9 = vld [vmem:[%s4003_s5 + $0x20c] sm:$0xf]  ;;  %v2693_v13 = vor.u32 %v3526_v2, %v2692_v1  ;;  %v2892_v63 = vld [vmem:[%s4003_s5 + $0x390] sm:$0xf] }
  0x61   : > { %v3654_v6 = vld [vmem:[%s4003_s5 + $0x644] sm:$0xf0]  ;;  %v2694_v10 = vld [vmem:[%s4003_s5 + $0x248] sm:$0xf0]  ;;  %v3404_v1 = vld [vmem:[%s4003_s5 + $0x790] sm:$0xf] }
  0x62   : > { %1897 = vmatpush.bf16.msrb.mxu0 %v2885_v40  ;;  %1923 = vmatpush.bf16.msrb.mxu2 %v2889_v42  ;;  %v3646_v11 = vld [vmem:[%s4003_s5 + $0x60c] sm:$0xf]  ;;  %v3205_v14 = vor.u32 %v3654_v6, %v3204_v5  ;;  %v2697_v15 = vor.u32 %v3518_v9, %v2694_v10  ;;  %v2628_v16 = vld [vmem:[%s4003_s5 + $0x188] sm:$0xf]  ;;  %v2894_v5 = vld [vmem:[%s4003_s5 + $0x3d0] sm:$0xf0] }
  0x63   : > { %v3206_v12 = vld [vmem:[%s4003_s5 + $0x648] sm:$0xf0]  ;;  %v3510_v17 = vld [vmem:[%s4003_s5 + $0x1c4] sm:$0xf0]  ;;  %v3406_v9 = vld [vmem:[%s4003_s5 + $0x7d0] sm:$0xf0] }
  0x64   : > { %1910 = vmatpush.bf16.msrb.mxu1 %v3397_v41  ;;  %1936 = vmatpush.bf16.msrb.mxu3 %v3401_v46  ;;  %v3140_v18 = vld [vmem:[%s4003_s5 + $0x588] sm:$0xf]  ;;  %v3209_v19 = vor.u32 %v3646_v11, %v3206_v12  ;;  %v3502_v21 = vld [vmem:[%s4003_s5 + $0x18c] sm:$0xf]  ;;  %v2629_v25 = vor.u32 %v3510_v17, %v2628_v16  ;;  %v3340_v16 = vld [vmem:[%s4003_s5 + $0x710] sm:$0xf] }
  0x65   : > { %v3638_v20 = vld [vmem:[%s4003_s5 + $0x5c4] sm:$0xf0]  ;;  %v2630_v22 = vld [vmem:[%s4003_s5 + $0x1c8] sm:$0xf0] }
  0x66   : > { %1898 = vmatpush.bf16.msrb.mxu0 %v2821_v52  ;;  %1924 = vmatpush.bf16.msrb.mxu2 %v2825_v55  ;;  %v3630_v23 = vld [vmem:[%s4003_s5 + $0x58c] sm:$0xf]  ;;  %v2564_v26 = vld [vmem:[%s4003_s5 + $0x108] sm:$0xf]  ;;  %v4129_v28 = vld [vmem:[#allocation1] sm:$0xff]  ;;  %v3141_v29 = vor.u32 %v3638_v20, %v3140_v18  ;;  %v2633_v30 = vor.u32 %v3502_v21, %v2630_v22 }
  0x67   : > { %v3142_v24 = vld [vmem:[%s4003_s5 + $0x5c8] sm:$0xf0]  ;;  %v3494_v27 = vld [vmem:[%s4003_s5 + $0x144] sm:$0xf0]  ;;  %1879 = vmatmul.bf16.vlgmr.msra.gmra.mxu2 %v4129_v28  ;;  %1853 = vmatmul.bf16.vlgmr.msra.gmra.mxu0 %v4129_v28  ;;  %v3687_v18 = vld [vmem:[%s4003_s5 + $0x74c] sm:$0xf0] }
  0x68   : > { %1911 = vmatpush.bf16.msrb.mxu1 %v3333_v54  ;;  %1937 = vmatpush.bf16.msrb.mxu3 %v3337_v58  ;;  %v4131_v31 = vld [vmem:[#allocation1 + $0x9] sm:$0xff]  ;;  %v3145_v33 = vor.u32 %v3630_v23, %v3142_v24  ;;  %v3486_v35 = vld [vmem:[%s4003_s5 + $0x10c] sm:$0xf]  ;;  %v2565_v39 = vor.u32 %v3494_v27, %v2564_v26  ;;  %v2830_v20 = vld [vmem:[%s4003_s5 + $0x350] sm:$0xf0]  ;;  %v3341_v24 = vor.u32 %v3687_v18, %v3340_v16 }
  0x69   : > { %v3076_v32 = vld [vmem:[%s4003_s5 + $0x508] sm:$0xf]  ;;  %v2566_v36 = vld [vmem:[%s4003_s5 + $0x148] sm:$0xf0]  ;;  %1892 = vmatmul.bf16.vlgmr.msra.gmra.mxu3 %v4131_v31  ;;  %1866 = vmatmul.bf16.vlgmr.msra.gmra.mxu1 %v4131_v31  ;;  %v3679_v21 = vld [vmem:[%s4003_s5 + $0x714] sm:$0xf] }
  0x6a   : > { %1899 = vmatpush.bf16.msrb.mxu0 %v2757_v0  ;;  %1925 = vmatpush.bf16.msrb.mxu2 %v2761_v4  ;;  %v3622_v34 = vld [vmem:[%s4003_s5 + $0x544] sm:$0xf0]  ;;  %v3614_v37 = vld [vmem:[%s4003_s5 + $0x50c] sm:$0xf]  ;;  %v2569_v41 = vor.u32 %v3486_v35, %v2566_v36  ;;  %v3575_v0 = vld [vmem:[%s4003_s5 + $0x3cc] sm:$0xf0] }
  0x6b   : > { %v3078_v38 = vld [vmem:[%s4003_s5 + $0x548] sm:$0xf0]  ;;  %v3077_v40 = vor.u32 %v3622_v34, %v3076_v32  ;;  %v2500_v42 = vld [vmem:[%s4003_s5 + $0x88] sm:$0xf]  ;;  %v3567_v4 = vld [vmem:[%s4003_s5 + $0x394] sm:$0xf]  ;;  %v2893_v11 = vor.u32 %v3575_v0, %v2892_v63 }
  0x6c   : > { %1912 = vmatpush.bf16.msrb.mxu1 %v3269_v3  ;;  %1938 = vmatpush.bf16.msrb.mxu3 %v3273_v8  ;;  %v3478_v43 = vld [vmem:[%s4003_s5 + $0xc4] sm:$0xf0]  ;;  %v3081_v45 = vor.u32 %v3614_v37, %v3078_v38  ;;  %v3470_v47 = vld [vmem:[%s4003_s5 + $0x8c] sm:$0xf]  ;;  %v3703_v3 = vld [vmem:[%s4003_s5 + $0x7cc] sm:$0xf0] }
  0x6d   : > { %v3012_v44 = vld [vmem:[%s4003_s5 + $0x488] sm:$0xf]  ;;  %v2502_v48 = vld [vmem:[%s4003_s5 + $0xc8] sm:$0xf0]  ;;  %v2501_v51 = vor.u32 %v3478_v43, %v2500_v42  ;;  %v3695_v8 = vld [vmem:[%s4003_s5 + $0x794] sm:$0xf]  ;;  %v3405_v12 = vor.u32 %v3703_v3, %v3404_v1 }
  0x6e   : > { %1900 = vmatpush.bf16.msrb.mxu0 %v2693_v13  ;;  %1926 = vmatpush.bf16.msrb.mxu2 %v2697_v15  ;;  %v3606_v46 = vld [vmem:[%s4003_s5 + $0x4c4] sm:$0xf0]  ;;  %v3598_v49 = vld [vmem:[%s4003_s5 + $0x48c] sm:$0xf]  ;;  %v2505_v55 = vor.u32 %v3470_v47, %v2502_v48  ;;  %v2897_v13 = vor.u32 %v3567_v4, %v2894_v5  ;;  %v3559_v15 = vld [vmem:[%s4003_s5 + $0x34c] sm:$0xf0]  ;;  %v3409_v17 = vor.u32 %v3695_v8, %v3406_v9 }
  0x6f   : > { %v3014_v50 = vld [vmem:[%s4003_s5 + $0x4c8] sm:$0xf0]  ;;  %v2436_v52 = vld [vmem:[%s4003_s5 + $0x8] sm:$0xf]  ;;  %v3013_v54 = vor.u32 %v3606_v46, %v3012_v44  ;;  %v3342_v22 = vld [vmem:[%s4003_s5 + $0x750] sm:$0xf0] }
  0x70   : > { %1913 = vmatpush.bf16.msrb.mxu1 %v3205_v14  ;;  %1939 = vmatpush.bf16.msrb.mxu3 %v3209_v19  ;;  %v3462_v53 = vld [vmem:[%s4003_s5 + $0x44] sm:$0xf0]  ;;  %v3454_v58 = vld [vmem:[%s4003_s5 + $0xc] sm:$0xf]  ;;  %v3017_v59 = vor.u32 %v3598_v49, %v3014_v50  ;;  %v2828_v14 = vld [vmem:[%s4003_s5 + $0x310] sm:$0xf] }
  0x71   : > { %v2948_v56 = vld [vmem:[%s4003_s5 + $0x408] sm:$0xf]  ;;  %v2438_v60 = vld [vmem:[%s4003_s5 + $0x48] sm:$0xf0]  ;;  %v2437_v2 = vor.u32 %v3462_v53, %v2436_v52  ;;  %v3551_v19 = vld [vmem:[%s4003_s5 + $0x314] sm:$0xf]  ;;  %v2829_v23 = vor.u32 %v3559_v15, %v2828_v14 }
  0x72   : > { %1901 = vmatpush.bf16.msrb.mxu0 %v2629_v25  ;;  %1927 = vmatpush.bf16.msrb.mxu2 %v2633_v30  ;;  %v3590_v57 = vld [vmem:[%s4003_s5 + $0x444] sm:$0xf0]  ;;  %v3582_v61 = vld [vmem:[%s4003_s5 + $0x40c] sm:$0xf]  ;;  %v2441_v7 = vor.u32 %v3454_v58, %v2438_v60  ;;  %v2833_v25 = vor.u32 %v3551_v19, %v2830_v20  ;;  %v2764_v26 = vld [vmem:[%s4003_s5 + $0x290] sm:$0xf]  ;;  %v3345_v30 = vor.u32 %v3679_v21, %v3342_v22 }
  0x73   : > { %v2950_v62 = vld [vmem:[%s4003_s5 + $0x448] sm:$0xf0]  ;;  %v2949_v6 = vor.u32 %v3590_v57, %v2948_v56  ;;  %v3543_v27 = vld [vmem:[%s4003_s5 + $0x2cc] sm:$0xf0]  ;;  %v2766_v34 = vld [vmem:[%s4003_s5 + $0x2d0] sm:$0xf0] }
  0x74   : > { %1914 = vmatpush.bf16.msrb.mxu1 %v3141_v29  ;;  %1940 = vmatpush.bf16.msrb.mxu3 %v3145_v33  ;;  %v2953_v10 = vor.u32 %v3582_v61, %v2950_v62  ;;  %v3276_v29 = vld [vmem:[%s4003_s5 + $0x690] sm:$0xf]  ;;  %v3535_v33 = vld [vmem:[%s4003_s5 + $0x294] sm:$0xf]  ;;  %v2765_v37 = vor.u32 %v3543_v27, %v2764_v26 }
  0x75   : > { %v3671_v32 = vld [vmem:[%s4003_s5 + $0x6cc] sm:$0xf0]  ;;  %v3663_v35 = vld [vmem:[%s4003_s5 + $0x694] sm:$0xf] }
  0x76   : > { %1902 = vmatpush.bf16.msrb.mxu0 %v2565_v39  ;;  %1928 = vmatpush.bf16.msrb.mxu2 %v2569_v41  ;;  %v3278_v36 = vld [vmem:[%s4003_s5 + $0x6d0] sm:$0xf0]  ;;  %v3277_v38 = vor.u32 %v3671_v32, %v3276_v29  ;;  %v2769_v39 = vor.u32 %v3535_v33, %v2766_v34  ;;  %v3527_v41 = vld [vmem:[%s4003_s5 + $0x24c] sm:$0xf0] }
  0x77   : > { %v3212_v42 = vld [vmem:[%s4003_s5 + $0x610] sm:$0xf]  ;;  %v3281_v43 = vor.u32 %v3663_v35, %v3278_v36  ;;  %v2702_v46 = vld [vmem:[%s4003_s5 + $0x250] sm:$0xf0]  ;;  %v2900_v35 = vld [vmem:[%s4003_s5 + $0x398] sm:$0xf] }
  0x78   : > { %1915 = vmatpush.bf16.msrb.mxu1 %v3077_v40  ;;  %1941 = vmatpush.bf16.msrb.mxu3 %v3081_v45  ;;  %v2700_v40 = vld [vmem:[%s4003_s5 + $0x210] sm:$0xf]  ;;  %v3519_v45 = vld [vmem:[%s4003_s5 + $0x214] sm:$0xf]  ;;  %v3576_v36 = vld [vmem:[%s4003_s5 + $0x3d4] sm:$0xf0] }
  0x79   : > { %v3655_v44 = vld [vmem:[%s4003_s5 + $0x64c] sm:$0xf0]  ;;  %v3647_v47 = vld [vmem:[%s4003_s5 + $0x614] sm:$0xf]  ;;  %v2701_v49 = vor.u32 %v3527_v41, %v2700_v40  ;;  %v3568_v40 = vld [vmem:[%s4003_s5 + $0x39c] sm:$0xf] }
  0x7a   : > { %1903 = vmatpush.bf16.msrb.mxu0 %v2501_v51  ;;  %1929 = vmatpush.bf16.msrb.mxu2 %v2505_v55  ;;  %v3214_v48 = vld [vmem:[%s4003_s5 + $0x650] sm:$0xf0]  ;;  %v3213_v50 = vor.u32 %v3655_v44, %v3212_v42  ;;  %v2705_v51 = vor.u32 %v3519_v45, %v2702_v46  ;;  %v2636_v52 = vld [vmem:[%s4003_s5 + $0x190] sm:$0xf]  ;;  %v2902_v41 = vld [vmem:[%s4003_s5 + $0x3d8] sm:$0xf0] }
  0x7b   : > { %v3511_v53 = vld [vmem:[%s4003_s5 + $0x1cc] sm:$0xf0]  ;;  %v3217_v55 = vor.u32 %v3647_v47, %v3214_v48  ;;  %v3503_v57 = vld [vmem:[%s4003_s5 + $0x194] sm:$0xf]  ;;  %v3696_v44 = vld [vmem:[%s4003_s5 + $0x79c] sm:$0xf]  ;;  %v2901_v47 = vor.u32 %v3576_v36, %v2900_v35 }
  0x7c   : > { %1916 = vmatpush.bf16.msrb.mxu1 %v3013_v54  ;;  %1942 = vmatpush.bf16.msrb.mxu3 %v3017_v59  ;;  %v3148_v54 = vld [vmem:[%s4003_s5 + $0x590] sm:$0xf]  ;;  %v2638_v58 = vld [vmem:[%s4003_s5 + $0x1d0] sm:$0xf0]  ;;  %v2637_v61 = vor.u32 %v3511_v53, %v2636_v52  ;;  %v3414_v45 = vld [vmem:[%s4003_s5 + $0x7d8] sm:$0xf0] }
  0x7d   : > { %v3639_v56 = vld [vmem:[%s4003_s5 + $0x5cc] sm:$0xf0]  ;;  %v3631_v59 = vld [vmem:[%s4003_s5 + $0x594] sm:$0xf]  ;;  %v2641_v63 = vor.u32 %v3503_v57, %v2638_v58  ;;  %v3348_v52 = vld [vmem:[%s4003_s5 + $0x718] sm:$0xf]  ;;  %v3417_v53 = vor.u32 %v3696_v44, %v3414_v45 }
  0x7e   : > { %1904 = vmatpush.bf16.msrb.mxu0 %v2437_v2  ;;  %1930 = vmatpush.bf16.msrb.mxu2 %v2441_v7  ;;  %v3150_v60 = vld [vmem:[%s4003_s5 + $0x5d0] sm:$0xf0]  ;;  %v3149_v62 = vor.u32 %v3639_v56, %v3148_v54  ;;  %v2572_v0 = vld [vmem:[%s4003_s5 + $0x110] sm:$0xf]  ;;  %v3688_v54 = vld [vmem:[%s4003_s5 + $0x754] sm:$0xf0] }
  0x7f   : > { %v3495_v1 = vld [vmem:[%s4003_s5 + $0x14c] sm:$0xf0]  ;;  %v3153_v3 = vor.u32 %v3631_v59, %v3150_v60  ;;  %v3487_v5 = vld [vmem:[%s4003_s5 + $0x114] sm:$0xf]  ;;  %v2838_v56 = vld [vmem:[%s4003_s5 + $0x358] sm:$0xf0]  ;;  %v3349_v60 = vor.u32 %v3688_v54, %v3348_v52 }
  0x80   : > { %1917 = vmatpush.bf16.msrb.mxu1 %v2949_v6  ;;  %1943 = vmatpush.bf16.msrb.mxu3 %v2953_v10  ;;  %v3084_v2 = vld [vmem:[%s4003_s5 + $0x510] sm:$0xf]  ;;  %v2574_v6 = vld [vmem:[%s4003_s5 + $0x150] sm:$0xf0]  ;;  %v2573_v9 = vor.u32 %v3495_v1, %v2572_v0  ;;  %v3680_v57 = vld [vmem:[%s4003_s5 + $0x71c] sm:$0xf] }
  0x81   : > { %1931 = vmatmul.bf16.vlgmr.msrb.gmra.mxu2 %v4129_v28  ;;  %1905 = vmatmul.bf16.vlgmr.msrb.gmra.mxu0 %v4129_v28  ;;  %v3623_v4 = vld [vmem:[%s4003_s5 + $0x54c] sm:$0xf0]  ;;  %v3615_v7 = vld [vmem:[%s4003_s5 + $0x514] sm:$0xf]  ;;  %v3350_v58 = vld [vmem:[%s4003_s5 + $0x758] sm:$0xf0] }
  0x82   : > { %1949 = vmatpush.bf16.msra.mxu0 %v2893_v11  ;;  %1975 = vmatpush.bf16.msra.mxu2 %v2897_v13  ;;  %v3086_v8 = vld [vmem:[%s4003_s5 + $0x550] sm:$0xf0]  ;;  %v3085_v10 = vor.u32 %v3623_v4, %v3084_v2  ;;  %v2577_v11 = vor.u32 %v3487_v5, %v2574_v6  ;;  %v3479_v13 = vld [vmem:[%s4003_s5 + $0xcc] sm:$0xf0]  ;;  %v3284_v0 = vld [vmem:[%s4003_s5 + $0x698] sm:$0xf]  ;;  %v3353_v1 = vor.u32 %v3680_v57, %v3350_v58 }
  0x83   : > { %1944 = vmatmul.bf16.vlgmr.msrb.gmra.mxu3 %v4131_v31  ;;  %1918 = vmatmul.bf16.vlgmr.msrb.gmra.mxu1 %v4131_v31  ;;  %v3020_v14 = vld [vmem:[%s4003_s5 + $0x490] sm:$0xf]  ;;  %v3089_v15 = vor.u32 %v3615_v7, %v3086_v8  ;;  %v2510_v18 = vld [vmem:[%s4003_s5 + $0xd0] sm:$0xf0]  ;;  %v3672_v2 = vld [vmem:[%s4003_s5 + $0x6d4] sm:$0xf0] }
  0x84   : > { %1962 = vmatpush.bf16.msra.mxu1 %v3405_v12  ;;  %1988 = vmatpush.bf16.msra.mxu3 %v3409_v17  ;;  %v2508_v12 = vld [vmem:[%s4003_s5 + $0x90] sm:$0xf]  ;;  %v3471_v17 = vld [vmem:[%s4003_s5 + $0x94] sm:$0xf]  ;;  %v2774_v4 = vld [vmem:[%s4003_s5 + $0x2d8] sm:$0xf0]  ;;  %v3285_v8 = vor.u32 %v3672_v2, %v3284_v0 }
  0x85   : > { %v3607_v16 = vld [vmem:[%s4003_s5 + $0x4cc] sm:$0xf0]  ;;  %v3599_v19 = vld [vmem:[%s4003_s5 + $0x494] sm:$0xf]  ;;  %v2509_v21 = vor.u32 %v3479_v13, %v2508_v12  ;;  %v3664_v5 = vld [vmem:[%s4003_s5 + $0x69c] sm:$0xf] }
  0x86   : > { %1950 = vmatpush.bf16.msra.mxu0 %v2829_v23  ;;  %1976 = vmatpush.bf16.msra.mxu2 %v2833_v25  ;;  %v3022_v20 = vld [vmem:[%s4003_s5 + $0x4d0] sm:$0xf0]  ;;  %v2444_v22 = vld [vmem:[%s4003_s5 + $0x10] sm:$0xf]  ;;  %v2513_v25 = vor.u32 %v3471_v17, %v2510_v18  ;;  %v3286_v6 = vld [vmem:[%s4003_s5 + $0x6d8] sm:$0xf0] }
  0x87   : > { %v3463_v23 = vld [vmem:[%s4003_s5 + $0x4c] sm:$0xf0]  ;;  %v3455_v29 = vld [vmem:[%s4003_s5 + $0x14] sm:$0xf]  ;;  %v3220_v12 = vld [vmem:[%s4003_s5 + $0x618] sm:$0xf]  ;;  %v3289_v13 = vor.u32 %v3664_v5, %v3286_v6 }
  0x88   : > { %1963 = vmatpush.bf16.msra.mxu1 %v3341_v24  ;;  %1989 = vmatpush.bf16.msra.mxu3 %v3345_v30  ;;  %v3021_v24 = vor.u32 %v3607_v16, %v3020_v14  ;;  %v2956_v26 = vld [vmem:[%s4003_s5 + $0x410] sm:$0xf]  ;;  %v3025_v30 = vor.u32 %v3599_v19, %v3022_v20  ;;  %v2446_v32 = vld [vmem:[%s4003_s5 + $0x50] sm:$0xf0]  ;;  %v3656_v14 = vld [vmem:[%s4003_s5 + $0x654] sm:$0xf0] }
  0x89   : > { %v3591_v27 = vld [vmem:[%s4003_s5 + $0x44c] sm:$0xf0]  ;;  %v3583_v33 = vld [vmem:[%s4003_s5 + $0x414] sm:$0xf]  ;;  %v2710_v16 = vld [vmem:[%s4003_s5 + $0x258] sm:$0xf0]  ;;  %v3221_v20 = vor.u32 %v3656_v14, %v3220_v12 }
  0x8a   : > { %1951 = vmatpush.bf16.msra.mxu0 %v2765_v37  ;;  %1977 = vmatpush.bf16.msra.mxu2 %v2769_v39  ;;  %v2958_v34 = vld [vmem:[%s4003_s5 + $0x450] sm:$0xf0]  ;;  %v3412_v37 = vld [vmem:[%s4003_s5 + $0x798] sm:$0xf]  ;;  %v2957_v42 = vor.u32 %v3591_v27, %v2956_v26  ;;  %v3648_v17 = vld [vmem:[%s4003_s5 + $0x61c] sm:$0xf] }
  0x8b   : > { %v3704_v39 = vld [vmem:[%s4003_s5 + $0x7d4] sm:$0xf0]  ;;  %v2961_v46 = vor.u32 %v3583_v33, %v2958_v34  ;;  %v3222_v18 = vld [vmem:[%s4003_s5 + $0x658] sm:$0xf0]  ;;  %v2908_v5 = vld [vmem:[%s4003_s5 + $0x3a0] sm:$0xf] }
  0x8c   : > { %1964 = vmatpush.bf16.msra.mxu1 %v3277_v38  ;;  %1990 = vmatpush.bf16.msra.mxu3 %v3281_v43  ;;  %v2445_v38 = vor.u32 %v3463_v23, %v2444_v22  ;;  %v2449_v43 = vor.u32 %v3455_v29, %v2446_v32  ;;  %v3413_v48 = vor.u32 %v3704_v39, %v3412_v37  ;;  %v2644_v22 = vld [vmem:[%s4003_s5 + $0x198] sm:$0xf]  ;;  %v3504_v27 = vld [vmem:[%s4003_s5 + $0x19c] sm:$0xf]  ;;  %v3577_v6 = vld [vmem:[%s4003_s5 + $0x3dc] sm:$0xf0] }
  0x8d   : > { %v3512_v23 = vld [vmem:[%s4003_s5 + $0x1d4] sm:$0xf0]  ;;  %v2646_v29 = vld [vmem:[%s4003_s5 + $0x1d8] sm:$0xf0]  ;;  %v3697_v14 = vld [vmem:[%s4003_s5 + $0x7a4] sm:$0xf] }
  0x8e   : > { %1952 = vmatpush.bf16.msra.mxu0 %v2701_v49  ;;  %1978 = vmatpush.bf16.msra.mxu2 %v2705_v51  ;;  %v2905_v49 = vor.u32 %v3568_v40, %v2902_v41  ;;  %v3560_v51 = vld [vmem:[%s4003_s5 + $0x354] sm:$0xf0]  ;;  %v3158_v32 = vld [vmem:[%s4003_s5 + $0x5d8] sm:$0xf0]  ;;  %v2645_v33 = vor.u32 %v3512_v23, %v2644_v22  ;;  %v2649_v35 = vor.u32 %v3504_v27, %v2646_v29  ;;  %v3356_v22 = vld [vmem:[%s4003_s5 + $0x720] sm:$0xf] }
  0x8f   : > { %v3640_v26 = vld [vmem:[%s4003_s5 + $0x5d4] sm:$0xf0]  ;;  %v3488_v41 = vld [vmem:[%s4003_s5 + $0x11c] sm:$0xf]  ;;  %v3681_v27 = vld [vmem:[%s4003_s5 + $0x724] sm:$0xf] }
  0x90   : > { %1965 = vmatpush.bf16.msra.mxu1 %v3213_v50  ;;  %1991 = vmatpush.bf16.msra.mxu3 %v3217_v55  ;;  %v2836_v50 = vld [vmem:[%s4003_s5 + $0x318] sm:$0xf]  ;;  %v3552_v55 = vld [vmem:[%s4003_s5 + $0x31c] sm:$0xf]  ;;  %v3358_v29 = vld [vmem:[%s4003_s5 + $0x760] sm:$0xf0] }
  0x91   : > { %v2837_v59 = vor.u32 %v3560_v51, %v2836_v50  ;;  %v2580_v36 = vld [vmem:[%s4003_s5 + $0x118] sm:$0xf]  ;;  %v3094_v44 = vld [vmem:[%s4003_s5 + $0x558] sm:$0xf0] }
  0x92   : > { %1953 = vmatpush.bf16.msra.mxu0 %v2637_v61  ;;  %1979 = vmatpush.bf16.msra.mxu2 %v2641_v63  ;;  %v2841_v61 = vor.u32 %v3552_v55, %v2838_v56  ;;  %v3544_v63 = vld [vmem:[%s4003_s5 + $0x2d4] sm:$0xf0]  ;;  %v2518_v54 = vld [vmem:[%s4003_s5 + $0xd8] sm:$0xf0] }
  0x93   : > { %v3496_v37 = vld [vmem:[%s4003_s5 + $0x154] sm:$0xf0]  ;;  %v3600_v55 = vld [vmem:[%s4003_s5 + $0x49c] sm:$0xf] }
  0x94   : > { %1966 = vmatpush.bf16.msra.mxu1 %v3149_v62  ;;  %1992 = vmatpush.bf16.msra.mxu3 %v3153_v3  ;;  %v2772_v62 = vld [vmem:[%s4003_s5 + $0x298] sm:$0xf]  ;;  %v3536_v3 = vld [vmem:[%s4003_s5 + $0x29c] sm:$0xf]  ;;  %v2581_v45 = vor.u32 %v3496_v37, %v2580_v36  ;;  %v3292_v36 = vld [vmem:[%s4003_s5 + $0x6a0] sm:$0xf]  ;;  %v3361_v37 = vor.u32 %v3681_v27, %v3358_v29 }
  0x95   : > { %v2773_v7 = vor.u32 %v3544_v63, %v2772_v62  ;;  %v3624_v40 = vld [vmem:[%s4003_s5 + $0x554] sm:$0xf0]  ;;  %v3030_v56 = vld [vmem:[%s4003_s5 + $0x4d8] sm:$0xf0]  ;;  %v2460_v29 = vld [vmem:[%s4003_s5 + $0x20] sm:$0xf] }
  0x96   : > { %1954 = vmatpush.bf16.msra.mxu0 %v2573_v9  ;;  %1980 = vmatpush.bf16.msra.mxu2 %v2577_v11  ;;  %v2777_v9 = vor.u32 %v3536_v3, %v2774_v4  ;;  %v3528_v11 = vld [vmem:[%s4003_s5 + $0x254] sm:$0xf0]  ;;  %v3456_v0 = vld [vmem:[%s4003_s5 + $0x1c] sm:$0xf] }
  0x97   : > { %v3028_v50 = vld [vmem:[%s4003_s5 + $0x498] sm:$0xf]  ;;  %v2454_v2 = vld [vmem:[%s4003_s5 + $0x58] sm:$0xf0] }
  0x98   : > { %1967 = vmatpush.bf16.msra.mxu1 %v3085_v10  ;;  %1993 = vmatpush.bf16.msra.mxu3 %v3089_v15  ;;  %v2708_v10 = vld [vmem:[%s4003_s5 + $0x218] sm:$0xf]  ;;  %v3520_v15 = vld [vmem:[%s4003_s5 + $0x21c] sm:$0xf] }
  0x99   : > { %v2709_v19 = vor.u32 %v3528_v11, %v2708_v10  ;;  %v3608_v52 = vld [vmem:[%s4003_s5 + $0x4d4] sm:$0xf0]  ;;  %v3584_v3 = vld [vmem:[%s4003_s5 + $0x41c] sm:$0xf]  ;;  %v3569_v10 = vld [vmem:[%s4003_s5 + $0x3a4] sm:$0xf] }
  0x9a   : > { %1955 = vmatpush.bf16.msra.mxu0 %v2509_v21  ;;  %1981 = vmatpush.bf16.msra.mxu2 %v2513_v25  ;;  %v2713_v21 = vor.u32 %v3520_v15, %v2710_v16  ;;  %v3225_v25 = vor.u32 %v3648_v17, %v3222_v18  ;;  %v2452_v58 = vld [vmem:[%s4003_s5 + $0x18] sm:$0xf]  ;;  %v2966_v4 = vld [vmem:[%s4003_s5 + $0x458] sm:$0xf0]  ;;  %v2910_v11 = vld [vmem:[%s4003_s5 + $0x3e0] sm:$0xf0]  ;;  %v2909_v17 = vor.u32 %v3577_v6, %v2908_v5 }
  0x9b   : > { %v2964_v62 = vld [vmem:[%s4003_s5 + $0x418] sm:$0xf]  ;;  %v3422_v15 = vld [vmem:[%s4003_s5 + $0x7e0] sm:$0xf0]  ;;  %v2969_v16 = vor.u32 %v3584_v3, %v2966_v4  ;;  %v2588_v6 = vld [vmem:[%s4003_s5 + $0x120] sm:$0xf] }
  0x9c   : > { %1968 = vmatpush.bf16.msra.mxu1 %v3021_v24  ;;  %1994 = vmatpush.bf16.msra.mxu3 %v3025_v30  ;;  %v3156_v24 = vld [vmem:[%s4003_s5 + $0x598] sm:$0xf]  ;;  %v3632_v30 = vld [vmem:[%s4003_s5 + $0x59c] sm:$0xf]  ;;  %v3425_v23 = vor.u32 %v3697_v14, %v3422_v15  ;;  %v3102_v14 = vld [vmem:[%s4003_s5 + $0x560] sm:$0xf0] }
  0x9d   : > { %v3157_v34 = vor.u32 %v3640_v26, %v3156_v24  ;;  %v3161_v39 = vor.u32 %v3632_v30, %v3158_v32  ;;  %v3592_v63 = vld [vmem:[%s4003_s5 + $0x454] sm:$0xf0]  ;;  %v3689_v24 = vld [vmem:[%s4003_s5 + $0x75c] sm:$0xf0]  ;;  %v2846_v26 = vld [vmem:[%s4003_s5 + $0x360] sm:$0xf0] }
  0x9e   : > { %1956 = vmatpush.bf16.msra.mxu0 %v2445_v38  ;;  %1982 = vmatpush.bf16.msra.mxu2 %v2449_v43  ;;  %v3092_v38 = vld [vmem:[%s4003_s5 + $0x518] sm:$0xf]  ;;  %v3616_v43 = vld [vmem:[%s4003_s5 + $0x51c] sm:$0xf]  ;;  %v2965_v12 = vor.u32 %v3592_v63, %v2964_v62  ;;  %v3357_v32 = vor.u32 %v3689_v24, %v3356_v22  ;;  %v3641_v62 = vld [vmem:[%s4003_s5 + $0x5dc] sm:$0xf0] }
  0x9f   : > { %v3097_v51 = vor.u32 %v3616_v43, %v3094_v44  ;;  %v3505_v63 = vld [vmem:[%s4003_s5 + $0x1a4] sm:$0xf]  ;;  %v3609_v22 = vld [vmem:[%s4003_s5 + $0x4dc] sm:$0xf0] }
  0xa0   : > { %1969 = vmatpush.bf16.msra.mxu1 %v2957_v42  ;;  %1995 = vmatpush.bf16.msra.mxu3 %v2961_v46  ;;  %v2582_v42 = vld [vmem:[%s4003_s5 + $0x158] sm:$0xf0]  ;;  %v3093_v46 = vor.u32 %v3624_v40, %v3092_v38  ;;  %v3673_v38 = vld [vmem:[%s4003_s5 + $0x6dc] sm:$0xf0]  ;;  %v2782_v40 = vld [vmem:[%s4003_s5 + $0x2e0] sm:$0xf0] }
  0xa1   : > { %1983 = vmatmul.bf16.vlgmr.msra.gmra.mxu2 %v4129_v28  ;;  %1957 = vmatmul.bf16.vlgmr.msra.gmra.mxu0 %v4129_v28  ;;  %v3293_v44 = vor.u32 %v3673_v38, %v3292_v36  ;;  %v2526_v24 = vld [vmem:[%s4003_s5 + $0xe0] sm:$0xf0] }
  0xa2   : > { %2001 = vmatpush.bf16.msrb.mxu0 %v2901_v47  ;;  %2027 = vmatpush.bf16.msrb.mxu2 %v2905_v49  ;;  %v2585_v47 = vor.u32 %v3488_v41, %v2582_v42  ;;  %v3480_v49 = vld [vmem:[%s4003_s5 + $0xd4] sm:$0xf0]  ;;  %v3665_v41 = vld [vmem:[%s4003_s5 + $0x6a4] sm:$0xf] }
  0xa3   : > { %1996 = vmatmul.bf16.vlgmr.msra.gmra.mxu3 %v4131_v31  ;;  %1970 = vmatmul.bf16.vlgmr.msra.gmra.mxu1 %v4131_v31  ;;  %v3294_v42 = vld [vmem:[%s4003_s5 + $0x6e0] sm:$0xf0] }
  0xa4   : > { %2014 = vmatpush.bf16.msrb.mxu1 %v3413_v48  ;;  %2040 = vmatpush.bf16.msrb.mxu3 %v3417_v53  ;;  %v2516_v48 = vld [vmem:[%s4003_s5 + $0x98] sm:$0xf]  ;;  %v3472_v53 = vld [vmem:[%s4003_s5 + $0x9c] sm:$0xf]  ;;  %v3457_v36 = vld [vmem:[%s4003_s5 + $0x24] sm:$0xf] }
  0xa5   : > { %v2517_v57 = vor.u32 %v3480_v49, %v2516_v48  ;;  %v3228_v48 = vld [vmem:[%s4003_s5 + $0x620] sm:$0xf]  ;;  %v3297_v49 = vor.u32 %v3665_v41, %v3294_v42  ;;  %v2462_v38 = vld [vmem:[%s4003_s5 + $0x60] sm:$0xf0]  ;;  %v2916_v41 = vld [vmem:[%s4003_s5 + $0x3a8] sm:$0xf] }
  0xa6   : > { %2002 = vmatpush.bf16.msrb.mxu0 %v2837_v59  ;;  %2028 = vmatpush.bf16.msrb.mxu2 %v2841_v61  ;;  %v3464_v59 = vld [vmem:[%s4003_s5 + $0x54] sm:$0xf0]  ;;  %v2521_v61 = vor.u32 %v3472_v53, %v2518_v54  ;;  %v3649_v53 = vld [vmem:[%s4003_s5 + $0x624] sm:$0xf]  ;;  %v3578_v42 = vld [vmem:[%s4003_s5 + $0x3e4] sm:$0xf0] }
  0xa7   : > { %v3230_v54 = vld [vmem:[%s4003_s5 + $0x660] sm:$0xf0] }
  0xa8   : > { %2015 = vmatpush.bf16.msrb.mxu1 %v3349_v60  ;;  %2041 = vmatpush.bf16.msrb.mxu3 %v3353_v1  ;;  %v3029_v60 = vor.u32 %v3608_v52, %v3028_v50  ;;  %v3033_v1 = vor.u32 %v3600_v55, %v3030_v56  ;;  %v3657_v50 = vld [vmem:[%s4003_s5 + $0x65c] sm:$0xf0]  ;;  %v2718_v52 = vld [vmem:[%s4003_s5 + $0x260] sm:$0xf0] }
  0xa9   : > { %v3229_v56 = vor.u32 %v3657_v50, %v3228_v48  ;;  %v3698_v50 = vld [vmem:[%s4003_s5 + $0x7ac] sm:$0xf] }
  0xaa   : > { %2003 = vmatpush.bf16.msrb.mxu0 %v2773_v7  ;;  %2029 = vmatpush.bf16.msrb.mxu2 %v2777_v9  ;;  %v3420_v7 = vld [vmem:[%s4003_s5 + $0x7a0] sm:$0xf] }
  0xab   : > { %v3705_v9 = vld [vmem:[%s4003_s5 + $0x7dc] sm:$0xf0] }
  0xac   : > { %2016 = vmatpush.bf16.msrb.mxu1 %v3285_v8  ;;  %2042 = vmatpush.bf16.msrb.mxu3 %v3289_v13  ;;  %v2453_v8 = vor.u32 %v3464_v59, %v2452_v58  ;;  %v2457_v13 = vor.u32 %v3456_v0, %v2454_v2  ;;  %v3421_v18 = vor.u32 %v3705_v9, %v3420_v7  ;;  %v2652_v58 = vld [vmem:[%s4003_s5 + $0x1a0] sm:$0xf]  ;;  %v2654_v0 = vld [vmem:[%s4003_s5 + $0x1e0] sm:$0xf0] }
  0xad   : > { %v3513_v59 = vld [vmem:[%s4003_s5 + $0x1dc] sm:$0xf0]  ;;  %v3166_v2 = vld [vmem:[%s4003_s5 + $0x5e0] sm:$0xf0]  ;;  %v2657_v5 = vor.u32 %v3505_v63, %v2654_v0  ;;  %v3682_v63 = vld [vmem:[%s4003_s5 + $0x72c] sm:$0xf] }
  0xae   : > { %2004 = vmatpush.bf16.msrb.mxu0 %v2709_v19  ;;  %2030 = vmatpush.bf16.msrb.mxu2 %v2713_v21  ;;  %v2913_v19 = vor.u32 %v3569_v10, %v2910_v11  ;;  %v3561_v21 = vld [vmem:[%s4003_s5 + $0x35c] sm:$0xf0]  ;;  %v2653_v3 = vor.u32 %v3513_v59, %v2652_v58  ;;  %v3489_v11 = vld [vmem:[%s4003_s5 + $0x124] sm:$0xf]  ;;  %v3364_v58 = vld [vmem:[%s4003_s5 + $0x728] sm:$0xf] }
  0xaf   : > { %v3497_v7 = vld [vmem:[%s4003_s5 + $0x15c] sm:$0xf0]  ;;  %v3366_v0 = vld [vmem:[%s4003_s5 + $0x768] sm:$0xf0] }
  0xb0   : > { %2017 = vmatpush.bf16.msrb.mxu1 %v3221_v20  ;;  %2043 = vmatpush.bf16.msrb.mxu3 %v3225_v25  ;;  %v2844_v20 = vld [vmem:[%s4003_s5 + $0x320] sm:$0xf]  ;;  %v3553_v25 = vld [vmem:[%s4003_s5 + $0x324] sm:$0xf]  ;;  %v2589_v15 = vor.u32 %v3497_v7, %v2588_v6  ;;  %v3300_v6 = vld [vmem:[%s4003_s5 + $0x6a8] sm:$0xf]  ;;  %v3369_v7 = vor.u32 %v3682_v63, %v3366_v0 }
  0xb1   : > { %v2845_v30 = vor.u32 %v3561_v21, %v2844_v20  ;;  %v3625_v10 = vld [vmem:[%s4003_s5 + $0x55c] sm:$0xf0]  ;;  %v2468_v0 = vld [vmem:[%s4003_s5 + $0x28] sm:$0xf] }
  0xb2   : > { %2005 = vmatpush.bf16.msrb.mxu0 %v2645_v33  ;;  %2031 = vmatpush.bf16.msrb.mxu2 %v2649_v35  ;;  %v2849_v33 = vor.u32 %v3553_v25, %v2846_v26  ;;  %v3545_v35 = vld [vmem:[%s4003_s5 + $0x2dc] sm:$0xf0]  ;;  %v3601_v25 = vld [vmem:[%s4003_s5 + $0x4a4] sm:$0xf] }
  0xb3   : > { %v3036_v20 = vld [vmem:[%s4003_s5 + $0x4a0] sm:$0xf]  ;;  %v3038_v26 = vld [vmem:[%s4003_s5 + $0x4e0] sm:$0xf0] }
  0xb4   : > { %2018 = vmatpush.bf16.msrb.mxu1 %v3157_v34  ;;  %2044 = vmatpush.bf16.msrb.mxu3 %v3161_v39  ;;  %v2780_v34 = vld [vmem:[%s4003_s5 + $0x2a0] sm:$0xf]  ;;  %v3537_v39 = vld [vmem:[%s4003_s5 + $0x2a4] sm:$0xf] }
  0xb5   : > { %v2781_v43 = vor.u32 %v3545_v35, %v2780_v34  ;;  %v2972_v34 = vld [vmem:[%s4003_s5 + $0x420] sm:$0xf] }
  0xb6   : > { %2006 = vmatpush.bf16.msrb.mxu0 %v2581_v45  ;;  %2032 = vmatpush.bf16.msrb.mxu2 %v2585_v47  ;;  %v2785_v45 = vor.u32 %v3537_v39, %v2782_v40  ;;  %v3529_v47 = vld [vmem:[%s4003_s5 + $0x25c] sm:$0xf0]  ;;  %v3585_v39 = vld [vmem:[%s4003_s5 + $0x424] sm:$0xf] }
  0xb7   : > { %v3593_v35 = vld [vmem:[%s4003_s5 + $0x45c] sm:$0xf0]  ;;  %v2974_v40 = vld [vmem:[%s4003_s5 + $0x460] sm:$0xf0] }
  0xb8   : > { %2019 = vmatpush.bf16.msrb.mxu1 %v3093_v46  ;;  %2045 = vmatpush.bf16.msrb.mxu3 %v3097_v51  ;;  %v2716_v46 = vld [vmem:[%s4003_s5 + $0x220] sm:$0xf]  ;;  %v3521_v51 = vld [vmem:[%s4003_s5 + $0x224] sm:$0xf]  ;;  %v2973_v48 = vor.u32 %v3593_v35, %v2972_v34  ;;  %v2662_v34 = vld [vmem:[%s4003_s5 + $0x1e8] sm:$0xf0] }
  0xb9   : > { %v2717_v55 = vor.u32 %v3529_v47, %v2716_v46  ;;  %v3570_v46 = vld [vmem:[%s4003_s5 + $0x3ac] sm:$0xf] }
  0xba   : > { %2007 = vmatpush.bf16.msrb.mxu0 %v2517_v57  ;;  %2033 = vmatpush.bf16.msrb.mxu2 %v2521_v61  ;;  %v2721_v57 = vor.u32 %v3521_v51, %v2718_v52  ;;  %v3233_v61 = vor.u32 %v3649_v53, %v3230_v54  ;;  %v2918_v47 = vld [vmem:[%s4003_s5 + $0x3e8] sm:$0xf0]  ;;  %v2977_v52 = vor.u32 %v3585_v39, %v2974_v40  ;;  %v2596_v40 = vld [vmem:[%s4003_s5 + $0x128] sm:$0xf] }
  0xbb   : > { %v3430_v51 = vld [vmem:[%s4003_s5 + $0x7e8] sm:$0xf0]  ;;  %v2917_v53 = vor.u32 %v3578_v42, %v2916_v41  ;;  %v3498_v41 = vld [vmem:[%s4003_s5 + $0x164] sm:$0xf0] }
  0xbc   : > { %2020 = vmatpush.bf16.msrb.mxu1 %v3029_v60  ;;  %2046 = vmatpush.bf16.msrb.mxu3 %v3033_v1  ;;  %v3164_v60 = vld [vmem:[%s4003_s5 + $0x5a0] sm:$0xf]  ;;  %v3633_v1 = vld [vmem:[%s4003_s5 + $0x5a4] sm:$0xf]  ;;  %v3433_v59 = vor.u32 %v3698_v50, %v3430_v51  ;;  %v3634_v35 = vld [vmem:[%s4003_s5 + $0x5ac] sm:$0xf] }
  0xbd   : > { %v3165_v4 = vor.u32 %v3641_v62, %v3164_v60  ;;  %v3169_v9 = vor.u32 %v3633_v1, %v3166_v2  ;;  %v3690_v60 = vld [vmem:[%s4003_s5 + $0x764] sm:$0xf0]  ;;  %v2854_v62 = vld [vmem:[%s4003_s5 + $0x368] sm:$0xf0]  ;;  %v4417_v51 = vld [vmem:[%s4009_s12] sm:$0xff] }
  0xbe   : > { %2008 = vmatpush.bf16.msrb.mxu0 %v2453_v8  ;;  %2034 = vmatpush.bf16.msrb.mxu2 %v2457_v13  ;;  %v3100_v8 = vld [vmem:[%s4003_s5 + $0x520] sm:$0xf]  ;;  %v3617_v13 = vld [vmem:[%s4003_s5 + $0x524] sm:$0xf]  ;;  %v3365_v2 = vor.u32 %v3690_v60, %v3364_v58  ;;  %v3108_v42 = vld [vmem:[%s4003_s5 + $0x528] sm:$0xf] }
  0xbf   : > { %v3105_v21 = vor.u32 %v3617_v13, %v3102_v14  ;;  %v2532_v50 = vld [vmem:[%s4003_s5 + $0xa8] sm:$0xf]  ;;  %v2534_v60 = vld [vmem:[%s4003_s5 + $0xe8] sm:$0xf0] }
  0xc0   : > { %2021 = vmatpush.bf16.msrb.mxu1 %v2965_v12  ;;  %2047 = vmatpush.bf16.msrb.mxu3 %v2969_v16  ;;  %v2590_v12 = vld [vmem:[%s4003_s5 + $0x160] sm:$0xf0]  ;;  %v3101_v16 = vor.u32 %v3625_v10, %v3100_v8  ;;  %v3674_v8 = vld [vmem:[%s4003_s5 + $0x6e4] sm:$0xf0]  ;;  %v2790_v10 = vld [vmem:[%s4003_s5 + $0x2e8] sm:$0xf0] }
  0xc1   : > { %2035 = vmatmul.bf16.vlgmr.msrb.gmra.mxu2 %v4129_v28  ;;  %2009 = vmatmul.bf16.vlgmr.msrb.gmra.mxu0 %v4129_v28  ;;  %v3301_v14 = vor.u32 %v3674_v8, %v3300_v6  ;;  %v3610_v58 = vld [vmem:[%s4003_s5 + $0x4e4] sm:$0xf0]  ;;  %v2470_v8 = vld [vmem:[%s4003_s5 + $0x68] sm:$0xf0] }
  0xc2   : > { %2053 = vmatpush.bf16.msra.mxu0 %v2909_v17  ;;  %2079 = vmatpush.bf16.msra.mxu2 %v2913_v19  ;;  %v2593_v17 = vor.u32 %v3489_v11, %v2590_v12  ;;  %v3481_v19 = vld [vmem:[%s4003_s5 + $0xdc] sm:$0xf0]  ;;  %v3666_v11 = vld [vmem:[%s4003_s5 + $0x6ac] sm:$0xf]  ;;  %v3594_v6 = vld [vmem:[%s4003_s5 + $0x464] sm:$0xf0] }
  0xc3   : > { %2048 = vmatmul.bf16.vlgmr.msrb.gmra.mxu3 %v4131_v31  ;;  %2022 = vmatmul.bf16.vlgmr.msrb.gmra.mxu1 %v4131_v31  ;;  %v3302_v12 = vld [vmem:[%s4003_s5 + $0x6e8] sm:$0xf0] }
  0xc4   : > { %2066 = vmatpush.bf16.msra.mxu1 %v3421_v18  ;;  %2092 = vmatpush.bf16.msra.mxu3 %v3425_v23  ;;  %v2524_v18 = vld [vmem:[%s4003_s5 + $0xa0] sm:$0xf]  ;;  %v3473_v23 = vld [vmem:[%s4003_s5 + $0xa4] sm:$0xf] }
  0xc5   : > { %v2525_v27 = vor.u32 %v3481_v19, %v2524_v18  ;;  %v3236_v18 = vld [vmem:[%s4003_s5 + $0x628] sm:$0xf]  ;;  %v3305_v19 = vor.u32 %v3666_v11, %v3302_v12  ;;  %v3586_v12 = vld [vmem:[%s4003_s5 + $0x42c] sm:$0xf] }
  0xc6   : > { %2054 = vmatpush.bf16.msra.mxu0 %v2845_v30  ;;  %2080 = vmatpush.bf16.msra.mxu2 %v2849_v33  ;;  %v3465_v30 = vld [vmem:[%s4003_s5 + $0x5c] sm:$0xf0]  ;;  %v2529_v33 = vor.u32 %v3473_v23, %v2526_v24 }
  0xc8   : > { %2067 = vmatpush.bf16.msra.mxu1 %v3357_v32  ;;  %2093 = vmatpush.bf16.msra.mxu3 %v3361_v37  ;;  %v3037_v32 = vor.u32 %v3609_v22, %v3036_v20  ;;  %v3041_v37 = vor.u32 %v3601_v25, %v3038_v26  ;;  %v3658_v20 = vld [vmem:[%s4003_s5 + $0x664] sm:$0xf0]  ;;  %v3650_v22 = vld [vmem:[%s4003_s5 + $0x62c] sm:$0xf] }
  0xc9   : > { %v3237_v24 = vor.u32 %v3658_v20, %v3236_v18  ;;  %v2660_v26 = vld [vmem:[%s4003_s5 + $0x1a8] sm:$0xf]  ;;  %v3707_v20 = vld [vmem:[%s4003_s5 + $0x7ec] sm:$0xf0] }
  0xca   : > { %2055 = vmatpush.bf16.msra.mxu0 %v2781_v43  ;;  %2081 = vmatpush.bf16.msra.mxu2 %v2785_v45  ;;  %v3428_v43 = vld [vmem:[%s4003_s5 + $0x7a8] sm:$0xf] }
  0xcb   : > { %v3706_v45 = vld [vmem:[%s4003_s5 + $0x7e4] sm:$0xf0] }
  0xcc   : > { %2068 = vmatpush.bf16.msra.mxu1 %v3293_v44  ;;  %2094 = vmatpush.bf16.msra.mxu3 %v3297_v49  ;;  %v2461_v44 = vor.u32 %v3465_v30, %v2460_v29  ;;  %v2465_v49 = vor.u32 %v3457_v36, %v2462_v38  ;;  %v3429_v54 = vor.u32 %v3706_v45, %v3428_v43  ;;  %v3172_v29 = vld [vmem:[%s4003_s5 + $0x5a8] sm:$0xf]  ;;  %v3174_v36 = vld [vmem:[%s4003_s5 + $0x5e8] sm:$0xf0] }
  0xcd   : > { %v3177_v43 = vor.u32 %v3634_v35, %v3174_v36  ;;  %v3490_v45 = vld [vmem:[%s4003_s5 + $0x12c] sm:$0xf]  ;;  %v3563_v35 = vld [vmem:[%s4003_s5 + $0x36c] sm:$0xf0] }
  0xce   : > { %2056 = vmatpush.bf16.msra.mxu0 %v2717_v55  ;;  %2082 = vmatpush.bf16.msra.mxu2 %v2721_v57  ;;  %v2921_v55 = vor.u32 %v3570_v46, %v2918_v47  ;;  %v3562_v57 = vld [vmem:[%s4003_s5 + $0x364] sm:$0xf0]  ;;  %v2598_v46 = vld [vmem:[%s4003_s5 + $0x168] sm:$0xf0]  ;;  %v3372_v36 = vld [vmem:[%s4003_s5 + $0x730] sm:$0xf] }
  0xcf   : > { %v3618_v47 = vld [vmem:[%s4003_s5 + $0x52c] sm:$0xf] }
  0xd0   : > { %2069 = vmatpush.bf16.msra.mxu1 %v3229_v56  ;;  %2095 = vmatpush.bf16.msra.mxu3 %v3233_v61  ;;  %v2852_v56 = vld [vmem:[%s4003_s5 + $0x328] sm:$0xf]  ;;  %v3554_v61 = vld [vmem:[%s4003_s5 + $0x32c] sm:$0xf] }
  0xd1   : > { %v2853_v1 = vor.u32 %v3562_v57, %v2852_v56  ;;  %v1813_v56 = vperm.slane %v4417_v51, 0 }
  0xd2   : > { %2057 = vmatpush.bf16.msra.mxu0 %v2653_v3  ;;  %2083 = vmatpush.bf16.msra.mxu2 %v2657_v5  ;;  %v2857_v3 = vor.u32 %v3554_v61, %v2854_v62  ;;  %v3546_v5 = vld [vmem:[%s4003_s5 + $0x2e4] sm:$0xf0]  ;;  %v3602_v61 = vld [vmem:[%s4003_s5 + $0x4ac] sm:$0xf] }
  0xd3   : > { %v3046_v62 = vld [vmem:[%s4003_s5 + $0x4e8] sm:$0xf0] }
  0xd4   : > { %2070 = vmatpush.bf16.msra.mxu1 %v3165_v4  ;;  %2096 = vmatpush.bf16.msra.mxu3 %v3169_v9  ;;  %v2788_v4 = vld [vmem:[%s4003_s5 + $0x2a8] sm:$0xf]  ;;  %v3538_v9 = vld [vmem:[%s4003_s5 + $0x2ac] sm:$0xf]  ;;  %v3049_v11 = vor.u32 %v3602_v61, %v3046_v62  ;;  %v3667_v61 = vld [vmem:[%s4003_s5 + $0x6b4] sm:$0xf] }
  0xd5   : > { %v2789_v13 = vor.u32 %v3546_v5, %v2788_v4  ;;  %v3310_v62 = vld [vmem:[%s4003_s5 + $0x6f0] sm:$0xf0] }
  0xd6   : > { %2058 = vmatpush.bf16.msra.mxu0 %v2589_v15  ;;  %2084 = vmatpush.bf16.msra.mxu2 %v2593_v17  ;;  %v2793_v15 = vor.u32 %v3538_v9, %v2790_v10  ;;  %v3530_v17 = vld [vmem:[%s4003_s5 + $0x264] sm:$0xf0] }
  0xd8   : > { %2071 = vmatpush.bf16.msra.mxu1 %v3101_v16  ;;  %2097 = vmatpush.bf16.msra.mxu3 %v3105_v21  ;;  %v2724_v16 = vld [vmem:[%s4003_s5 + $0x228] sm:$0xf]  ;;  %v2726_v21 = vld [vmem:[%s4003_s5 + $0x268] sm:$0xf0] }
  0xd9   : > { %v2725_v23 = vor.u32 %v3530_v17, %v2724_v16  ;;  %v3579_v16 = vld [vmem:[%s4003_s5 + $0x3ec] sm:$0xf0] }
  0xda   : > { %2059 = vmatpush.bf16.msra.mxu0 %v2525_v27  ;;  %2085 = vmatpush.bf16.msra.mxu2 %v2529_v33  ;;  %v3514_v27 = vld [vmem:[%s4003_s5 + $0x1e4] sm:$0xf0]  ;;  %v3506_v33 = vld [vmem:[%s4003_s5 + $0x1ac] sm:$0xf]  ;;  %v3436_v17 = vld [vmem:[%s4003_s5 + $0x7b0] sm:$0xf] }
  0xdb   : > { %v2665_v39 = vor.u32 %v3506_v33, %v2662_v34  ;;  %v2860_v34 = vld [vmem:[%s4003_s5 + $0x330] sm:$0xf] }
  0xdc   : > { %2072 = vmatpush.bf16.msra.mxu1 %v3037_v32  ;;  %2098 = vmatpush.bf16.msra.mxu3 %v3041_v37  ;;  %v3642_v32 = vld [vmem:[%s4003_s5 + $0x5e4] sm:$0xf0]  ;;  %v2661_v37 = vor.u32 %v3514_v27, %v2660_v26 }
  0xdd   : > { %v3173_v38 = vor.u32 %v3642_v32, %v3172_v29  ;;  %v3437_v32 = vor.u32 %v3707_v20, %v3436_v17  ;;  %v3180_v20 = vld [vmem:[%s4003_s5 + $0x5b0] sm:$0xf] }
  0xde   : > { %2060 = vmatpush.bf16.msra.mxu0 %v2461_v44  ;;  %2086 = vmatpush.bf16.msra.mxu2 %v2465_v49  ;;  %v3626_v44 = vld [vmem:[%s4003_s5 + $0x564] sm:$0xf0]  ;;  %v2597_v49 = vor.u32 %v3498_v41, %v2596_v40  ;;  %v3555_v40 = vld [vmem:[%s4003_s5 + $0x334] sm:$0xf] }
  0xdf   : > { %v2862_v41 = vld [vmem:[%s4003_s5 + $0x370] sm:$0xf0] }
  0xe0   : > { %2073 = vmatpush.bf16.msra.mxu1 %v2973_v48  ;;  %2099 = vmatpush.bf16.msra.mxu3 %v2977_v52  ;;  %v3110_v48 = vld [vmem:[%s4003_s5 + $0x568] sm:$0xf0]  ;;  %v3109_v52 = vor.u32 %v3626_v44, %v3108_v42  ;;  %v3374_v44 = vld [vmem:[%s4003_s5 + $0x770] sm:$0xf0] }
  0xe1   : > { %2087 = vmatmul.bf16.vlgmr.msra.gmra.mxu2 %v4129_v28  ;;  %2061 = vmatmul.bf16.vlgmr.msra.gmra.mxu0 %v4129_v28  ;;  %v3522_v28 = vld [vmem:[%s4003_s5 + $0x22c] sm:$0xf]  ;;  %v3113_v57 = vor.u32 %v3618_v47, %v3110_v48  ;;  %v2861_v47 = vor.u32 %v3563_v35, %v2860_v34  ;;  %v2604_v35 = vld [vmem:[%s4003_s5 + $0x130] sm:$0xf] }
  0xe2   : > { %2105 = vmatpush.bf16.msrb.mxu0 %v2917_v53  ;;  %2131 = vmatpush.bf16.msrb.mxu2 %v2921_v55  ;;  %v2729_v25 = vor.u32 %v3522_v28, %v2726_v21  ;;  %v2601_v53 = vor.u32 %v3490_v45, %v2598_v46  ;;  %v3044_v55 = vld [vmem:[%s4003_s5 + $0x4a8] sm:$0xf]  ;;  %v3571_v28 = vld [vmem:[%s4003_s5 + $0x3b4] sm:$0xf] }
  0xe3   : > { %2100 = vmatmul.bf16.vlgmr.msra.gmra.mxu3 %v4131_v31  ;;  %2074 = vmatmul.bf16.vlgmr.msra.gmra.mxu1 %v4131_v31  ;;  %v3238_v31 = vld [vmem:[%s4003_s5 + $0x668] sm:$0xf0]  ;;  %v3045_v4 = vor.u32 %v3610_v58, %v3044_v55  ;;  %v2926_v21 = vld [vmem:[%s4003_s5 + $0x3f0] sm:$0xf0] }
  0xe4   : > { %2118 = vmatpush.bf16.msrb.mxu1 %v3429_v54  ;;  %2144 = vmatpush.bf16.msrb.mxu3 %v3433_v59  ;;  %v3241_v30 = vor.u32 %v3650_v22, %v3238_v31  ;;  %v3482_v54 = vld [vmem:[%s4003_s5 + $0xe4] sm:$0xf0]  ;;  %v3474_v59 = vld [vmem:[%s4003_s5 + $0xac] sm:$0xf]  ;;  %v2929_v33 = vor.u32 %v3571_v28, %v2926_v21  ;;  %v3539_v58 = vld [vmem:[%s4003_s5 + $0x2b4] sm:$0xf] }
  0xe5   : > { %v2533_v63 = vor.u32 %v3482_v54, %v2532_v50  ;;  %v2537_v5 = vor.u32 %v3474_v59, %v2534_v60  ;;  %v2796_v50 = vld [vmem:[%s4003_s5 + $0x2b0] sm:$0xf]  ;;  %v4455_v54 = vld [vmem:[#allocation1] sm:$0xff]  ;;  %v2798_v59 = vld [vmem:[%s4003_s5 + $0x2f0] sm:$0xf0] }
  0xe6   : > { %2106 = vmatpush.bf16.msrb.mxu0 %v2853_v1  ;;  %2132 = vmatpush.bf16.msrb.mxu2 %v2857_v3  ;;  %v3466_v1 = vld [vmem:[%s4003_s5 + $0x64] sm:$0xf0]  ;;  %v1854_v3 = vpop.f32.mrf.mxu0  ;;  %v1867_v10 = vpop.f32.mrf.mxu1  ;;  %v3643_v28 = vld [vmem:[%s4003_s5 + $0x5ec] sm:$0xf0] }
  0xe7   : > { %v1855_v9 = vadd.f32 %v1854_v3, %v1813_v56  ;;  %v4464_v60 = vld [vmem:[#allocation1 + $0x9] sm:$0xff] }
  0xe8   : > { %2119 = vmatpush.bf16.msrb.mxu1 %v3365_v2  ;;  %2145 = vmatpush.bf16.msrb.mxu3 %v3369_v7  ;;  %v2980_v2 = vld [vmem:[%s4003_s5 + $0x428] sm:$0xf]  ;;  %v3458_v7 = vld [vmem:[%s4003_s5 + $0x2c] sm:$0xf] }
  0xe9   : > { %v1868_v18 = vadd.f32 %v1867_v10, %v1855_v9  ;;  %v2981_v22 = vor.u32 %v3594_v6, %v2980_v2  ;;  %v2473_v31 = vor.u32 %v3458_v7, %v2470_v8  ;;  %v2732_v2 = vld [vmem:[%s4003_s5 + $0x230] sm:$0xf]  ;;  %v1815_v7 = vperm.slane %v4417_v51, 2  ;;  %v3523_v10 = vld [vmem:[%s4003_s5 + $0x234] sm:$0xf] }
  0xea   : > { %2107 = vmatpush.bf16.msrb.mxu0 %v2789_v13  ;;  %2133 = vmatpush.bf16.msrb.mxu2 %v2793_v15  ;;  %v2982_v13 = vld [vmem:[%s4003_s5 + $0x468] sm:$0xf0]  ;;  %v2924_v15 = vld [vmem:[%s4003_s5 + $0x3b0] sm:$0xf]  ;;  %v3313_v8 = vor.u32 %v3667_v61, %v3310_v62 }
  0xeb   : > { %v2985_v26 = vor.u32 %v3586_v12, %v2982_v13  ;;  %v2925_v27 = vor.u32 %v3579_v16, %v2924_v15  ;;  %v3244_v6 = vld [vmem:[%s4003_s5 + $0x630] sm:$0xf]  ;;  %v3651_v12 = vld [vmem:[%s4003_s5 + $0x634] sm:$0xf] }
  0xec   : > { %2120 = vmatpush.bf16.msrb.mxu1 %v3301_v14  ;;  %2146 = vmatpush.bf16.msrb.mxu3 %v3305_v19  ;;  %v1814_v14 = vperm.slane %v4417_v51, 1  ;;  %v2469_v19 = vor.u32 %v3466_v1, %v2468_v0  ;;  %v3659_v9 = vld [vmem:[%s4003_s5 + $0x66c] sm:$0xf0]  ;;  %v3246_v13 = vld [vmem:[%s4003_s5 + $0x670] sm:$0xf0] }
  0xed   : > { %v2668_v15 = vld [vmem:[%s4003_s5 + $0x1b0] sm:$0xf]  ;;  %v3245_v17 = vor.u32 %v3659_v9, %v3244_v6 }
  0xee   : > { %2108 = vmatpush.bf16.msrb.mxu0 %v2725_v23  ;;  %2134 = vmatpush.bf16.msrb.mxu2 %v2729_v25  ;;  %v3699_v23 = vld [vmem:[%s4003_s5 + $0x7b4] sm:$0xf]  ;;  %v1880_v25 = vpop.f32.mrf.mxu2  ;;  %v1856_v42 = vpop.f32.mrf.mxu0  ;;  %v3467_v6 = vld [vmem:[%s4003_s5 + $0x6c] sm:$0xf0] }
  0xef   : > { %v1881_v29 = vadd.f32 %v1880_v25, %v1814_v14  ;;  %v1869_v45 = vpop.f32.mrf.mxu1  ;;  %v1816_v25 = vperm.slane %v4417_v51, 3  ;;  %v3491_v42 = vld [vmem:[%s4003_s5 + $0x134] sm:$0xf] }
  0xf0   : > { %2121 = vmatpush.bf16.msrb.mxu1 %v3237_v24  ;;  %2147 = vmatpush.bf16.msrb.mxu3 %v3241_v30  ;;  %v3438_v24 = vld [vmem:[%s4003_s5 + $0x7f0] sm:$0xf0]  ;;  %v1893_v30 = vpop.f32.mrf.mxu3 }
  0xf1   : > { %v3118_v45 = vld [vmem:[%s4003_s5 + $0x570] sm:$0xf0] }
  0xf2   : > { %2109 = vmatpush.bf16.msrb.mxu0 %v2661_v37  ;;  %2135 = vmatpush.bf16.msrb.mxu2 %v2665_v39  ;;  %v3441_v37 = vor.u32 %v3699_v23, %v3438_v24  ;;  %v3691_v39 = vld [vmem:[%s4003_s5 + $0x76c] sm:$0xf0]  ;;  %v3507_v23 = vld [vmem:[%s4003_s5 + $0x1b4] sm:$0xf] }
  0xf3   : > { %v3373_v48 = vor.u32 %v3691_v39, %v3372_v36  ;;  %v2670_v24 = vld [vmem:[%s4003_s5 + $0x1f0] sm:$0xf0]  ;;  %v3499_v36 = vld [vmem:[%s4003_s5 + $0x16c] sm:$0xf0] }
  0xf4   : > { %2122 = vmatpush.bf16.msrb.mxu1 %v3173_v38  ;;  %2148 = vmatpush.bf16.msrb.mxu3 %v3177_v43  ;;  %v1894_v38 = vadd.f32 %v1893_v30, %v1881_v29  ;;  %v3683_v43 = vld [vmem:[%s4003_s5 + $0x734] sm:$0xf] }
  0xf5   : > { %v3377_v56 = vor.u32 %v3683_v43, %v3374_v44  ;;  %v2606_v43 = vld [vmem:[%s4003_s5 + $0x170] sm:$0xf0] }
  0xf6   : > { %2110 = vmatpush.bf16.msrb.mxu0 %v2597_v49  ;;  %2136 = vmatpush.bf16.msrb.mxu2 %v2601_v53  ;;  %v2277_v46 = vrot.slane %v1894_v38, 7  ;;  %v2865_v49 = vor.u32 %v3555_v40, %v2862_v41  ;;  %v3308_v53 = vld [vmem:[%s4003_s5 + $0x6b0] sm:$0xf]  ;;  %v3619_v44 = vld [vmem:[%s4003_s5 + $0x534] sm:$0xf] }
  0xf7   : > { %v3627_v41 = vld [vmem:[%s4003_s5 + $0x56c] sm:$0xf0]  ;;  %v3121_v62 = vor.u32 %v3619_v44, %v3118_v45  ;;  %v2804_v45 = vld [vmem:[%s4003_s5 + $0x2b8] sm:$0xf] }
  0xf8   : > { %2123 = vmatpush.bf16.msrb.mxu1 %v3109_v52  ;;  %2149 = vmatpush.bf16.msrb.mxu3 %v3113_v57  ;;  %v3547_v52 = vld [vmem:[%s4003_s5 + $0x2ec] sm:$0xf0]  ;;  %v4459_v55 = vsel %vm2291_vm0, %v1868_v18, %v2277_v46  ;;  %v1895_v1 = vpop.f32.mrf.mxu3 }
  0xf9   : > { %v3675_v57 = vld [vmem:[%s4003_s5 + $0x6ec] sm:$0xf0]  ;;  %v2797_v0 = vor.u32 %v3547_v52, %v2796_v50  ;;  %v3603_v1 = vld [vmem:[%s4003_s5 + $0x4b4] sm:$0xf] }
  0xfa   : > { %2111 = vmatpush.bf16.msrb.mxu0 %v2533_v63  ;;  %2137 = vmatpush.bf16.msrb.mxu2 %v2537_v5  ;;  %v1882_v63 = vpop.f32.mrf.mxu2  ;;  %v3309_v3 = vor.u32 %v3675_v57, %v3308_v53  ;;  %v3531_v5 = vld [vmem:[%s4003_s5 + $0x26c] sm:$0xf0]  ;;  %v2609_v53 = vor.u32 %v3491_v42, %v2606_v43 }
  0xfb   : > { %v2733_v14 = vor.u32 %v3531_v5, %v2732_v2  ;;  %v3052_v57 = vld [vmem:[%s4003_s5 + $0x4b0] sm:$0xf]  ;;  %v3475_v63 = vld [vmem:[%s4003_s5 + $0xb4] sm:$0xf] }
  0xfc   : > { %2124 = vmatpush.bf16.msrb.mxu1 %v3045_v4  ;;  %2150 = vmatpush.bf16.msrb.mxu3 %v3049_v11  ;;  %v2801_v4 = vor.u32 %v3539_v58, %v2798_v59  ;;  %v2734_v11 = vld [vmem:[%s4003_s5 + $0x270] sm:$0xf0]  ;;  %v3611_v58 = vld [vmem:[%s4003_s5 + $0x4ec] sm:$0xf0] }
  0xfd   : > { %v2737_v18 = vor.u32 %v3523_v10, %v2734_v11  ;;  %v3054_v2 = vld [vmem:[%s4003_s5 + $0x4f0] sm:$0xf0]  ;;  %v2476_v5 = vld [vmem:[%s4003_s5 + $0x30] sm:$0xf] }
  0xfe   : > { %2112 = vmatpush.bf16.msrb.mxu0 %v2469_v19  ;;  %2138 = vmatpush.bf16.msrb.mxu2 %v2473_v31  ;;  %v1906_v16 = vpop.f32.mrf.mxu0  ;;  %v3515_v19 = vld [vmem:[%s4003_s5 + $0x1ec] sm:$0xf0]  ;;  %v3249_v31 = vor.u32 %v3651_v12, %v3246_v13  ;;  %v3459_v12 = vld [vmem:[%s4003_s5 + $0x34] sm:$0xf] }
  0xff   : > { %v1907_v21 = vadd.f32 %v1906_v16, %v1815_v7  ;;  %v2669_v30 = vor.u32 %v3515_v19, %v2668_v15  ;;  %v2988_v10 = vld [vmem:[%s4003_s5 + $0x430] sm:$0xf]  ;;  %v2478_v15 = vld [vmem:[%s4003_s5 + $0x70] sm:$0xf0]  ;;  %v3580_v19 = vld [vmem:[%s4003_s5 + $0x3f4] sm:$0xf0] }
 0x100   : > { %2125 = vmatpush.bf16.msrb.mxu1 %v2981_v22  ;;  %2151 = vmatpush.bf16.msrb.mxu3 %v2985_v26  ;;  %v1919_v22 = vpop.f32.mrf.mxu1  ;;  %v3635_v26 = vld [vmem:[%s4003_s5 + $0x5b4] sm:$0xf]  ;;  %v3595_v11 = vld [vmem:[%s4003_s5 + $0x46c] sm:$0xf0] }
 0x101   : > { %2139 = vmatmul.bf16.vlgmr.msrb.gmra.mxu2 %v4455_v54  ;;  %2113 = vmatmul.bf16.vlgmr.msrb.gmra.mxu0 %v4455_v54  ;;  %v1920_v29 = vadd.f32 %v1919_v22, %v1907_v21  ;;  %v3587_v16 = vld [vmem:[%s4003_s5 + $0x434] sm:$0xf]  ;;  %v3708_v21 = vld [vmem:[%s4003_s5 + $0x7f4] sm:$0xf0]  ;;  %v3572_v22 = vld [vmem:[%s4003_s5 + $0x3bc] sm:$0xf] }
 0x102   : > { %2157 = vmatpush.bf16.msra.mxu0 %v2925_v27  ;;  %2183 = vmatpush.bf16.msra.mxu2 %v2929_v33  ;;  %v3182_v27 = vld [vmem:[%s4003_s5 + $0x5f0] sm:$0xf0]  ;;  %v2673_v33 = vor.u32 %v3507_v23, %v2670_v24  ;;  %v2989_v23 = vor.u32 %v3595_v11, %v2988_v10  ;;  %v2481_v24 = vor.u32 %v3459_v12, %v2478_v15  ;;  %v2676_v11 = vld [vmem:[%s4003_s5 + $0x1b8] sm:$0xf] }
 0x103   : > { %2152 = vmatmul.bf16.vlgmr.msrb.gmra.mxu3 %v4464_v60  ;;  %2126 = vmatmul.bf16.vlgmr.msrb.gmra.mxu1 %v4464_v60  ;;  %v3185_v38 = vor.u32 %v3635_v26, %v3182_v27  ;;  %v2278_v46 = vrot.slane %v1920_v29, 6  ;;  %v3446_v26 = vld [vmem:[%s4003_s5 + $0x7f8] sm:$0xf0]  ;;  %v3516_v12 = vld [vmem:[%s4003_s5 + $0x1f4] sm:$0xf0] }
 0x104   : > { %2170 = vmatpush.bf16.msra.mxu1 %v3437_v32  ;;  %2196 = vmatpush.bf16.msra.mxu3 %v3441_v37  ;;  %v3181_v32 = vor.u32 %v3643_v28, %v3180_v20  ;;  %v1932_v34 = vpop.f32.mrf.mxu2  ;;  %v3116_v37 = vld [vmem:[%s4003_s5 + $0x530] sm:$0xf]  ;;  %v3444_v20 = vld [vmem:[%s4003_s5 + $0x7b8] sm:$0xf]  ;;  %v2477_v28 = vor.u32 %v3467_v6, %v2476_v5  ;;  %v3254_v5 = vld [vmem:[%s4003_s5 + $0x678] sm:$0xf0] }
 0x105   : > { %v1933_v39 = vadd.f32 %v1932_v34, %v1816_v25  ;;  %v3117_v52 = vor.u32 %v3627_v41, %v3116_v37  ;;  %v3700_v25 = vld [vmem:[%s4003_s5 + $0x7bc] sm:$0xf]  ;;  %v3564_v34 = vld [vmem:[%s4003_s5 + $0x374] sm:$0xf0] }
 0x106   : > { %2158 = vmatpush.bf16.msra.mxu0 %v2861_v47  ;;  %2184 = vmatpush.bf16.msra.mxu2 %v2865_v49  ;;  %v1945_v40 = vpop.f32.mrf.mxu3  ;;  %v2540_v49 = vld [vmem:[%s4003_s5 + $0xb0] sm:$0xf]  ;;  %v1908_v50 = vpop.f32.mrf.mxu0  ;;  %v3692_v37 = vld [vmem:[%s4003_s5 + $0x774] sm:$0xf0]  ;;  %v3382_v41 = vld [vmem:[%s4003_s5 + $0x778] sm:$0xf0] }
 0x107   : > { %v1946_v47 = vadd.f32 %v1945_v40, %v1933_v39  ;;  %v2870_v39 = vld [vmem:[%s4003_s5 + $0x378] sm:$0xf0] }
 0x108   : > { %2171 = vmatpush.bf16.msra.mxu1 %v3373_v48  ;;  %2197 = vmatpush.bf16.msra.mxu3 %v3377_v56  ;;  %v2605_v48 = vor.u32 %v3499_v36, %v2604_v35  ;;  %v3483_v56 = vld [vmem:[%s4003_s5 + $0xec] sm:$0xf0]  ;;  %v1921_v59 = vpop.f32.mrf.mxu1  ;;  %v3380_v35 = vld [vmem:[%s4003_s5 + $0x738] sm:$0xf]  ;;  %v3449_v36 = vor.u32 %v3700_v25, %v3446_v26  ;;  %v3684_v40 = vld [vmem:[%s4003_s5 + $0x73c] sm:$0xf] }
 0x109   : > { %v2279_v61 = vrot.slane %v1946_v47, 5  ;;  %v3381_v43 = vor.u32 %v3692_v37, %v3380_v35  ;;  %v3316_v47 = vld [vmem:[%s4003_s5 + $0x6b8] sm:$0xf]  ;;  %v3540_v50 = vld [vmem:[%s4003_s5 + $0x2bc] sm:$0xf] }
 0x10a   : > { %2159 = vmatpush.bf16.msra.mxu0 %v2797_v0  ;;  %2185 = vmatpush.bf16.msra.mxu2 %v2801_v4  ;;  %v2542_v0 = vld [vmem:[%s4003_s5 + $0xf0] sm:$0xf0]  ;;  %v2541_v4 = vor.u32 %v3483_v56, %v2540_v49  ;;  %v3676_v49 = vld [vmem:[%s4003_s5 + $0x6f4] sm:$0xf0]  ;;  %v3318_v56 = vld [vmem:[%s4003_s5 + $0x6f8] sm:$0xf0] }
 0x10b   : > { %v2545_v9 = vor.u32 %v3475_v63, %v2542_v0  ;;  %v3252_v63 = vld [vmem:[%s4003_s5 + $0x638] sm:$0xf] }
 0x10c   : > { %2172 = vmatpush.bf16.msra.mxu1 %v3309_v3  ;;  %2198 = vmatpush.bf16.msra.mxu3 %v3313_v8  ;;  %v2294_v3 = vsel %vm2293_vm1, %v2278_v46, %v2279_v61  ;;  %v3053_v8 = vor.u32 %v3611_v58, %v3052_v57  ;;  %v1934_v13 = vpop.f32.mrf.mxu2  ;;  %v3548_v46 = vld [vmem:[%s4003_s5 + $0x2f4] sm:$0xf0]  ;;  %v3317_v58 = vor.u32 %v3676_v49, %v3316_v47  ;;  %v3062_v47 = vld [vmem:[%s4003_s5 + $0x4f8] sm:$0xf0] }
 0x10d   : > { %v4510_v7 = vsel %vm2295_vm2, %v4459_v55, %v2294_v3  ;;  %v2990_v55 = vld [vmem:[%s4003_s5 + $0x470] sm:$0xf0]  ;;  %v2805_v57 = vor.u32 %v3548_v46, %v2804_v45  ;;  %v2740_v61 = vld [vmem:[%s4003_s5 + $0x238] sm:$0xf]  ;;  %v2742_v3 = vld [vmem:[%s4003_s5 + $0x278] sm:$0xf0] }
 0x10e   : > { %2160 = vmatpush.bf16.msra.mxu0 %v2733_v14  ;;  %2186 = vmatpush.bf16.msra.mxu2 %v2737_v18  ;;  %v3057_v14 = vor.u32 %v3603_v1, %v3054_v2  ;;  %v2932_v18 = vld [vmem:[%s4003_s5 + $0x3b8] sm:$0xf]  ;;  %v2993_v27 = vor.u32 %v3587_v16, %v2990_v55  ;;  %v3524_v2 = vld [vmem:[%s4003_s5 + $0x23c] sm:$0xf] }
 0x10f   : > { %v2933_v29 = vor.u32 %v3580_v19, %v2932_v18  ;;  %v3660_v1 = vld [vmem:[%s4003_s5 + $0x674] sm:$0xf0]  ;;  %v2745_v10 = vor.u32 %v3524_v2, %v2742_v3  ;;  %v3508_v55 = vld [vmem:[%s4003_s5 + $0x1bc] sm:$0xf] }
 0x110   : > { %2173 = vmatpush.bf16.msra.mxu1 %v3245_v17  ;;  %2199 = vmatpush.bf16.msra.mxu3 %v3249_v31  ;;  %v1947_v17 = vpop.f32.mrf.mxu3  ;;  %v2934_v31 = vld [vmem:[%s4003_s5 + $0x3f8] sm:$0xf0]  ;;  %v3188_v13 = vld [vmem:[%s4003_s5 + $0x5b8] sm:$0xf] }
 0x111   : > { %v3644_v16 = vld [vmem:[%s4003_s5 + $0x5f4] sm:$0xf0]  ;;  %v2678_v17 = vld [vmem:[%s4003_s5 + $0x1f8] sm:$0xf0] }
 0x112   : > { %2161 = vmatpush.bf16.msra.mxu0 %v2669_v30  ;;  %2187 = vmatpush.bf16.msra.mxu2 %v2673_v33  ;;  %v3445_v30 = vor.u32 %v3708_v21, %v3444_v20  ;;  %v2868_v33 = vld [vmem:[%s4003_s5 + $0x338] sm:$0xf]  ;;  %v3636_v18 = vld [vmem:[%s4003_s5 + $0x5bc] sm:$0xf]  ;;  %v2677_v20 = vor.u32 %v3516_v12, %v2676_v11  ;;  %v2681_v21 = vor.u32 %v3508_v55, %v2678_v17  ;;  %v1820_v55 = vperm.slane %v4417_v51, 7 }
 0x113   : > { %v2869_v42 = vor.u32 %v3564_v34, %v2868_v33  ;;  %v3190_v19 = vld [vmem:[%s4003_s5 + $0x5f8] sm:$0xf0]  ;;  %v3628_v26 = vld [vmem:[%s4003_s5 + $0x574] sm:$0xf0] }
 0x114   : > { %2174 = vmatpush.bf16.msra.mxu1 %v3181_v32  ;;  %2200 = vmatpush.bf16.msra.mxu3 %v3185_v38  ;;  %v2937_v32 = vor.u32 %v3572_v22, %v2934_v31  ;;  %v3556_v38 = vld [vmem:[%s4003_s5 + $0x33c] sm:$0xf]  ;;  %v2612_v22 = vld [vmem:[%s4003_s5 + $0x138] sm:$0xf]  ;;  %v3193_v25 = vor.u32 %v3636_v18, %v3190_v19 }
 0x115   : > { %v2873_v44 = vor.u32 %v3556_v38, %v2870_v39  ;;  %v3500_v31 = vld [vmem:[%s4003_s5 + $0x174] sm:$0xf0]  ;;  %v3126_v33 = vld [vmem:[%s4003_s5 + $0x578] sm:$0xf0] }
 0x116   : > { %2162 = vmatpush.bf16.msra.mxu0 %v2605_v48  ;;  %2188 = vmatpush.bf16.msra.mxu2 %v2609_v53  ;;  %v3385_v48 = vor.u32 %v3684_v40, %v3382_v41  ;;  %v3668_v53 = vld [vmem:[%s4003_s5 + $0x6bc] sm:$0xf]  ;;  %v2613_v34 = vor.u32 %v3500_v31, %v2612_v22  ;;  %v2548_v38 = vld [vmem:[%s4003_s5 + $0xb8] sm:$0xf] }
 0x117   : > { %v3321_v0 = vor.u32 %v3668_v53, %v3318_v56  ;;  %v3484_v39 = vld [vmem:[%s4003_s5 + $0xf4] sm:$0xf0]  ;;  %v2550_v45 = vld [vmem:[%s4003_s5 + $0xf8] sm:$0xf0] }
 0x118   : > { %2175 = vmatpush.bf16.msra.mxu1 %v3117_v52  ;;  %2201 = vmatpush.bf16.msra.mxu3 %v3121_v62  ;;  %v2806_v52 = vld [vmem:[%s4003_s5 + $0x2f8] sm:$0xf0]  ;;  %v3532_v62 = vld [vmem:[%s4003_s5 + $0x274] sm:$0xf0] }
 0x119   : > { %v2809_v59 = vor.u32 %v3540_v50, %v2806_v52  ;;  %v2741_v6 = vor.u32 %v3532_v62, %v2740_v61  ;;  %v3060_v40 = vld [vmem:[%s4003_s5 + $0x4b8] sm:$0xf]  ;;  %v3604_v46 = vld [vmem:[%s4003_s5 + $0x4bc] sm:$0xf] }
 0x11a   : > { %2163 = vmatpush.bf16.msra.mxu0 %v2541_v4  ;;  %2189 = vmatpush.bf16.msra.mxu2 %v2545_v9  ;;  %v3652_v4 = vld [vmem:[%s4003_s5 + $0x63c] sm:$0xf]  ;;  %v3253_v9 = vor.u32 %v3660_v1, %v3252_v63  ;;  %v2484_v52 = vld [vmem:[%s4003_s5 + $0x38] sm:$0xf] }
 0x11b   : > { %v3257_v15 = vor.u32 %v3652_v4, %v3254_v5  ;;  %v3468_v53 = vld [vmem:[%s4003_s5 + $0x74] sm:$0xf0]  ;;  %v3460_v61 = vld [vmem:[%s4003_s5 + $0x3c] sm:$0xf] }
 0x11c   : > { %2176 = vmatpush.bf16.msra.mxu1 %v3053_v8  ;;  %2202 = vmatpush.bf16.msra.mxu3 %v3057_v14  ;;  %v2996_v56 = vld [vmem:[%s4003_s5 + $0x438] sm:$0xf]  ;;  %v2486_v62 = vld [vmem:[%s4003_s5 + $0x78] sm:$0xf0]  ;;  %v2485_v2 = vor.u32 %v3468_v53, %v2484_v52 }
 0x11d   : > { %v2998_v1 = vld [vmem:[%s4003_s5 + $0x478] sm:$0xf0]  ;;  %v2489_v4 = vor.u32 %v3460_v61, %v2486_v62 }
 0x11e   : > { %2164 = vmatpush.bf16.msra.mxu0 %v2477_v28  ;;  %2190 = vmatpush.bf16.msra.mxu2 %v2481_v24  ;;  %v4554_v8 = vpop.f32.mrf.mxu0  ;;  %v3189_v28 = vor.u32 %v3644_v16, %v3188_v13 }
 0x120   : > { %2177 = vmatpush.bf16.msra.mxu1 %v2989_v23  ;;  %2203 = vmatpush.bf16.msra.mxu3 %v2993_v27  ;;  %v4559_v14 = vpop.f32.mrf.mxu1  ;;  %v3124_v23 = vld [vmem:[%s4003_s5 + $0x538] sm:$0xf]  ;;  %v3492_v27 = vld [vmem:[%s4003_s5 + $0x13c] sm:$0xf] }
 0x121   : > { %2191 = vmatmul.bf16.vlgmr.msra.gmra.mxu2 %v4455_v54  ;;  %2165 = vmatmul.bf16.vlgmr.msra.gmra.mxu0 %v4455_v54 }
 0x122   : > { %2209 = vmatpush.bf16.msrb.mxu0 %v2933_v29  ;;  %2235 = vmatpush.bf16.msrb.mxu2 %v2937_v32  ;;  %v2614_v29 = vld [vmem:[%s4003_s5 + $0x178] sm:$0xf0] }
 0x123   : > { %2204 = vmatmul.bf16.vlgmr.msra.gmra.mxu3 %v4464_v60  ;;  %2178 = vmatmul.bf16.vlgmr.msra.gmra.mxu1 %v4464_v60  ;;  %v3620_v32 = vld [vmem:[%s4003_s5 + $0x53c] sm:$0xf]  ;;  %v2617_v37 = vor.u32 %v3492_v27, %v2614_v29 }
 0x124   : > { %2222 = vmatpush.bf16.msrb.mxu1 %v3445_v30  ;;  %2248 = vmatpush.bf16.msrb.mxu3 %v3449_v36  ;;  %v4569_v24 = vpop.f32.mrf.mxu2  ;;  %v3125_v36 = vor.u32 %v3628_v26, %v3124_v23 }
 0x126   : > { %2210 = vmatpush.bf16.msrb.mxu0 %v2869_v42  ;;  %2236 = vmatpush.bf16.msrb.mxu2 %v2873_v44  ;;  %v4574_v30 = vpop.f32.mrf.mxu3  ;;  %v1960_v35 = vpop.f32.mrf.mxu0  ;;  %v3129_v42 = vor.u32 %v3620_v32, %v3126_v33  ;;  %v3476_v44 = vld [vmem:[%s4003_s5 + $0xbc] sm:$0xf] }
 0x127   : > { %v2553_v50 = vor.u32 %v3476_v44, %v2550_v45 }
 0x128   : > { %2223 = vmatpush.bf16.msrb.mxu1 %v3381_v43  ;;  %2249 = vmatpush.bf16.msrb.mxu3 %v3385_v48  ;;  %v1973_v41 = vpop.f32.mrf.mxu1  ;;  %v3612_v43 = vld [vmem:[%s4003_s5 + $0x4f4] sm:$0xf0]  ;;  %v2549_v48 = vor.u32 %v3484_v39, %v2548_v38 }
 0x129   : > { %v3061_v49 = vor.u32 %v3612_v43, %v3060_v40 }
 0x12a   : > { %2211 = vmatpush.bf16.msrb.mxu0 %v2805_v57  ;;  %2237 = vmatpush.bf16.msrb.mxu2 %v2809_v59  ;;  %v3596_v59 = vld [vmem:[%s4003_s5 + $0x474] sm:$0xf0] }
 0x12b   : > { %v2997_v3 = vor.u32 %v3596_v59, %v2996_v56 }
 0x12c   : > { %2224 = vmatpush.bf16.msrb.mxu1 %v3317_v58  ;;  %2250 = vmatpush.bf16.msrb.mxu3 %v3321_v0  ;;  %v1986_v57 = vpop.f32.mrf.mxu2  ;;  %v3065_v58 = vor.u32 %v3604_v46, %v3062_v47  ;;  %v3588_v0 = vld [vmem:[%s4003_s5 + $0x43c] sm:$0xf] }
 0x12d   : > { %v3001_v5 = vor.u32 %v3588_v0, %v2998_v1 }
 0x12e   : > { %2212 = vmatpush.bf16.msrb.mxu0 %v2741_v6  ;;  %2238 = vmatpush.bf16.msrb.mxu2 %v2745_v10  ;;  %v1999_v63 = vpop.f32.mrf.mxu3  ;;  %v1817_v6 = vperm.slane %v4417_v51, 4  ;;  %v1819_v10 = vperm.slane %v4417_v51, 6 }
 0x130   : > { %2225 = vmatpush.bf16.msrb.mxu1 %v3253_v9  ;;  %2251 = vmatpush.bf16.msrb.mxu3 %v3257_v15  ;;  %v1818_v9 = vperm.slane %v4417_v51, 5  ;;  %v1959_v11 = vadd.f32 %v4554_v8, %v1817_v6 }
 0x132   : > { %2213 = vmatpush.bf16.msrb.mxu0 %v2677_v20  ;;  %2239 = vmatpush.bf16.msrb.mxu2 %v2681_v21  ;;  %v1985_v12 = vadd.f32 %v4569_v24, %v1818_v9 }
 0x134   : > { %2226 = vmatpush.bf16.msrb.mxu1 %v3189_v28  ;;  %2252 = vmatpush.bf16.msrb.mxu3 %v3193_v25 }
 0x136   : > { %2214 = vmatpush.bf16.msrb.mxu0 %v2613_v34  ;;  %2240 = vmatpush.bf16.msrb.mxu2 %v2617_v37 }
 0x138   : > { %2227 = vmatpush.bf16.msrb.mxu1 %v3125_v36  ;;  %2253 = vmatpush.bf16.msrb.mxu3 %v3129_v42 }
 0x13a   : > { %2215 = vmatpush.bf16.msrb.mxu0 %v2549_v48  ;;  %2241 = vmatpush.bf16.msrb.mxu2 %v2553_v50 }
 0x13c   : > { %2228 = vmatpush.bf16.msrb.mxu1 %v3061_v49  ;;  %2254 = vmatpush.bf16.msrb.mxu3 %v3065_v58 }
 0x13e   : > { %2216 = vmatpush.bf16.msrb.mxu0 %v2485_v2  ;;  %2242 = vmatpush.bf16.msrb.mxu2 %v2489_v4  ;;  %v2010_v13 = vpop.f32.mrf.mxu0 }
 0x13f   : > { %v2011_v15 = vadd.f32 %v2010_v13, %v1819_v10 }
 0x140   : > { %2229 = vmatpush.bf16.msrb.mxu1 %v2997_v3  ;;  %2255 = vmatpush.bf16.msrb.mxu3 %v3001_v5  ;;  %v2023_v16 = vpop.f32.mrf.mxu1 }
 0x141   : > { %2217 = vmatmul.bf16.vlgmr.msrb.gmra.mxu0 %v4455_v54  ;;  %2243 = vmatmul.bf16.vlgmr.msrb.gmra.mxu2 %v4455_v54  ;;  %v1972_v54 = vadd.f32 %v4559_v14, %v1959_v11  ;;  %v2024_v17 = vadd.f32 %v2023_v16, %v2011_v15 }
 0x143   : > { %2230 = vmatmul.bf16.vlgmr.msrb.gmra.mxu1 %v4464_v60  ;;  %2256 = vmatmul.bf16.vlgmr.msrb.gmra.mxu3 %v4464_v60  ;;  %v1998_v60 = vadd.f32 %v4574_v30, %v1985_v12  ;;  %v2280_v28 = vrot.slane %v1972_v54, 4  ;;  %v2282_v8 = vrot.slane %v2024_v17, 2  ;;  %v524_v30 = vld [vmem:[%s4009_s12 + $0x8] sm:$0xff] }
 0x144   : > { %v2036_v18 = vpop.f32.mrf.mxu2  ;;  %v1821_v32 = vperm.slane %v524_v30, 0  ;;  %v1822_v36 = vperm.slane %v524_v30, 1  ;;  %v1823_v47 = vperm.slane %v524_v30, 2  ;;  %v1824_v52 = vperm.slane %v524_v30, 3 }
 0x145   : > { %v2037_v19 = vadd.f32 %v2036_v18, %v1820_v55  ;;  %v2281_v21 = vrot.slane %v1998_v60, 3  ;;  %v1825_v16 = vperm.slane %v524_v30, 4  ;;  %v1826_v55 = vperm.slane %v524_v30, 5 }
 0x146   : > { %v2049_v20 = vpop.f32.mrf.mxu3  ;;  %v2012_v31 = vpop.f32.mrf.mxu0  ;;  %v1827_v54 = vperm.slane %v524_v30, 6 }
 0x147   : > { %v2050_v22 = vadd.f32 %v2049_v20, %v2037_v19  ;;  %v2298_v14 = vsel %vm2297_vm3, %v2280_v28, %v2281_v21  ;;  %v1828_v28 = vperm.slane %v524_v30, 7 }
 0x148   : > { %v2025_v23 = vpop.f32.mrf.mxu1 }
 0x149   : > { %v2283_v51 = vrot.slane %v2050_v22, 1 }
 0x14b   : > { %v2300_v24 = vsel %vm2299_vm4, %v2282_v8, %v2283_v51 }
 0x14c   : > { %v2302_v25 = vsel %vm2301_vm5, %v2298_v14, %v2300_v24  ;;  %v2038_v26 = vpop.f32.mrf.mxu2 }
 0x14d   : > { %v2304_v27 = vsel %vm2303_vm6, %v4510_v7, %v2302_v25 }
 0x14e   : > { %v2051_v29 = vpop.f32.mrf.mxu3  ;;  %2314 = vst [vmem:[%s4611_s18] sm:$0xff] %v2304_v27 }
 0x15e   : > { %v2062_v33 = vpop.f32.mrf.mxu0 }
 0x15f   : > { %v2063_v34 = vadd.f32 %v2062_v33, %v1821_v32 }
 0x160   : > { %v2075_v35 = vpop.f32.mrf.mxu1 }
 0x161   : > { %v2076_v37 = vadd.f32 %v2075_v35, %v2063_v34 }
 0x164   : > { %v2088_v38 = vpop.f32.mrf.mxu2 }
 0x165   : > { %v2089_v39 = vadd.f32 %v2088_v38, %v1822_v36 }
 0x166   : > { %v2101_v40 = vpop.f32.mrf.mxu3  ;;  %v2064_v42 = vpop.f32.mrf.mxu0 }
 0x167   : > { %v2102_v41 = vadd.f32 %v2101_v40, %v2089_v39 }
 0x168   : > { %v2077_v43 = vpop.f32.mrf.mxu1 }
 0x169   : > { %v2284_v44 = vrot.slane %v2102_v41, 7 }
 0x16b   : > { %v2305_v45 = vsel %vm2291_vm0, %v2076_v37, %v2284_v44 }
 0x16c   : > { %v2090_v46 = vpop.f32.mrf.mxu2 }
 0x16e   : > { %v2103_v7 = vpop.f32.mrf.mxu3 }
 0x17e   : > { %v2114_v48 = vpop.f32.mrf.mxu0 }
 0x17f   : > { %v2115_v49 = vadd.f32 %v2114_v48, %v1823_v47 }
 0x180   : > { %v2127_v50 = vpop.f32.mrf.mxu1 }
 0x181   : > { %v2128_v53 = vadd.f32 %v2127_v50, %v2115_v49 }
 0x183   : > { %v2285_v59 = vrot.slane %v2128_v53, 6 }
 0x184   : > { %v2140_v56 = vpop.f32.mrf.mxu2 }
 0x185   : > { %v2141_v57 = vadd.f32 %v2140_v56, %v1824_v52 }
 0x186   : > { %v2153_v58 = vpop.f32.mrf.mxu3  ;;  %v2116_v62 = vpop.f32.mrf.mxu0 }
 0x187   : > { %v2154_v61 = vadd.f32 %v2153_v58, %v2141_v57 }
 0x188   : > { %v2129_v63 = vpop.f32.mrf.mxu1 }
 0x189   : > { %v2286_v0 = vrot.slane %v2154_v61, 5 }
 0x18b   : > { %v2306_v1 = vsel %vm2293_vm1, %v2285_v59, %v2286_v0 }
 0x18c   : > { %v2307_v2 = vsel %vm2295_vm2, %v2305_v45, %v2306_v1  ;;  %v2142_v3 = vpop.f32.mrf.mxu2 }
 0x18e   : > { %v2155_v4 = vpop.f32.mrf.mxu3 }
 0x19e   : > { %v2166_v5 = vpop.f32.mrf.mxu0 }
 0x19f   : > { %v2167_v18 = vadd.f32 %v2166_v5, %v1825_v16 }
 0x1a0   : > { %v2179_v6 = vpop.f32.mrf.mxu1 }
 0x1a1   : > { %v2180_v21 = vadd.f32 %v2179_v6, %v2167_v18 }
 0x1a3   : > { %v2287_v25 = vrot.slane %v2180_v21, 4 }
 0x1a4   : > { %v2192_v9 = vpop.f32.mrf.mxu2 }
 0x1a5   : > { %v2193_v19 = vadd.f32 %v2192_v9, %v1826_v55 }
 0x1a6   : > { %v2205_v10 = vpop.f32.mrf.mxu3  ;;  %v2168_v11 = vpop.f32.mrf.mxu0 }
 0x1a7   : > { %v2206_v8 = vadd.f32 %v2205_v10, %v2193_v19 }
 0x1a8   : > { %v2181_v12 = vpop.f32.mrf.mxu1 }
 0x1a9   : > { %v2288_v26 = vrot.slane %v2206_v8, 3 }
 0x1ab   : > { %v2308_v33 = vsel %vm2297_vm3, %v2287_v25, %v2288_v26 }
 0x1ac   : > { %v2194_v13 = vpop.f32.mrf.mxu2 }
 0x1ae   : > { %v2207_v15 = vpop.f32.mrf.mxu3 }
 0x1be   : > { %v2218_v60 = vpop.f32.mrf.mxu0 }
 0x1bf   : > { %v2219_v20 = vadd.f32 %v2218_v60, %v1827_v54 }
 0x1c0   : > { %v2231_v17 = vpop.f32.mrf.mxu1 }
 0x1c1   : > { %v2232_v22 = vadd.f32 %v2231_v17, %v2219_v20 }
 0x1c3   : > { %v2289_v27 = vrot.slane %v2232_v22, 2 }
 0x1c4   : > { %v2244_v31 = vpop.f32.mrf.mxu2 }
 0x1c5   : > { %v2245_v23 = vadd.f32 %v2244_v31, %v1828_v28 }
 0x1c6   : > { %v2257_v51 = vpop.f32.mrf.mxu3  ;;  %v2220_v14 = vpop.f32.mrf.mxu0 }
 0x1c7   : > { %v2258_v29 = vadd.f32 %v2257_v51, %v2245_v23 }
 0x1c8   : > { %v2233_v24 = vpop.f32.mrf.mxu1 }
 0x1c9   : > { %v2290_v32 = vrot.slane %v2258_v29, 1 }
 0x1cb   : > { %v2309_v34 = vsel %vm2299_vm4, %v2289_v27, %v2290_v32 }
 0x1cc   : > { %v2310_v30 = vsel %vm2301_vm5, %v2308_v33, %v2309_v34  ;;  %v2246_v35 = vpop.f32.mrf.mxu2 }
 0x1cd   : > { %v2311_v36 = vsel %vm2303_vm6, %v2307_v2, %v2310_v30 }
 0x1ce   : > { %v2259_v37 = vpop.f32.mrf.mxu3  ;;  %2315 = vst [vmem:[%s4611_s18 + $0x8] sm:$0xff] %v2311_v36 }
 0x1cf PF: > { %p25_p10 = scmp.ge.s32.totalorder %s3927_s23, 6   ;;  %s4649_s19 = smov %s3863_s20 }
 0x1d0   : > { %s4650_s20 = smov %s3867_s21  ;;  %s4651_s21 = smov %s3937_s26 }
 0x1d1   : > { %s4652_s22 = smov %s3927_s23  ;;  %27 = sbr.rel (!%p25_p10) target bundleno = 11 (0xb), region = 88 }
 0x1d6   :  { %2336 = vsyncpa [#allocation5], 1 }
 0x1d7   :  { %2338 = vsyncpa [#allocation5 + $0x1], 1 }
 0x1d8   :  { %2339 = vsyncpa [#allocation7], 1 }
 0x1d9   :  { %2341 = vsyncpa [#allocation7 + $0x1], 1 }

// kernel: forward.3
= control target key start
LH: loop header
LB: loop body
LE: loop exit
PB: predicated region body
PF: predicated region fallthrough
CT: control target
= control target key end

     0   :  { %14 = vsyncpa [#allocation3], 0  ;;  %s1244_s0 = inlined_call_operand.vmem [shape: f32[8,128], index: 0, kind: input, shape index: {}]   ;;  %s1245_s1 = inlined_call_operand.hbm [shape: bf16[128,128], index: 1, kind: input, shape index: {}]   ;;  %s1246_s2 = inlined_call_operand.vmem [shape: s8[128,128], index: 2, kind: input, shape index: {}]   ;;  %s1247_s3 = inlined_call_operand.hbm [shape: f32[1,128], index: 3, kind: input, shape index: {}]   ;;  %s1248_s4 = inlined_call_operand.vmem [shape: s8[1,128], index: 4, kind: input, shape index: {}]   ;;  %s1249_s5 = inlined_call_operand.hbm [shape: bf16[128,128], index: 5, kind: input, shape index: {}]   ;;  %s1250_s6 = inlined_call_operand.vmem [shape: s8[128,128], index: 6, kind: input, shape index: {}]   ;;  %s1251_s7 = inlined_call_operand.hbm [shape: f32[1,128], index: 7, kind: input, shape index: {}]   ;;  %s1252_s8 = inlined_call_operand.vmem [shape: s8[1,128], index: 8, kind: input, shape index: {}]   ;;  %s1253_s9 = inlined_call_operand.vmem [shape: f32[8,128], index: 9, kind: output, shape index: {}]  }
   0x1   :  { %15 = vsyncpa [#allocation5], 0  ;;  %s39_s11 = sshll.u32 %s1247_s3, 4  ;;  %s40_s11 = int_to_ptr.hbm [resolvable:$true] %s39_s11 }
   0x2   :  { %16 = vsyncpa [#allocation8], 0  ;;  %s990_s12 = smov [#allocation4]   ;;  %s23_s16 = sshll.u32 %s1245_s1, 4  ;;  %s24_s16 = int_to_ptr.hbm [resolvable:$true] %s23_s16 }
   0x3   :  { %s41_s13 = sshll.u32 %s990_s12, 4  ;;  %s991_s17 = smov [#allocation2]   ;;  %s42_s13 = int_to_ptr.vmem [resolvable:$true] %s41_s13 }
   0x4   :  { %44 = dma.hbm_to_vmem [thread:$0]  %s40_s11, 16, %s42_s13, [#allocation5]  }
   0x5   :  { %s25_s18 = sshll.u32 %s991_s17, 4  ;;  %s992_s19 = smov 64   ;;  %s26_s18 = int_to_ptr.vmem [resolvable:$true] %s25_s18 }
   0x6   :  { %s993_s20 = smov 4   ;;  %s51_s3 = sshll.u32 %s1249_s5, 4  ;;  %s52_s3 = int_to_ptr.hbm [resolvable:$true] %s51_s3 }
   0x7   :  { %31 = dma.hbm_to_vmem [thread:$0]  %s24_s16, 1024, %s26_s18, [#allocation3], %s992_s19, %s992_s19, %s993_s20  }
   0x8   :  { %s994_s23 = smov [#allocation6]   ;;  %s67_s1 = sshll.u32 %s1251_s7, 4  ;;  %s68_s1 = int_to_ptr.hbm [resolvable:$true] %s67_s1 }
   0x9   :  { %s53_s24 = sshll.u32 %s994_s23, 4  ;;  %s995_s27 = smov [#allocation7]   ;;  %s54_s24 = int_to_ptr.vmem [resolvable:$true] %s53_s24 }
   0xa   :  { %59 = dma.hbm_to_vmem [thread:$0]  %s52_s3, 1024, %s54_s24, [#allocation5], %s992_s19, %s992_s19, %s993_s20  }
   0xb   :  { %s69_s28 = sshll.u32 %s995_s27, 4  ;;  %s70_s28 = int_to_ptr.vmem [resolvable:$true] %s69_s28 }
   0xc   :  { %72 = dma.hbm_to_vmem [thread:$0]  %s68_s1, 16, %s70_s28, [#allocation8]  }
   0xd   :  { %984 = dma.done.wait [#allocation3], 1024  }
   0xe   :  { %985 = vsyncadd [#allocation3], 4294966272 }
   0xf   :  { %986 = dma.done.wait [#allocation5], 1040  }
  0x10   :  { %987 = vsyncadd [#allocation5], 4294966256 }
  0x11   :  { %988 = dma.done.wait [#allocation8], 16  }
  0x12   :  { %989 = vsyncadd [#allocation8], 4294967280  ;;  %v98_v0 = vld [vmem:[%s1246_s2 + $0x18] sm:$0xff]  ;;  %v97_v1 = vld [vmem:[%s1246_s2 + $0x10] sm:$0xff]  ;;  %v996_v2 = vmov 0  }
  0x13   :  { %vm102_vm0 = vnez %v98_v0  ;;  %vm101_vm1 = vnez %v97_v1  ;;  %v1067_v8 = vunpack.c.l.b16 %v996_v2  ;;  %v1070_v9 = vunpack.c.h.b16 %v996_v2  ;;  %v1084_v43 = vld [vmem:[%s1246_s2 + $0x8] sm:$0xff]  ;;  %v117_v44 = vld [vmem:[#allocation2 + $0x38] sm:$0xf]  ;;  %v118_v49 = vld [vmem:[#allocation2 + $0x3c] sm:$0xf] }
  0x14   :  { %v122_v3 = vsel %vm102_vm0, 16843009, %v996_v2  ;;  %v121_v10 = vsel %vm101_vm1, 16843009, %v996_v2  ;;  %v115_v50 = vld [vmem:[#allocation2 + $0x30] sm:$0xf]  ;;  %vm100_vm13 = vnez %v1084_v43 }
  0x15   :  { %v137_v4 = vunpack.c.2.s8 %v122_v3  ;;  %v138_v5 = vunpack.c.3.s8 %v122_v3  ;;  %v135_v6 = vunpack.c.0.s8 %v122_v3  ;;  %v136_v7 = vunpack.c.1.s8 %v122_v3  ;;  %v116_v54 = vld [vmem:[#allocation2 + $0x34] sm:$0xf] }
  0x16   :  { %v133_v15 = vunpack.c.2.s8 %v121_v10  ;;  %v134_v16 = vunpack.c.3.s8 %v121_v10  ;;  %v131_v17 = vunpack.c.0.s8 %v121_v10  ;;  %v132_v18 = vunpack.c.1.s8 %v121_v10 }
  0x17   :  { %v167_v11 = vpack.c.b16 %v137_v4, %v137_v4  ;;  %v169_v12 = vpack.c.b16 %v138_v5, %v138_v5  ;;  %v163_v13 = vpack.c.b16 %v135_v6, %v135_v6  ;;  %v165_v14 = vpack.c.b16 %v136_v7, %v136_v7 }
  0x18   :  { %v159_v23 = vpack.c.b16 %v133_v15, %v133_v15  ;;  %v161_v24 = vpack.c.b16 %v134_v16, %v134_v16  ;;  %v1073_v25 = vpack.c.b16 %v131_v17, %v131_v17  ;;  %v1075_v26 = vpack.c.b16 %v132_v18, %v132_v18  ;;  %v114_v17 = vld [vmem:[#allocation2 + $0x2c] sm:$0xf] }
  0x19   :  { %v168_v19 = vpack.c.b8 %v167_v11, %v167_v11  ;;  %v170_v20 = vpack.c.b8 %v169_v12, %v169_v12  ;;  %v164_v21 = vpack.c.b8 %v163_v13, %v163_v13  ;;  %v166_v22 = vpack.c.b8 %v165_v14, %v165_v14  ;;  %v113_v13 = vld [vmem:[#allocation2 + $0x28] sm:$0xf] }
  0x1a   :  { %v160_v30 = vpack.c.b8 %v159_v23, %v159_v23  ;;  %v162_v38 = vpack.c.b8 %v161_v24, %v161_v24  ;;  %v156_v55 = vpack.c.b8 %v1073_v25, %v1073_v25  ;;  %v158_v11 = vpack.c.b8 %v1075_v26, %v1075_v26 }
  0x1b   :  { %vm185_vm2 = vnez %v168_v19  ;;  %vm186_vm3 = vnez %v170_v20  ;;  %vm183_vm4 = vnez %v164_v21  ;;  %vm184_vm5 = vnez %v166_v22 }
  0x1c   :  { %v201_v27 = vsel %vm185_vm2, 16843009, %v996_v2  ;;  %v202_v28 = vsel %vm186_vm3, 16843009, %v996_v2  ;;  %v199_v29 = vsel %vm183_vm4, 16843009, %v996_v2  ;;  %vm181_vm15 = vnez %v160_v30 }
  0x1d   :  { %v245_v31 = vunpack.c.1.s8 %v201_v27  ;;  %v246_v32 = vunpack.c.0.s8 %v201_v27  ;;  %v248_v33 = vunpack.c.1.s8 %v202_v28  ;;  %v249_v34 = vunpack.c.0.s8 %v202_v28  ;;  %v111_v30 = vld [vmem:[#allocation2 + $0x20] sm:$0xf] }
  0x1e   :  { %v200_v35 = vsel %vm184_vm5, 16843009, %v996_v2  ;;  %v239_v36 = vunpack.c.1.s8 %v199_v29  ;;  %v240_v37 = vunpack.c.0.s8 %v199_v29  ;;  %vm182_vm0 = vnez %v162_v38 }
  0x1f   :  { %v845_v39 = vunpack.i.l.s16 %v246_v32  ;;  %v846_v40 = vunpack.i.l.s16 %v245_v31  ;;  %v847_v41 = vunpack.i.l.s16 %v249_v34  ;;  %v848_v42 = vunpack.i.l.s16 %v248_v33  ;;  %v112_v33 = vld [vmem:[#allocation2 + $0x24] sm:$0xf] }
  0x20   :  { %v242_v45 = vunpack.c.1.s8 %v200_v35  ;;  %v243_v46 = vunpack.c.0.s8 %v200_v35  ;;  %v841_v47 = vunpack.i.l.s16 %v240_v37  ;;  %v842_v48 = vunpack.i.l.s16 %v239_v36  ;;  %v95_v37 = vld [vmem:[%s1246_s2] sm:$0xff] }
  0x21   :  { %vm353_vm6 = vcmp.ne.s32.totalorder %v845_v39, %v1067_v8  ;;  %vm354_vm7 = vcmp.ne.s32.totalorder %v846_v40, %v1070_v9  ;;  %vm360_vm8 = vcmp.ne.s32.totalorder %v847_v41, %v1067_v8  ;;  %vm361_vm9 = vcmp.ne.s32.totalorder %v848_v42, %v1070_v9 }
  0x22   :  { %vm355_vm10 = vmpackc.low %vm354_vm7, %vm353_vm6  ;;  %vm339_vm11 = vcmp.ne.s32.totalorder %v841_v47, %v1067_v8  ;;  %vm340_vm12 = vcmp.ne.s32.totalorder %v842_v48, %v1070_v9  ;;  %v843_v51 = vunpack.i.l.s16 %v243_v46  ;;  %v844_v52 = vunpack.i.l.s16 %v242_v45 }
  0x23   :  { %vm362_vm14 = vmpackc.low %vm361_vm9, %vm360_vm8  ;;  %v377_v53 = vsel %vm355_vm10, %v117_v44, 0  ;;  %v197_v60 = vsel %vm181_vm15, 16843009, %v996_v2  ;;  %v198_v61 = vsel %vm182_vm0, 16843009, %v996_v2  ;;  %vm179_vm5 = vnez %v156_v55 }
  0x24   :  { %v378_v56 = vsel %vm362_vm14, %v118_v49, 0  ;;  %v712_v57 = vunpack.c.l.b16 %v377_v53  ;;  %vm341_vm1 = vmpackc.low %vm340_vm12, %vm339_vm11  ;;  %vm346_vm2 = vcmp.ne.s32.totalorder %v843_v51, %v1067_v8  ;;  %vm347_vm3 = vcmp.ne.s32.totalorder %v844_v52, %v1070_v9 }
  0x25   :  { %v713_v58 = vunpack.c.l.b16 %v378_v56  ;;  %vm348_vm4 = vmpackc.low %vm347_vm3, %vm346_vm2  ;;  %v375_v59 = vsel %vm341_vm1, %v115_v50, 0  ;;  %v233_v0 = vunpack.c.1.s8 %v197_v60  ;;  %v234_v1 = vunpack.c.0.s8 %v197_v60 }
  0x26   :  { %v376_v62 = vsel %vm348_vm4, %v116_v54, 0  ;;  %v710_v63 = vunpack.c.l.b16 %v375_v59  ;;  %v236_v5 = vunpack.c.1.s8 %v198_v61  ;;  %v237_v6 = vunpack.c.0.s8 %v198_v61 }
  0x27   :  { %v721_v3 = vpack.c.b16 %v713_v58, %v712_v57  ;;  %v711_v4 = vunpack.c.l.b16 %v376_v62  ;;  %v837_v7 = vunpack.i.l.s16 %v234_v1  ;;  %v838_v10 = vunpack.i.l.s16 %v233_v0 }
  0x28   :  { %v839_v14 = vunpack.i.l.s16 %v237_v6  ;;  %v840_v15 = vunpack.i.l.s16 %v236_v5  ;;  %v195_v16 = vsel %vm179_vm5, 16843009, %v996_v2  ;;  %vm180_vm8 = vnez %v158_v11  ;;  %v109_v6 = vld [vmem:[#allocation2 + $0x18] sm:$0xf] }
  0x29   :  { %730 = vmatpush.bf16.msra.mxu0 %v721_v3  ;;  %v720_v12 = vpack.c.b16 %v711_v4, %v710_v63  ;;  %vm325_vm6 = vcmp.ne.s32.totalorder %v837_v7, %v1067_v8  ;;  %vm326_vm7 = vcmp.ne.s32.totalorder %v838_v10, %v1070_v9  ;;  %v227_v18 = vunpack.c.1.s8 %v195_v16 }
  0x2a   :  { %vm327_vm9 = vmpackc.low %vm326_vm7, %vm325_vm6  ;;  %vm332_vm10 = vcmp.ne.s32.totalorder %v839_v14, %v1067_v8  ;;  %vm333_vm11 = vcmp.ne.s32.totalorder %v840_v15, %v1070_v9  ;;  %v196_v19 = vsel %vm180_vm8, 16843009, %v996_v2  ;;  %v228_v20 = vunpack.c.0.s8 %v195_v16  ;;  %v107_v14 = vld [vmem:[#allocation2 + $0x10] sm:$0xf] }
  0x2b   :  { %vm334_vm12 = vmpackc.low %vm333_vm11, %vm332_vm10  ;;  %v373_v21 = vsel %vm327_vm9, %v113_v13, 0  ;;  %v230_v22 = vunpack.c.1.s8 %v196_v19  ;;  %v231_v23 = vunpack.c.0.s8 %v196_v19  ;;  %v834_v24 = vunpack.i.l.s16 %v227_v18  ;;  %v110_v13 = vld [vmem:[#allocation2 + $0x1c] sm:$0xf]  ;;  %v108_v18 = vld [vmem:[#allocation2 + $0x14] sm:$0xf] }
  0x2c   :  { %v374_v25 = vsel %vm334_vm12, %v114_v17, 0  ;;  %v708_v26 = vunpack.c.l.b16 %v373_v21  ;;  %v833_v27 = vunpack.i.l.s16 %v228_v20  ;;  %v120_v28 = vsel %vm100_vm13, 16843009, %v996_v2 }
  0x2d   :  { %731 = vmatpush.bf16.msra.mxu0 %v720_v12  ;;  %v709_v29 = vunpack.c.l.b16 %v374_v25  ;;  %vm312_vm14 = vcmp.ne.s32.totalorder %v834_v24, %v1070_v9  ;;  %v835_v31 = vunpack.i.l.s16 %v231_v23  ;;  %v836_v32 = vunpack.i.l.s16 %v230_v22 }
  0x2e   :  { %vm311_vm15 = vcmp.ne.s32.totalorder %v833_v27, %v1067_v8  ;;  %v129_v34 = vunpack.c.2.s8 %v120_v28  ;;  %v130_v35 = vunpack.c.3.s8 %v120_v28  ;;  %v127_v36 = vunpack.c.0.s8 %v120_v28 }
  0x2f   :  { %v719_v38 = vpack.c.b16 %v709_v29, %v708_v26  ;;  %vm313_vm0 = vmpackc.low %vm312_vm14, %vm311_vm15  ;;  %vm318_vm13 = vcmp.ne.s32.totalorder %v835_v31, %v1067_v8  ;;  %vm319_vm1 = vcmp.ne.s32.totalorder %v836_v32, %v1070_v9  ;;  %v128_v39 = vunpack.c.1.s8 %v120_v28  ;;  %v1138_v28 = vld [vmem:[%s1244_s0] sm:$0xff] }
  0x30   :  { %vm320_vm2 = vmpackc.low %vm319_vm1, %vm318_vm13  ;;  %v371_v40 = vsel %vm313_vm0, %v111_v30, 0  ;;  %v151_v41 = vpack.c.b16 %v129_v34, %v129_v34  ;;  %v153_v42 = vpack.c.b16 %v130_v35, %v130_v35  ;;  %v147_v43 = vpack.c.b16 %v127_v36, %v127_v36  ;;  %v382_v36 = vld [vmem:[%s1250_s6 + $0x18] sm:$0xff] }
  0x31   :  { %732 = vmatpush.bf16.msra.mxu0 %v719_v38  ;;  %v372_v44 = vsel %vm320_vm2, %v112_v33, 0  ;;  %v706_v45 = vunpack.c.l.b16 %v371_v40  ;;  %v149_v46 = vpack.c.b16 %v128_v39, %v128_v39  ;;  %vm99_vm3 = vnez %v95_v37 }
  0x32   :  { %v707_v47 = vunpack.c.l.b16 %v372_v44  ;;  %v152_v48 = vpack.c.b8 %v151_v41, %v151_v41  ;;  %v154_v49 = vpack.c.b8 %v153_v42, %v153_v42  ;;  %v148_v50 = vpack.c.b8 %v147_v43, %v147_v43  ;;  %v1150_v44 = vld [vmem:[%s1250_s6 + $0x10] sm:$0xff] }
  0x33   :  { %v150_v51 = vpack.c.b8 %v149_v46, %v149_v46  ;;  %v1118_v52 = vsel %vm99_vm3, 16843009, %v996_v2  ;;  %v678_v40 = vpack.c.bf16 %v1138_v28, %v1138_v28 }
  0x34   :  { %v718_v53 = vpack.c.b16 %v707_v47, %v706_v45  ;;  %vm177_vm4 = vnez %v152_v48  ;;  %vm178_vm5 = vnez %v154_v49  ;;  %vm175_vm6 = vnez %v148_v50 }
  0x35   :  { %v193_v54 = vsel %vm177_vm4, 16843009, %v996_v2  ;;  %v194_v55 = vsel %vm178_vm5, 16843009, %v996_v2  ;;  %vm176_vm7 = vnez %v150_v51  ;;  %v191_v56 = vsel %vm175_vm6, 16843009, %v996_v2 }
  0x36   :  { %733 = vmatpush.bf16.msra.mxu0 %v718_v53  ;;  %v221_v57 = vunpack.c.1.s8 %v193_v54  ;;  %v222_v58 = vunpack.c.0.s8 %v193_v54  ;;  %v224_v59 = vunpack.c.1.s8 %v194_v55  ;;  %v225_v60 = vunpack.c.0.s8 %v194_v55  ;;  %v105_v51 = vld [vmem:[#allocation2 + $0x8] sm:$0xf] }
  0x37   :  { %v192_v61 = vsel %vm176_vm7, 16843009, %v996_v2  ;;  %v215_v62 = vunpack.c.1.s8 %v191_v56  ;;  %v216_v63 = vunpack.c.0.s8 %v191_v56  ;;  %v125_v0 = vunpack.c.2.s8 %v1118_v52  ;;  %v106_v56 = vld [vmem:[#allocation2 + $0xc] sm:$0xf] }
  0x38   :  { %v829_v1 = vunpack.i.l.s16 %v222_v58  ;;  %v830_v3 = vunpack.i.l.s16 %v221_v57  ;;  %v831_v4 = vunpack.i.l.s16 %v225_v60  ;;  %v832_v5 = vunpack.i.l.s16 %v224_v59 }
  0x39   :  { %v218_v7 = vunpack.c.1.s8 %v192_v61  ;;  %v219_v10 = vunpack.c.0.s8 %v192_v61  ;;  %v825_v11 = vunpack.i.l.s16 %v216_v63  ;;  %v826_v12 = vunpack.i.l.s16 %v215_v62 }
  0x3a   :  { %vm297_vm8 = vcmp.ne.s32.totalorder %v829_v1, %v1067_v8  ;;  %vm298_vm9 = vcmp.ne.s32.totalorder %v830_v3, %v1070_v9  ;;  %vm304_vm10 = vcmp.ne.s32.totalorder %v831_v4, %v1067_v8  ;;  %vm305_vm11 = vcmp.ne.s32.totalorder %v832_v5, %v1070_v9  ;;  %v103_v5 = vld [vmem:[#allocation2] sm:$0xf] }
  0x3b   :  { %vm299_vm12 = vmpackc.low %vm298_vm9, %vm297_vm8  ;;  %vm283_vm14 = vcmp.ne.s32.totalorder %v825_v11, %v1067_v8  ;;  %vm284_vm15 = vcmp.ne.s32.totalorder %v826_v12, %v1070_v9  ;;  %v827_v15 = vunpack.i.l.s16 %v219_v10  ;;  %v828_v16 = vunpack.i.l.s16 %v218_v7 }
  0x3c   :  { %vm306_vm0 = vmpackc.low %vm305_vm11, %vm304_vm10  ;;  %v369_v17 = vsel %vm299_vm12, %v109_v6, 0  ;;  %v126_v19 = vunpack.c.3.s8 %v1118_v52  ;;  %v143_v20 = vpack.c.b16 %v125_v0, %v125_v0  ;;  %v123_v21 = vunpack.c.0.s8 %v1118_v52 }
  0x3d   :  { %v370_v22 = vsel %vm306_vm0, %v110_v13, 0  ;;  %v704_v23 = vunpack.c.l.b16 %v369_v17  ;;  %vm285_vm13 = vmpackc.low %vm284_vm15, %vm283_vm14  ;;  %vm290_vm1 = vcmp.ne.s32.totalorder %v827_v15, %v1067_v8  ;;  %vm291_vm2 = vcmp.ne.s32.totalorder %v828_v16, %v1070_v9  ;;  %v104_v13 = vld [vmem:[#allocation2 + $0x4] sm:$0xf] }
  0x3e   :  { %v705_v24 = vunpack.c.l.b16 %v370_v22  ;;  %vm292_vm3 = vmpackc.low %vm291_vm2, %vm290_vm1  ;;  %v367_v25 = vsel %vm285_vm13, %v107_v14, 0  ;;  %v144_v26 = vpack.c.b8 %v143_v20, %v143_v20  ;;  %v145_v27 = vpack.c.b16 %v126_v19, %v126_v19 }
  0x3f   :  { %v368_v29 = vsel %vm292_vm3, %v108_v18, 0  ;;  %v702_v30 = vunpack.c.l.b16 %v367_v25  ;;  %v124_v31 = vunpack.c.1.s8 %v1118_v52  ;;  %v139_v32 = vpack.c.b16 %v123_v21, %v123_v21 }
  0x40   :  { %v717_v33 = vpack.c.b16 %v705_v24, %v704_v23  ;;  %v703_v34 = vunpack.c.l.b16 %v368_v29  ;;  %v146_v35 = vpack.c.b8 %v145_v27, %v145_v27  ;;  %vm173_vm4 = vnez %v144_v26 }
  0x41   :  { %v189_v37 = vsel %vm173_vm4, 16843009, %v996_v2  ;;  %v140_v38 = vpack.c.b8 %v139_v32, %v139_v32  ;;  %v141_v39 = vpack.c.b16 %v124_v31, %v124_v31  ;;  %vm386_vm7 = vnez %v382_v36 }
  0x42   :  { %734 = vmatpush.bf16.msra.mxu0 %v717_v33  ;;  %v716_v41 = vpack.c.b16 %v703_v34, %v702_v30  ;;  %vm174_vm5 = vnez %v146_v35  ;;  %v209_v42 = vunpack.c.1.s8 %v189_v37  ;;  %v210_v43 = vunpack.c.0.s8 %v189_v37 }
  0x43   :  { %v190_v45 = vsel %vm174_vm5, 16843009, %v996_v2  ;;  %v142_v46 = vpack.c.b8 %v141_v39, %v141_v39  ;;  %vm171_vm6 = vnez %v140_v38  ;;  %v406_v53 = vsel %vm386_vm7, 16843009, %v996_v2 }
  0x44   :  { %v212_v47 = vunpack.c.1.s8 %v190_v45  ;;  %v213_v48 = vunpack.c.0.s8 %v190_v45  ;;  %v821_v49 = vunpack.i.l.s16 %v210_v43  ;;  %v822_v50 = vunpack.i.l.s16 %v209_v42  ;;  %v401_v42 = vld [vmem:[#allocation6 + $0x38] sm:$0xf] }
  0x45   :  { %vm172_vm8 = vnez %v142_v46  ;;  %v187_v52 = vsel %vm171_vm6, 16843009, %v996_v2  ;;  %vm385_vm9 = vnez %v1150_v44  ;;  %v421_v60 = vunpack.c.2.s8 %v406_v53  ;;  %v402_v46 = vld [vmem:[#allocation6 + $0x3c] sm:$0xf] }
  0x46   :  { %735 = vmatpush.bf16.msra.mxu0 %v716_v41  ;;  %vm269_vm10 = vcmp.ne.s32.totalorder %v821_v49, %v1067_v8  ;;  %vm270_vm11 = vcmp.ne.s32.totalorder %v822_v50, %v1070_v9  ;;  %v823_v54 = vunpack.i.l.s16 %v213_v48  ;;  %v824_v55 = vunpack.i.l.s16 %v212_v47 }
  0x47   :  { %vm271_vm12 = vmpackc.low %vm270_vm11, %vm269_vm10  ;;  %v188_v57 = vsel %vm172_vm8, 16843009, %v996_v2  ;;  %v203_v58 = vunpack.c.1.s8 %v187_v52  ;;  %v204_v59 = vunpack.c.0.s8 %v187_v52  ;;  %v422_v7 = vunpack.c.3.s8 %v406_v53 }
  0x48   :  { %vm276_vm14 = vcmp.ne.s32.totalorder %v823_v54, %v1067_v8  ;;  %vm277_vm15 = vcmp.ne.s32.totalorder %v824_v55, %v1070_v9  ;;  %v365_v61 = vsel %vm271_vm12, %v105_v51, 0  ;;  %v206_v62 = vunpack.c.1.s8 %v188_v57 }
  0x49   :  { %vm278_vm0 = vmpackc.low %vm277_vm15, %vm276_vm14  ;;  %v700_v63 = vunpack.c.l.b16 %v365_v61  ;;  %v207_v0 = vunpack.c.0.s8 %v188_v57  ;;  %v817_v1 = vunpack.i.l.s16 %v204_v59  ;;  %v818_v3 = vunpack.i.l.s16 %v203_v58  ;;  %v399_v58 = vld [vmem:[#allocation6 + $0x30] sm:$0xf] }
  0x4a   :  { %v366_v4 = vsel %vm278_vm0, %v106_v56, 0  ;;  %v820_v6 = vunpack.i.l.s16 %v206_v62  ;;  %v451_v10 = vpack.c.b16 %v421_v60, %v421_v60  ;;  %v453_v15 = vpack.c.b16 %v422_v7, %v422_v7  ;;  %v400_v62 = vld [vmem:[#allocation6 + $0x34] sm:$0xf] }
  0x4b   :  { %v701_v11 = vunpack.c.l.b16 %v366_v4  ;;  %vm255_vm13 = vcmp.ne.s32.totalorder %v817_v1, %v1067_v8  ;;  %vm256_vm1 = vcmp.ne.s32.totalorder %v818_v3, %v1070_v9  ;;  %v819_v12 = vunpack.i.l.s16 %v207_v0  ;;  %v380_v4 = vld [vmem:[%s1250_s6 + $0x8] sm:$0xff] }
  0x4c   :  { %vm257_vm2 = vmpackc.low %vm256_vm1, %vm255_vm13  ;;  %vm263_vm3 = vcmp.ne.s32.totalorder %v820_v6, %v1070_v9  ;;  %v452_v14 = vpack.c.b8 %v451_v10, %v451_v10  ;;  %v419_v16 = vunpack.c.0.s8 %v406_v53  ;;  %v420_v19 = vunpack.c.1.s8 %v406_v53 }
  0x4d   :  { %v715_v17 = vpack.c.b16 %v701_v11, %v700_v63  ;;  %vm262_vm4 = vcmp.ne.s32.totalorder %v819_v12, %v1067_v8  ;;  %v363_v18 = vsel %vm257_vm2, %v103_v5, 0  ;;  %v454_v21 = vpack.c.b8 %v453_v15, %v453_v15 }
  0x4e   :  { %vm264_vm5 = vmpackc.low %vm263_vm3, %vm262_vm4  ;;  %v698_v20 = vunpack.c.l.b16 %v363_v18  ;;  %vm469_vm6 = vnez %v452_v14  ;;  %v447_v22 = vpack.c.b16 %v419_v16, %v419_v16  ;;  %v449_v25 = vpack.c.b16 %v420_v19, %v420_v19 }
  0x4f   :  { %736 = vmatpush.bf16.msra.mxu0 %v715_v17  ;;  %v364_v23 = vsel %vm264_vm5, %v104_v13, 0  ;;  %v485_v24 = vsel %vm469_vm6, 16843009, %v996_v2  ;;  %v1169_v26 = vsel %vm385_vm9, 16843009, %v996_v2  ;;  %vm470_vm7 = vnez %v454_v21 }
  0x50   :  { %v699_v27 = vunpack.c.l.b16 %v364_v23  ;;  %v529_v29 = vunpack.c.1.s8 %v485_v24  ;;  %v530_v30 = vunpack.c.0.s8 %v485_v24  ;;  %v486_v31 = vsel %vm470_vm7, 16843009, %v996_v2 }
  0x51   :  { %v448_v32 = vpack.c.b8 %v447_v22, %v447_v22  ;;  %v450_v33 = vpack.c.b8 %v449_v25, %v449_v25  ;;  %v417_v34 = vunpack.c.2.s8 %v1169_v26  ;;  %v532_v36 = vunpack.c.1.s8 %v486_v31 }
  0x52   :  { %v714_v35 = vpack.c.b16 %v699_v27, %v698_v20  ;;  %v533_v37 = vunpack.c.0.s8 %v486_v31  ;;  %v877_v38 = vunpack.i.l.s16 %v530_v30  ;;  %v878_v39 = vunpack.i.l.s16 %v529_v29  ;;  %v397_v20 = vld [vmem:[#allocation6 + $0x28] sm:$0xf] }
  0x53   :  { %vm467_vm8 = vnez %v448_v32  ;;  %vm468_vm10 = vnez %v450_v33  ;;  %v418_v41 = vunpack.c.3.s8 %v1169_v26  ;;  %v880_v44 = vunpack.i.l.s16 %v532_v36 }
  0x54   :  { %737 = vmatpush.bf16.msra.mxu0 %v714_v35  ;;  %vm637_vm9 = vcmp.ne.s32.totalorder %v877_v38, %v1067_v8  ;;  %v879_v43 = vunpack.i.l.s16 %v533_v37  ;;  %v483_v45 = vsel %vm467_vm8, 16843009, %v996_v2  ;;  %vm638_vm11 = vcmp.ne.s32.totalorder %v878_v39, %v1070_v9 }
  0x55   :  { %v484_v47 = vsel %vm468_vm10, 16843009, %v996_v2  ;;  %v523_v48 = vunpack.c.1.s8 %v483_v45  ;;  %v524_v49 = vunpack.c.0.s8 %v483_v45  ;;  %vm639_vm12 = vmpackc.low %vm638_vm11, %vm637_vm9  ;;  %vm645_vm15 = vcmp.ne.s32.totalorder %v880_v44, %v1070_v9 }
  0x56   :  { %vm644_vm14 = vcmp.ne.s32.totalorder %v879_v43, %v1067_v8  ;;  %v526_v50 = vunpack.c.1.s8 %v484_v47  ;;  %v527_v51 = vunpack.c.0.s8 %v484_v47  ;;  %v661_v52 = vsel %vm639_vm12, %v401_v42, 0 }
  0x57   :  { %738 = vmatmul.bf16.vlgmr.msra.gmra.mxu0 %v678_v40  ;;  %vm646_vm0 = vmpackc.low %vm645_vm15, %vm644_vm14  ;;  %v873_v53 = vunpack.i.l.s16 %v524_v49  ;;  %v874_v54 = vunpack.i.l.s16 %v523_v48  ;;  %v443_v55 = vpack.c.b16 %v417_v34, %v417_v34  ;;  %v778_v57 = vunpack.c.l.b16 %v661_v52  ;;  %v395_v49 = vld [vmem:[#allocation6 + $0x20] sm:$0xf] }
  0x58   :  { %v662_v56 = vsel %vm646_vm0, %v402_v46, 0  ;;  %v875_v59 = vunpack.i.l.s16 %v527_v51  ;;  %v876_v60 = vunpack.i.l.s16 %v526_v50  ;;  %v445_v28 = vpack.c.b16 %v418_v41, %v418_v41 }
  0x59   :  { %v779_v61 = vunpack.c.l.b16 %v662_v56  ;;  %vm623_vm13 = vcmp.ne.s32.totalorder %v873_v53, %v1067_v8  ;;  %vm624_vm1 = vcmp.ne.s32.totalorder %v874_v54, %v1070_v9  ;;  %v444_v63 = vpack.c.b8 %v443_v55, %v443_v55  ;;  %v396_v54 = vld [vmem:[#allocation6 + $0x24] sm:$0xf] }
  0x5a   :  { %vm625_vm2 = vmpackc.low %vm624_vm1, %vm623_vm13  ;;  %vm630_vm3 = vcmp.ne.s32.totalorder %v875_v59, %v1067_v8  ;;  %vm631_vm4 = vcmp.ne.s32.totalorder %v876_v60, %v1070_v9  ;;  %v415_v40 = vunpack.c.0.s8 %v1169_v26  ;;  %v416_v3 = vunpack.c.1.s8 %v1169_v26  ;;  %v398_v26 = vld [vmem:[#allocation6 + $0x2c] sm:$0xf] }
  0x5b   :  { %v787_v0 = vpack.c.b16 %v779_v61, %v778_v57  ;;  %vm632_vm5 = vmpackc.low %vm631_vm4, %vm630_vm3  ;;  %v659_v1 = vsel %vm625_vm2, %v399_v58, 0  ;;  %vm465_vm6 = vnez %v444_v63  ;;  %v446_v7 = vpack.c.b8 %v445_v28, %v445_v28 }
  0x5c   :  { %v660_v5 = vsel %vm632_vm5, %v400_v62, 0  ;;  %v776_v6 = vunpack.c.l.b16 %v659_v1  ;;  %v481_v10 = vsel %vm465_vm6, 16843009, %v996_v2  ;;  %v439_v14 = vpack.c.b16 %v415_v40, %v415_v40 }
  0x5d   :  { %796 = vmatpush.bf16.msra.mxu1 %v787_v0  ;;  %v777_v11 = vunpack.c.l.b16 %v660_v5  ;;  %v517_v12 = vunpack.c.1.s8 %v481_v10  ;;  %v518_v13 = vunpack.c.0.s8 %v481_v10  ;;  %vm466_vm7 = vnez %v446_v7  ;;  %v393_v10 = vld [vmem:[#allocation6 + $0x18] sm:$0xf] }
  0x5e   :  { %v441_v15 = vpack.c.b16 %v416_v3, %v416_v3  ;;  %vm384_vm8 = vnez %v380_v4  ;;  %v482_v17 = vsel %vm466_vm7, 16843009, %v996_v2  ;;  %v440_v23 = vpack.c.b8 %v439_v14, %v439_v14 }
  0x5f   :  { %v786_v16 = vpack.c.b16 %v777_v11, %v776_v6  ;;  %v869_v18 = vunpack.i.l.s16 %v518_v13  ;;  %v870_v19 = vunpack.i.l.s16 %v517_v12  ;;  %v520_v21 = vunpack.c.1.s8 %v482_v17  ;;  %v394_v13 = vld [vmem:[#allocation6 + $0x1c] sm:$0xf] }
  0x60   :  { %v521_v22 = vunpack.c.0.s8 %v482_v17  ;;  %v442_v24 = vpack.c.b8 %v441_v15, %v441_v15  ;;  %v404_v25 = vsel %vm384_vm8, 16843009, %v996_v2  ;;  %vm463_vm12 = vnez %v440_v23 }
  0x61   :  { %797 = vmatpush.bf16.msra.mxu1 %v786_v16  ;;  %vm609_vm10 = vcmp.ne.s32.totalorder %v869_v18, %v1067_v8  ;;  %vm610_vm9 = vcmp.ne.s32.totalorder %v870_v19, %v1070_v9  ;;  %v872_v29 = vunpack.i.l.s16 %v520_v21  ;;  %v479_v31 = vsel %vm463_vm12, 16843009, %v996_v2 }
  0x62   :  { %vm611_vm11 = vmpackc.low %vm610_vm9, %vm609_vm10  ;;  %v871_v27 = vunpack.i.l.s16 %v521_v22  ;;  %vm464_vm14 = vnez %v442_v24  ;;  %v413_v33 = vunpack.c.2.s8 %v404_v25  ;;  %v511_v35 = vunpack.c.1.s8 %v479_v31 }
  0x63   :  { %v657_v30 = vsel %vm611_vm11, %v397_v20, 0  ;;  %v480_v32 = vsel %vm464_vm14, 16843009, %v996_v2  ;;  %vm617_vm0 = vcmp.ne.s32.totalorder %v872_v29, %v1070_v9  ;;  %v512_v36 = vunpack.c.0.s8 %v479_v31 }
  0x64   :  { %vm616_vm15 = vcmp.ne.s32.totalorder %v871_v27, %v1067_v8  ;;  %v774_v34 = vunpack.c.l.b16 %v657_v30  ;;  %v514_v37 = vunpack.c.1.s8 %v480_v32  ;;  %v515_v38 = vunpack.c.0.s8 %v480_v32  ;;  %v392_v30 = vld [vmem:[#allocation6 + $0x14] sm:$0xf] }
  0x65   :  { %vm618_vm13 = vmpackc.low %vm617_vm0, %vm616_vm15  ;;  %v414_v39 = vunpack.c.3.s8 %v404_v25  ;;  %v866_v42 = vunpack.i.l.s16 %v511_v35  ;;  %v435_v43 = vpack.c.b16 %v413_v33, %v413_v33  ;;  %v411_v44 = vunpack.c.0.s8 %v404_v25 }
  0x66   :  { %v658_v41 = vsel %vm618_vm13, %v398_v26, 0  ;;  %v865_v46 = vunpack.i.l.s16 %v512_v36  ;;  %v867_v47 = vunpack.i.l.s16 %v515_v38  ;;  %v868_v48 = vunpack.i.l.s16 %v514_v37  ;;  %v391_v26 = vld [vmem:[#allocation6 + $0x10] sm:$0xf]  ;;  %v379_v37 = vld [vmem:[%s1250_s6] sm:$0xff] }
  0x67   :  { %v775_v45 = vunpack.c.l.b16 %v658_v41  ;;  %vm596_vm1 = vcmp.ne.s32.totalorder %v866_v42, %v1070_v9  ;;  %v436_v50 = vpack.c.b8 %v435_v43, %v435_v43  ;;  %v437_v51 = vpack.c.b16 %v414_v39, %v414_v39 }
  0x68   :  { %v412_v52 = vunpack.c.1.s8 %v404_v25  ;;  %vm595_vm2 = vcmp.ne.s32.totalorder %v865_v46, %v1067_v8  ;;  %vm602_vm3 = vcmp.ne.s32.totalorder %v867_v47, %v1067_v8  ;;  %vm603_vm4 = vcmp.ne.s32.totalorder %v868_v48, %v1070_v9 }
  0x69   :  { %v785_v53 = vpack.c.b16 %v775_v45, %v774_v34  ;;  %vm597_vm5 = vmpackc.low %vm596_vm1, %vm595_vm2  ;;  %v438_v55 = vpack.c.b8 %v437_v51, %v437_v51  ;;  %vm461_vm6 = vnez %v436_v50  ;;  %v431_v56 = vpack.c.b16 %v411_v44, %v411_v44 }
  0x6a   :  { %v433_v57 = vpack.c.b16 %v412_v52, %v412_v52  ;;  %vm604_vm7 = vmpackc.low %vm603_vm4, %vm602_vm3  ;;  %v655_v58 = vsel %vm597_vm5, %v395_v49, 0  ;;  %v477_v59 = vsel %vm461_vm6, 16843009, %v996_v2 }
  0x6b   :  { %798 = vmatpush.bf16.msra.mxu1 %v785_v53  ;;  %v656_v60 = vsel %vm604_vm7, %v396_v54, 0  ;;  %v772_v61 = vunpack.c.l.b16 %v655_v58  ;;  %vm462_vm8 = vnez %v438_v55  ;;  %v505_v62 = vunpack.c.1.s8 %v477_v59 }
  0x6c   :  { %v773_v63 = vunpack.c.l.b16 %v656_v60  ;;  %v478_v28 = vsel %vm462_vm8, 16843009, %v996_v2  ;;  %v506_v40 = vunpack.c.0.s8 %v477_v59  ;;  %v432_v0 = vpack.c.b8 %v431_v56, %v431_v56 }
  0x6d   :  { %v508_v1 = vunpack.c.1.s8 %v478_v28  ;;  %v509_v3 = vunpack.c.0.s8 %v478_v28  ;;  %v862_v4 = vunpack.i.l.s16 %v505_v62  ;;  %v434_v5 = vpack.c.b8 %v433_v57, %v433_v57  ;;  %v389_v62 = vld [vmem:[#allocation6 + $0x8] sm:$0xf] }
  0x6e   :  { %v784_v6 = vpack.c.b16 %v773_v63, %v772_v61  ;;  %v861_v7 = vunpack.i.l.s16 %v506_v40  ;;  %vm459_vm10 = vnez %v432_v0  ;;  %vm383_vm7 = vnez %v379_v37  ;;  %v390_v63 = vld [vmem:[#allocation6 + $0xc] sm:$0xf] }
  0x6f   :  { %vm582_vm9 = vcmp.ne.s32.totalorder %v862_v4, %v1070_v9  ;;  %v863_v11 = vunpack.i.l.s16 %v509_v3  ;;  %v864_v12 = vunpack.i.l.s16 %v508_v1  ;;  %vm460_vm11 = vnez %v434_v5 }
  0x70   :  { %799 = vmatpush.bf16.msra.mxu1 %v784_v6  ;;  %vm581_vm12 = vcmp.ne.s32.totalorder %v861_v7, %v1067_v8  ;;  %v475_v14 = vsel %vm459_vm10, 16843009, %v996_v2  ;;  %v476_v15 = vsel %vm460_vm11, 16843009, %v996_v2  ;;  %v403_v38 = vsel %vm383_vm7, 16843009, %v996_v2 }
  0x71   :  { %vm583_vm14 = vmpackc.low %vm582_vm9, %vm581_vm12  ;;  %vm588_vm15 = vcmp.ne.s32.totalorder %v863_v11, %v1067_v8  ;;  %vm589_vm0 = vcmp.ne.s32.totalorder %v864_v12, %v1070_v9  ;;  %v499_v16 = vunpack.c.1.s8 %v475_v14  ;;  %v500_v17 = vunpack.c.0.s8 %v475_v14 }
  0x72   :  { %vm590_vm13 = vmpackc.low %vm589_vm0, %vm588_vm15  ;;  %v653_v18 = vsel %vm583_vm14, %v393_v10, 0  ;;  %v502_v19 = vunpack.c.1.s8 %v476_v15  ;;  %v503_v20 = vunpack.c.0.s8 %v476_v15  ;;  %v409_v39 = vunpack.c.2.s8 %v403_v38 }
  0x73   :  { %v654_v21 = vsel %vm590_vm13, %v394_v13, 0  ;;  %v770_v22 = vunpack.c.l.b16 %v653_v18  ;;  %v857_v23 = vunpack.i.l.s16 %v500_v17  ;;  %v858_v24 = vunpack.i.l.s16 %v499_v16  ;;  %v387_v13 = vld [vmem:[#allocation6] sm:$0xf]  ;;  %v388_v17 = vld [vmem:[#allocation6 + $0x4] sm:$0xf] }
  0x74   :  { %v771_v25 = vunpack.c.l.b16 %v654_v21  ;;  %v859_v27 = vunpack.i.l.s16 %v503_v20  ;;  %v860_v29 = vunpack.i.l.s16 %v502_v19  ;;  %v410_v41 = vunpack.c.3.s8 %v403_v38 }
  0x75   :  { %vm567_vm1 = vcmp.ne.s32.totalorder %v857_v23, %v1067_v8  ;;  %vm568_vm2 = vcmp.ne.s32.totalorder %v858_v24, %v1070_v9  ;;  %v427_v42 = vpack.c.b16 %v409_v39, %v409_v39  ;;  %v407_v46 = vunpack.c.0.s8 %v403_v38  ;;  %v663_v23 = vld [vmem:[%s1248_s4] sm:$0x1] }
  0x76   :  { %v783_v31 = vpack.c.b16 %v771_v25, %v770_v22  ;;  %vm569_vm3 = vmpackc.low %vm568_vm2, %vm567_vm1  ;;  %vm574_vm4 = vcmp.ne.s32.totalorder %v859_v27, %v1067_v8  ;;  %vm575_vm5 = vcmp.ne.s32.totalorder %v860_v29, %v1070_v9  ;;  %v429_v43 = vpack.c.b16 %v410_v41, %v410_v41 }
  0x77   :  { %vm576_vm6 = vmpackc.low %vm575_vm5, %vm574_vm4  ;;  %v651_v32 = vsel %vm569_vm3, %v391_v26, 0  ;;  %v428_v44 = vpack.c.b8 %v427_v42, %v427_v42  ;;  %v408_v47 = vunpack.c.1.s8 %v403_v38  ;;  %v423_v48 = vpack.c.b16 %v407_v46, %v407_v46  ;;  %v665_v26 = vld [vmem:[#allocation4] sm:$0x1] }
  0x78   :  { %800 = vmatpush.bf16.msra.mxu1 %v783_v31  ;;  %v652_v33 = vsel %vm576_vm6, %v392_v30, 0  ;;  %v768_v34 = vunpack.c.l.b16 %v651_v32  ;;  %v430_v45 = vpack.c.b8 %v429_v43, %v429_v43 }
  0x79   :  { %v769_v35 = vunpack.c.l.b16 %v652_v33  ;;  %vm457_vm8 = vnez %v428_v44  ;;  %v425_v49 = vpack.c.b16 %v408_v47, %v408_v47  ;;  %v424_v56 = vpack.c.b8 %v423_v48, %v423_v48  ;;  %v670_v33 = vld [vmem:[%s1252_s8] sm:$0x1] }
  0x7a   :  { %vm458_vm10 = vnez %v430_v45  ;;  %v473_v50 = vsel %vm457_vm8, 16843009, %v996_v2  ;;  %vm664_vm8 = vnez %v663_v23 }
  0x7b   :  { %v782_v36 = vpack.c.b16 %v769_v35, %v768_v34  ;;  %v474_v51 = vsel %vm458_vm10, 16843009, %v996_v2  ;;  %v493_v52 = vunpack.c.1.s8 %v473_v50  ;;  %v494_v53 = vunpack.c.0.s8 %v473_v50 }
  0x7c   :  { %v496_v54 = vunpack.c.1.s8 %v474_v51  ;;  %v497_v55 = vunpack.c.0.s8 %v474_v51  ;;  %v426_v57 = vpack.c.b8 %v425_v49, %v425_v49  ;;  %vm455_vm9 = vnez %v424_v56 }
  0x7d   :  { %801 = vmatpush.bf16.msra.mxu1 %v782_v36  ;;  %v853_v58 = vunpack.i.l.s16 %v494_v53  ;;  %v854_v59 = vunpack.i.l.s16 %v493_v52  ;;  %v471_v28 = vsel %vm455_vm9, 16843009, %v996_v2  ;;  %v666_v24 = vsel %vm664_vm8, 16843009, %v996_v2  ;;  %v672_v36 = vld [vmem:[#allocation7] sm:$0x1] }
  0x7e   :  { %v855_v60 = vunpack.i.l.s16 %v497_v55  ;;  %v856_v61 = vunpack.i.l.s16 %v496_v54  ;;  %vm456_vm11 = vnez %v426_v57  ;;  %v487_v1 = vunpack.c.1.s8 %v471_v28 }
  0x7f   :  { %vm553_vm12 = vcmp.ne.s32.totalorder %v853_v58, %v1067_v8  ;;  %vm554_vm14 = vcmp.ne.s32.totalorder %v854_v59, %v1070_v9  ;;  %v472_v0 = vsel %vm456_vm11, 16843009, %v996_v2  ;;  %v488_v3 = vunpack.c.0.s8 %v471_v28 }
  0x80   :  { %vm560_vm15 = vcmp.ne.s32.totalorder %v855_v60, %v1067_v8  ;;  %vm561_vm0 = vcmp.ne.s32.totalorder %v856_v61, %v1070_v9  ;;  %vm555_vm13 = vmpackc.low %vm554_vm14, %vm553_vm12  ;;  %v490_v6 = vunpack.c.1.s8 %v472_v0  ;;  %v491_v7 = vunpack.c.0.s8 %v472_v0 }
  0x81   :  { %vm562_vm1 = vmpackc.low %vm561_vm0, %vm560_vm15  ;;  %v649_v40 = vsel %vm555_vm13, %v389_v62, 0  ;;  %v849_v11 = vunpack.i.l.s16 %v488_v3  ;;  %v850_v12 = vunpack.i.l.s16 %v487_v1  ;;  %v667_v25 = vunpack.c.0.s8 %v666_v24 }
  0x82   :  { %v650_v4 = vsel %vm562_vm1, %v390_v63, 0  ;;  %v766_v5 = vunpack.c.l.b16 %v649_v40  ;;  %v851_v14 = vunpack.i.l.s16 %v491_v7  ;;  %v852_v15 = vunpack.i.l.s16 %v490_v6 }
  0x83   :  { %v767_v10 = vunpack.c.l.b16 %v650_v4  ;;  %vm539_vm2 = vcmp.ne.s32.totalorder %v849_v11, %v1067_v8  ;;  %vm540_vm3 = vcmp.ne.s32.totalorder %v850_v12, %v1070_v9  ;;  %vm668_vm10 = vcmp.ne.s32.totalorder %v667_v25, 0 }
  0x84   :  { %vm541_vm4 = vmpackc.low %vm540_vm3, %vm539_vm2  ;;  %vm546_vm5 = vcmp.ne.s32.totalorder %v851_v14, %v1067_v8  ;;  %vm547_vm6 = vcmp.ne.s32.totalorder %v852_v15, %v1070_v9  ;;  %v669_v8 = vsel %vm668_vm10, %v665_v26, 0.0  ;;  %vm671_vm9 = vnez %v670_v33 }
  0x85   :  { %v781_v16 = vpack.c.b16 %v767_v10, %v766_v5  ;;  %vm548_vm7 = vmpackc.low %vm547_vm6, %vm546_vm5  ;;  %v647_v18 = vsel %vm541_vm4, %v387_v13, 0  ;;  %v680_v9 = vperm.slane %v669_v8, 0  ;;  %v673_v34 = vsel %vm671_vm9, 16843009, %v996_v2 }
  0x86   :  { %v648_v19 = vsel %vm548_vm7, %v388_v17, 0  ;;  %v764_v20 = vunpack.c.l.b16 %v647_v18  ;;  %v674_v35 = vunpack.c.0.s8 %v673_v34 }
  0x87   :  { %802 = vmatpush.bf16.msra.mxu1 %v781_v16  ;;  %v765_v21 = vunpack.c.l.b16 %v648_v19 }
  0x88   :  { %vm675_vm11 = vcmp.ne.s32.totalorder %v674_v35, 0 }
  0x89   :  { %v780_v22 = vpack.c.b16 %v765_v21, %v764_v20  ;;  %v676_v37 = vsel %vm675_vm11, %v672_v36, 0.0 }
  0x8a   :  { %v746_v38 = vperm.slane %v676_v37, 0 }
  0x8b   :  { %803 = vmatpush.bf16.msra.mxu1 %v780_v22 }
  0xd4   :  { %v739_v27 = vpop.f32.mrf.mxu0 }
  0xd5   :  { %v740_v29 = vadd.f32 %v739_v27, %v680_v9 }
  0xd7   :  { %v743_v30 = vmax.f32 %v740_v29, 0.0 }
  0xd9   :  { %v744_v31 = vpack.c.bf16 %v743_v30, %v743_v30 }
  0xdb   :  { %804 = vmatmul.bf16.vlgmr.msra.gmra.mxu1 %v744_v31 }
  0xdc   :  { %v741_v32 = vpop.f32.mrf.mxu0 }
 0x158   :  { %v805_v39 = vpop.f32.mrf.mxu1 }
 0x159   :  { %v806_v41 = vadd.f32 %v805_v39, %v746_v38 }
 0x15b   :  { %809 = vst [vmem:[%s1253_s9] sm:$0xff] %v806_v41 }
 0x160   :  { %v807_v42 = vpop.f32.mrf.mxu1 }
 0x161   :  { %814 = vsyncpa [#allocation3], 1 }
 0x162   :  { %815 = vsyncpa [#allocation5], 1 }
 0x163   :  { %816 = vsyncpa [#allocation8], 1 }

</bundles_post_ra>
